<compile_context>
chip_gen: v5e
topology: v5e:2x2
jax: 0.10.0
libtpu: 0.0.40
codegen_flags: <defaults>
</compile_context>

<pallas_src>
import math

import jax
import jax.numpy as jnp
from jax import lax
from jax.experimental import pallas as pl
from jax.experimental.pallas import tpu as pltpu

NEG_SLOPE = 0.01   # PyTorch F.leaky_relu default slope
BN_EPS = 1e-5      # nn.BatchNorm1d default eps


# --------------------------- fused Pallas kernel -----------------------------

def fused_forward_kernel(emb_ref, bert_ref, adj_ref,
                         emb_w_ref, bert_w_ref, fc1_w_ref, fc2_w_ref,
                         bias_ref, w_all_ref, wg_all_ref, vec_all_ref, pool_ref,
                         o_ref):
    """One grid step = G graphs stacked to G*Np rows: input linears -> H GCN
    layers (block-diagonal adjacency) -> per-graph mean pool -> head."""
    f32 = jnp.float32
    bf16 = jnp.bfloat16

    biases = bias_ref[...]                        # (4, F) f32:
                                                  # [embedding_fc.b, bert_fc.b,
                                                  #  fc_rumor_1.b, fc_rumor_2.b(padded)]

    # --- input linears, all G graphs of the step at once (M = G*Np rows) -----
    x = jnp.dot(emb_ref[...], emb_w_ref[...],
                preferred_element_type=f32) + biases[0:1, :]          # (GN, F)
    text = jnp.dot(bert_ref[...], bert_w_ref[...],
                   preferred_element_type=f32) + biases[1:2, :]       # (G, F)

    n_hidden = w_all_ref.shape[0]

    # --- n_hidden dynamic-GCN propagation layers, in-kernel loop -------------
    # TODO(synk): GraphConvLayer / TemporalFusion_single internals are not in
    # the reference; standard GCN propagation (h = A_norm @ (X W) + b) and a
    # GRU-style gated fusion with the previous layer's features are used.
    def layer(i, x):
        a = adj_ref[i]                 # (GN, GN) bf16 block-diag adjacency (hop i)
        w = w_all_ref[i]               # (F, F)   bf16
        wg = wg_all_ref[i]             # (2F, F)  bf16  == [Wgx ; Wgh]
        vec = vec_all_ref[i]           # (4, F)   f32: b, bn_scale, bn_shift, bg
        b, bn_scale, bn_shift, bg = vec[0:1], vec[1:2], vec[2:3], vec[3:4]

        x_b = x.astype(bf16)           # hoisted: single cast reused below
        xw = jnp.dot(x_b, w, preferred_element_type=f32)
        h = jnp.dot(a, xw.astype(bf16), preferred_element_type=f32) + b

        # BatchNorm1d (eval mode, running stats pre-folded into scale/shift)
        h = h * bn_scale + bn_shift
        # LeakyReLU (dropout = identity at inference)
        h = jnp.where(h > 0, h, NEG_SLOPE * h)

        # TemporalFusion_single: z = sigmoid([h | last] @ Wg + bg)
        hl = jnp.concatenate([h.astype(bf16), x_b], axis=1)          # (GN, 2F)
        z = jax.nn.sigmoid(jnp.dot(hl, wg, preferred_element_type=f32) + bg)
        return z * h + (1.0 - z) * x

    x = lax.fori_loop(0, n_hidden, layer, x, unroll=True)

    # --- Mean_nBatch: per-graph mean via one (G, GN) @ (GN, F) MXU push ------
    # TODO(synk): assumes every graph has the same node count; ragged batches
    # would need a scalar-prefetched per-graph count baked into pool_ref rows.
    xg = jnp.dot(pool_ref[...], x.astype(bf16), preferred_element_type=f32)   # (G, F)

    # --- head for all G graphs at once: cat -> fc1 -> leaky_relu -> fc2 ------
    cat = jnp.concatenate([xg, text], axis=1).astype(bf16)           # (G, 2F)
    h1 = jnp.dot(cat, fc1_w_ref[...], preferred_element_type=f32) + biases[2:3, :]
    h1 = jnp.where(h1 > 0, h1, NEG_SLOPE * h1)
    logits = jnp.dot(h1.astype(bf16), fc2_w_ref[...],
                     preferred_element_type=f32) + biases[3:4, :]
    o_ref[...] = jax.nn.sigmoid(logits)          # lane-dense (G, 128) f32 store


# --------------------------- pallas_call wrapper ------------------------------

def dynamic_gcn_forward(params, node_emb, bert_pool, adj_all, graphs_per_step=8):
    """node_emb:  [B, Np, EMB]   f32 (stand-in for nn.Embedding lookup of data.x)
       bert_pool: [B, BERT]      f32 (stand-in for bert(...)['pooler_output'] per root)
       adj_all:   [B, H, Np, Np] f32 dense row-normalized per-graph adjacency snapshots."""
    B, n_per, emb_dim = node_emb.shape
    bert_dim = bert_pool.shape[1]
    H, F, _ = params["w_all"].shape
    out_pad = params["fc2_w"].shape[1]           # lane-dense padded class width (== F)
    n_class = params["n_class"]
    assert out_pad == F and n_class <= out_pad

    G = graphs_per_step
    assert B % G == 0, "batch must be a multiple of graphs_per_step"
    GN = G * n_per
    steps = B // G
    bf16 = jnp.bfloat16

    # Pre-cast streamed per-step inputs to bf16 (only arrays re-DMA'd per step).
    emb_in = node_emb.astype(bf16).reshape(steps, GN, emb_dim)
    bert_in = bert_pool.astype(bf16).reshape(steps, G, bert_dim)

    # Block-diagonal adjacency per (step, hop): one K=GN MXU push per layer.
    adj_g = adj_all.astype(bf16).reshape(steps, G, H, n_per, n_per)
    adj_bd = jnp.zeros((steps, H, GN, GN), bf16)
    for g in range(G):
        sl = slice(g * n_per, (g + 1) * n_per)
        adj_bd = adj_bd.at[:, :, sl, sl].set(adj_g[:, g])

    # Per-graph mean-pool matrix: row g has 1/Np over that graph's node rows.
    pool = jnp.kron(jnp.eye(G, dtype=jnp.float32),
                    jnp.full((1, n_per), 1.0 / n_per, jnp.float32)).astype(bf16)

    # --- VMEM budget & advisory cost estimate ---------------------------------
    def nbytes(shape, dtype):
        return math.prod(shape) * jnp.dtype(dtype).itemsize

    streamed = (nbytes((GN, emb_dim), bf16) + nbytes((G, bert_dim), bf16)
                + nbytes((H, GN, GN), bf16) + nbytes((G, out_pad), jnp.float32))
    resident = (nbytes((emb_dim, F), bf16) + nbytes((bert_dim, F), bf16)
                + nbytes((2 * F, F), bf16) + nbytes((F, out_pad), bf16)
                + nbytes((4, F), jnp.float32) + nbytes((H, F, F), bf16)
                + nbytes((H, 2 * F, F), bf16) + nbytes((H, 4, F), jnp.float32)
                + nbytes((G, GN), bf16))
    # streamed blocks double-buffered, weight stacks single-buffered (Buffered(1));
    # generous headroom for intermediates, capped below v7x's 64 MiB physical VMEM.
    vmem_limit = int(min(2 * streamed + resident + (16 << 20), 64 << 20))

    layer_flops = 2 * GN * F * F + 2 * GN * GN * F + 2 * GN * (2 * F) * F
    step_flops = (2 * GN * emb_dim * F + 2 * G * bert_dim * F + H * layer_flops
                  + 2 * G * GN * F + 2 * G * (2 * F) * F + 2 * G * F * out_pad)
    cost = pl.CostEstimate(
        flops=int(steps * step_flops),
        transcendentals=int(steps * (H * GN * F + G * out_pad)),
        bytes_accessed=int(steps * streamed + resident))

    const = dict(pipeline_mode=pl.Buffered(1))   # weights: DMA once, single-buffer

    out = pl.pallas_call(
        fused_forward_kernel,
        out_shape=jax.ShapeDtypeStruct((steps, G, out_pad), jnp.float32),
        grid_spec=pltpu.PrefetchScalarGridSpec(
            num_scalar_prefetch=0,
            grid=(steps,),
            in_specs=[
                # streamed per-step (double-buffered by default)
                pl.BlockSpec((None, GN, emb_dim), lambda s: (s, 0, 0)),
                pl.BlockSpec((None, G, bert_dim), lambda s: (s, 0, 0)),
                pl.BlockSpec((None, H, GN, GN), lambda s: (s, 0, 0, 0)),
                # constant block index => DMA'd once, single-buffered
                pl.BlockSpec((emb_dim, F), lambda s: (0, 0), **const),
                pl.BlockSpec((bert_dim, F), lambda s: (0, 0), **const),
                pl.BlockSpec((2 * F, F), lambda s: (0, 0), **const),
                pl.BlockSpec((F, out_pad), lambda s: (0, 0), **const),
                pl.BlockSpec((4, F), lambda s: (0, 0), **const),
                pl.BlockSpec((H, F, F), lambda s: (0, 0, 0), **const),
                pl.BlockSpec((H, 2 * F, F), lambda s: (0, 0, 0), **const),
                pl.BlockSpec((H, 4, F), lambda s: (0, 0, 0), **const),
                pl.BlockSpec((G, GN), lambda s: (0, 0), **const),
            ],
            out_specs=pl.BlockSpec((None, G, out_pad), lambda s: (s, 0, 0)),
        ),
        compiler_params=pltpu.CompilerParams(
            # graph-groups are fully independent -> shard across v7x's two TCs
            dimension_semantics=("parallel",),
            vmem_limit_bytes=vmem_limit),
        cost_estimate=cost,
    )(emb_in, bert_in, adj_bd,
      params["emb_w"], params["bert_w"], params["fc1_w"], params["fc2_w"],
      params["bias_pack"], params["w_all"], params["wg_all"], params["vec_all"],
      pool)

    return out.reshape(B, out_pad)[:, :n_class]


# --------------------------- parameter construction --------------------------

def init_params(key, emb_dim, bert_dim, n_feature, n_hidden, n_class):
    ks = iter(jax.random.split(key, 8 + 4 * n_hidden))
    out_pad = n_feature                        # lane-dense padded class width

    def lin(k, fan_in, fan_out):
        bound = 1.0 / (fan_in ** 0.5)
        return jax.random.uniform(k, (fan_in, fan_out), jnp.float32, -bound, bound)

    def vec(k, n):
        return jax.random.uniform(k, (n,), jnp.float32, -0.1, 0.1)

    emb_w = lin(next(ks), emb_dim, n_feature)
    bert_w = lin(next(ks), bert_dim, n_feature)
    fc1_w = lin(next(ks), 2 * n_feature, n_feature)
    fc2_w = jnp.pad(lin(next(ks), n_feature, n_class),
                    ((0, 0), (0, out_pad - n_class)))               # (F, 128)

    bias_pack = jnp.stack([
        vec(next(ks), n_feature),                                    # embedding_fc.b
        vec(next(ks), n_feature),                                    # bert_fc.b
        vec(next(ks), n_feature),                                    # fc_rumor_1.b
        jnp.pad(vec(next(ks), n_class), (0, n_feature - n_class)),   # fc_rumor_2.b
    ], axis=0)

    w_list, wg_list, vec_list = [], [], []
    for _ in range(n_hidden):
        w = lin(next(ks), n_feature, n_feature)
        wg = lin(next(ks), 2 * n_feature, n_feature)                 # [Wgx ; Wgh]
        b = vec(next(ks), n_feature)
        bg = vec(next(ks), n_feature)
        gamma = jnp.ones((n_feature,), jnp.float32)
        beta = jnp.zeros((n_feature,), jnp.float32)
        run_mean = jnp.zeros((n_feature,), jnp.float32)
        run_var = jnp.ones((n_feature,), jnp.float32)
        bn_scale = gamma * lax.rsqrt(run_var + BN_EPS)               # eval-mode BN folded
        bn_shift = beta - run_mean * bn_scale
        w_list.append(w)
        wg_list.append(wg)
        vec_list.append(jnp.stack([b, bn_scale, bn_shift, bg], axis=0))

    return {
        "emb_w": emb_w.astype(jnp.bfloat16),
        "bert_w": bert_w.astype(jnp.bfloat16),
        "fc1_w": fc1_w.astype(jnp.bfloat16),
        "fc2_w": fc2_w.astype(jnp.bfloat16),                         # (F, 128) padded
        "bias_pack": bias_pack,                                      # (4, F) f32
        "w_all": jnp.stack(w_list).astype(jnp.bfloat16),             # [H, F, F]
        "wg_all": jnp.stack(wg_list).astype(jnp.bfloat16),           # [H, 2F, F]
        "vec_all": jnp.stack(vec_list),                              # [H, 4, F] f32
        "n_class": n_class,
    }


# --------------------------- pure-JAX reference -------------------------------

def reference_forward(params, node_emb, bert_pool, adj_all):
    """f32 reference of the same forward (bf16 weights/inputs upcast)."""
    f32 = jnp.float32
    q = lambda a: a.astype(jnp.bfloat16).astype(f32)   # match kernel's input quantization
    emb_w = params["emb_w"].astype(f32)
    bert_w = params["bert_w"].astype(f32)
    fc1_w = params["fc1_w"].astype(f32)
    fc2_w = params["fc2_w"].astype(f32)
    w_all = params["w_all"].astype(f32)
    wg_all = params["wg_all"].astype(f32)
    bias = params["bias_pack"]
    vec_all = params["vec_all"]

    x = q(node_emb) @ emb_w + bias[0]                     # (B, Np, F)
    text = q(bert_pool) @ bert_w + bias[1]                # (B, F)
    for i in range(w_all.shape[0]):
        a = q(adj_all[:, i])                              # (B, Np, Np)
        vec = vec_all[i]
        h = jnp.einsum("bnm,bmf->bnf", a, x @ w_all[i]) + vec[0]
        h = h * vec[1] + vec[2]
        h = jnp.where(h > 0, h, NEG_SLOPE * h)
        z = jax.nn.sigmoid(jnp.concatenate([h, x], axis=-1) @ wg_all[i] + vec[3])
        x = z * h + (1.0 - z) * x
    xg = jnp.mean(x, axis=1)                              # (B, F)
    cat = jnp.concatenate([xg, text], axis=1)
    h1 = cat @ fc1_w + bias[2]
    h1 = jnp.where(h1 > 0, h1, NEG_SLOPE * h1)
    logits = h1 @ fc2_w + bias[3]
    return jax.nn.sigmoid(logits)[:, :params["n_class"]]


# --------------------------- main ---------------------------------------------

if __name__ == "__main__":
    B = 16           # graphs / root posts in the batch
    G = 8            # graphs per grid step -> G*Np = 128 node rows, grid = (2,)
    N_PER = 16       # propagation nodes per graph
    EMB_DIM = 32     # text_embedding.shape[1] (stand-in)
    BERT_DIM = 128   # BERT hidden size (stand-in)
    N_FEATURE = 128  # config.hidden_dim — lane-dense
    N_HIDDEN = 3     # config.n_hidden (3 adjacency snapshots)
    N_CLASS = 2      # config.n_class

    key = jax.random.PRNGKey(0)
    k_emb, k_bert, k_adj, k_param = jax.random.split(key, 4)

    # TODO(synk): the BERT encoder and nn.Embedding table gather (plus host-side
    # root-index bookkeeping) have no clean single-kernel Pallas equivalent;
    # their outputs are provided as kernel inputs.
    node_emb = jax.random.normal(k_emb, (B, N_PER, EMB_DIM), jnp.float32)
    bert_pool = jax.random.normal(k_bert, (B, BERT_DIM), jnp.float32)

    # Dense per-graph, per-snapshot row-normalized adjacency with self-loops
    # (dense equivalent of the sparse edge_index / edge_values lists).
    a = (jax.random.uniform(k_adj, (B, N_HIDDEN, N_PER, N_PER)) < 0.3).astype(jnp.float32)
    a = jnp.minimum(a + jnp.eye(N_PER, dtype=jnp.float32), 1.0)
    adj_all = a / jnp.sum(a, axis=-1, keepdims=True)       # [B, H, Np, Np]

    params = init_params(k_param, EMB_DIM, BERT_DIM, N_FEATURE, N_HIDDEN, N_CLASS)

    fwd = jax.jit(lambda ne, bp, ad: dynamic_gcn_forward(params, ne, bp, ad,
                                                         graphs_per_step=G))
    out = jax.block_until_ready(fwd(node_emb, bert_pool, adj_all))
    ref = reference_forward(params, node_emb, bert_pool, adj_all)

    assert out.shape == (B, N_CLASS)
    assert bool(jnp.all(jnp.isfinite(out)))
    assert bool(jnp.all((out >= 0.0) & (out <= 1.0)))       # sigmoid output
    assert float(jnp.max(jnp.abs(out - ref))) < 0.1         # bf16-vs-f32 tolerance
    print("KERNEL_OK")
</pallas_src>

<mosaic_0001>
module attributes {stable_mosaic.version = 11 : i64} {
  func.func @fused_forward_kernel(%arg0: i32, %arg1: memref<1x128x32xbf16, #tpu.memory_space<vmem>>, %arg2: memref<1x8x128xbf16, #tpu.memory_space<vmem>>, %arg3: memref<1x3x128x128xbf16, #tpu.memory_space<vmem>>, %arg4: memref<32x128xbf16, #tpu.memory_space<vmem>>, %arg5: memref<128x128xbf16, #tpu.memory_space<vmem>>, %arg6: memref<256x128xbf16, #tpu.memory_space<vmem>>, %arg7: memref<128x128xbf16, #tpu.memory_space<vmem>>, %arg8: memref<4x128xf32, #tpu.memory_space<vmem>>, %arg9: memref<3x128x128xbf16, #tpu.memory_space<vmem>>, %arg10: memref<3x256x128xbf16, #tpu.memory_space<vmem>>, %arg11: memref<3x4x128xf32, #tpu.memory_space<vmem>>, %arg12: memref<8x128xbf16, #tpu.memory_space<vmem>>, %arg13: memref<1x8x128xf32, #tpu.memory_space<vmem>>) attributes {dimension_semantics = [#tpu.dimension_semantics<parallel>], iteration_bounds = array<i64: 2>, scalar_prefetch = 0 : i64, scratch_operands = 0 : i64, tpu.core_type = #tpu.core_type<tc>, window_params = [{transform_indices = @transform_0, window_bounds = array<i64: 1, 128, 32>}, {transform_indices = @transform_1, window_bounds = array<i64: 1, 8, 128>}, {transform_indices = @transform_2, window_bounds = array<i64: 1, 3, 128, 128>}, {pipeline_mode = #tpu.pipeline_mode<synchronous>, transform_indices = @transform_3, window_bounds = array<i64: 32, 128>}, {pipeline_mode = #tpu.pipeline_mode<synchronous>, transform_indices = @transform_4, window_bounds = array<i64: 128, 128>}, {pipeline_mode = #tpu.pipeline_mode<synchronous>, transform_indices = @transform_5, window_bounds = array<i64: 256, 128>}, {pipeline_mode = #tpu.pipeline_mode<synchronous>, transform_indices = @transform_6, window_bounds = array<i64: 128, 128>}, {pipeline_mode = #tpu.pipeline_mode<synchronous>, transform_indices = @transform_7, window_bounds = array<i64: 4, 128>}, {pipeline_mode = #tpu.pipeline_mode<synchronous>, transform_indices = @transform_8, window_bounds = array<i64: 3, 128, 128>}, {pipeline_mode = #tpu.pipeline_mode<synchronous>, transform_indices = @transform_9, window_bounds = array<i64: 3, 256, 128>}, {pipeline_mode = #tpu.pipeline_mode<synchronous>, transform_indices = @transform_10, window_bounds = array<i64: 3, 4, 128>}, {pipeline_mode = #tpu.pipeline_mode<synchronous>, transform_indices = @transform_11, window_bounds = array<i64: 8, 128>}, {transform_indices = @transform_12, window_bounds = array<i64: 1, 8, 128>}]} {
    %c0 = arith.constant 0 : index
    %c0_0 = arith.constant 0 : index
    %0 = vector.load %arg8[%c0, %c0_0] : memref<4x128xf32, #tpu.memory_space<vmem>>, vector<4x128xf32>
    %c0_1 = arith.constant 0 : index
    %c0_2 = arith.constant 0 : index
    %c0_3 = arith.constant 0 : index
    %1 = vector.load %arg1[%c0_1, %c0_2, %c0_3] : memref<1x128x32xbf16, #tpu.memory_space<vmem>>, vector<1x128x32xbf16>
    %2 = vector.shape_cast %1 : vector<1x128x32xbf16> to vector<128x32xbf16>
    %c0_4 = arith.constant 0 : index
    %c0_5 = arith.constant 0 : index
    %3 = vector.load %arg4[%c0_4, %c0_5] : memref<32x128xbf16, #tpu.memory_space<vmem>>, vector<32x128xbf16>
    %cst = arith.constant dense<0.000000e+00> : vector<128x128xf32>
    %4 = tpu.matmul %2, %3, %cst {dimension_numbers = #tpu.dot_dimension_numbers<[1], [0], [0], [1], [0, 0, 1, 1], [], []>} : vector<128x32xbf16>, vector<32x128xbf16>, vector<128x128xf32> -> vector<128x128xf32>
    %5 = vector.extract_strided_slice %0 {offsets = [0, 0], sizes = [1, 128], strides = [1, 1]} : vector<4x128xf32> to vector<1x128xf32>
    %6 = vector.broadcast %5 : vector<1x128xf32> to vector<128x128xf32>
    %7 = arith.addf %4, %6 : vector<128x128xf32>
    %c0_6 = arith.constant 0 : index
    %c0_7 = arith.constant 0 : index
    %c0_8 = arith.constant 0 : index
    %8 = vector.load %arg2[%c0_6, %c0_7, %c0_8] : memref<1x8x128xbf16, #tpu.memory_space<vmem>>, vector<1x8x128xbf16>
    %9 = vector.shape_cast %8 : vector<1x8x128xbf16> to vector<8x128xbf16>
    %c0_9 = arith.constant 0 : index
    %c0_10 = arith.constant 0 : index
    %10 = vector.load %arg5[%c0_9, %c0_10] : memref<128x128xbf16, #tpu.memory_space<vmem>>, vector<128x128xbf16>
    %cst_11 = arith.constant dense<0.000000e+00> : vector<8x128xf32>
    %11 = tpu.matmul %9, %10, %cst_11 {dimension_numbers = #tpu.dot_dimension_numbers<[1], [0], [0], [1], [0, 0, 1, 1], [], []>} : vector<8x128xbf16>, vector<128x128xbf16>, vector<8x128xf32> -> vector<8x128xf32>
    %12 = vector.extract_strided_slice %0 {offsets = [1, 0], sizes = [1, 128], strides = [1, 1]} : vector<4x128xf32> to vector<1x128xf32>
    %13 = vector.broadcast %12 : vector<1x128xf32> to vector<8x128xf32>
    %14 = arith.addf %11, %13 : vector<8x128xf32>
    %c0_i32 = arith.constant 0 : i32
    %c0_12 = arith.constant 0 : index
    %15 = arith.index_cast %c0_i32 : i32 to index
    %c0_13 = arith.constant 0 : index
    %c0_14 = arith.constant 0 : index
    %16 = vector.load %arg3[%c0_12, %15, %c0_13, %c0_14] : memref<1x3x128x128xbf16, #tpu.memory_space<vmem>>, vector<1x1x128x128xbf16>
    %17 = vector.shape_cast %16 : vector<1x1x128x128xbf16> to vector<128x128xbf16>
    %18 = arith.index_cast %c0_i32 : i32 to index
    %c0_15 = arith.constant 0 : index
    %c0_16 = arith.constant 0 : index
    %19 = vector.load %arg9[%18, %c0_15, %c0_16] : memref<3x128x128xbf16, #tpu.memory_space<vmem>>, vector<1x128x128xbf16>
    %20 = vector.shape_cast %19 : vector<1x128x128xbf16> to vector<128x128xbf16>
    %21 = arith.index_cast %c0_i32 : i32 to index
    %c0_17 = arith.constant 0 : index
    %c0_18 = arith.constant 0 : index
    %22 = vector.load %arg10[%21, %c0_17, %c0_18] : memref<3x256x128xbf16, #tpu.memory_space<vmem>>, vector<1x256x128xbf16>
    %23 = vector.shape_cast %22 : vector<1x256x128xbf16> to vector<256x128xbf16>
    %24 = arith.index_cast %c0_i32 : i32 to index
    %c0_19 = arith.constant 0 : index
    %c0_20 = arith.constant 0 : index
    %25 = vector.load %arg11[%24, %c0_19, %c0_20] : memref<3x4x128xf32, #tpu.memory_space<vmem>>, vector<1x4x128xf32>
    %26 = vector.shape_cast %25 : vector<1x4x128xf32> to vector<4x128xf32>
    %27 = vector.extract_strided_slice %26 {offsets = [0, 0], sizes = [1, 128], strides = [1, 1]} : vector<4x128xf32> to vector<1x128xf32>
    %28 = vector.extract_strided_slice %26 {offsets = [1, 0], sizes = [1, 128], strides = [1, 1]} : vector<4x128xf32> to vector<1x128xf32>
    %29 = vector.extract_strided_slice %26 {offsets = [2, 0], sizes = [1, 128], strides = [1, 1]} : vector<4x128xf32> to vector<1x128xf32>
    %30 = vector.extract_strided_slice %26 {offsets = [3, 0], sizes = [1, 128], strides = [1, 1]} : vector<4x128xf32> to vector<1x128xf32>
    %31 = arith.truncf %7 : vector<128x128xf32> to vector<128x128xbf16>
    %cst_21 = arith.constant dense<0.000000e+00> : vector<128x128xf32>
    %32 = tpu.matmul %31, %20, %cst_21 {dimension_numbers = #tpu.dot_dimension_numbers<[1], [0], [0], [1], [0, 0, 1, 1], [], []>} : vector<128x128xbf16>, vector<128x128xbf16>, vector<128x128xf32> -> vector<128x128xf32>
    %33 = arith.truncf %32 : vector<128x128xf32> to vector<128x128xbf16>
    %cst_22 = arith.constant dense<0.000000e+00> : vector<128x128xf32>
    %34 = tpu.matmul %17, %33, %cst_22 {dimension_numbers = #tpu.dot_dimension_numbers<[1], [0], [0], [1], [0, 0, 1, 1], [], []>} : vector<128x128xbf16>, vector<128x128xbf16>, vector<128x128xf32> -> vector<128x128xf32>
    %35 = vector.broadcast %27 : vector<1x128xf32> to vector<128x128xf32>
    %36 = arith.addf %34, %35 : vector<128x128xf32>
    %37 = vector.broadcast %28 : vector<1x128xf32> to vector<128x128xf32>
    %38 = arith.mulf %36, %37 : vector<128x128xf32>
    %39 = vector.broadcast %29 : vector<1x128xf32> to vector<128x128xf32>
    %40 = arith.addf %38, %39 : vector<128x128xf32>
    %cst_23 = arith.constant 0.000000e+00 : f32
    %41 = vector.broadcast %cst_23 : f32 to vector<128x128xf32>
    %42 = arith.cmpf ogt, %40, %41 : vector<128x128xf32>
    %cst_24 = arith.constant 0.00999999977 : f32
    %43 = vector.broadcast %cst_24 : f32 to vector<128x128xf32>
    %44 = arith.mulf %43, %40 : vector<128x128xf32>
    %45 = arith.select %42, %40, %44 : vector<128x128xi1>, vector<128x128xf32>
    %46 = arith.truncf %45 : vector<128x128xf32> to vector<128x128xbf16>
    %47 = tpu.concatenate %46, %31 in 1 : vector<128x128xbf16>, vector<128x128xbf16> -> vector<128x256xbf16>
    %cst_25 = arith.constant dense<0.000000e+00> : vector<128x128xf32>
    %48 = tpu.matmul %47, %23, %cst_25 {dimension_numbers = #tpu.dot_dimension_numbers<[1], [0], [0], [1], [0, 0, 1, 1], [], []>} : vector<128x256xbf16>, vector<256x128xbf16>, vector<128x128xf32> -> vector<128x128xf32>
    %49 = vector.broadcast %30 : vector<1x128xf32> to vector<128x128xf32>
    %50 = arith.addf %48, %49 : vector<128x128xf32>
    %51 = arith.negf %50 : vector<128x128xf32>
    %52 = math.exp %51 : vector<128x128xf32>
    %cst_26 = arith.constant 1.000000e+00 : f32
    %53 = vector.broadcast %cst_26 : f32 to vector<128x128xf32>
    %54 = arith.addf %53, %52 : vector<128x128xf32>
    %55 = arith.divf %53, %54 : vector<128x128xf32>
    %56 = arith.mulf %55, %45 : vector<128x128xf32>
    %cst_27 = arith.constant 1.000000e+00 : f32
    %57 = vector.broadcast %cst_27 : f32 to vector<128x128xf32>
    %58 = arith.subf %57, %55 : vector<128x128xf32>
    %59 = arith.mulf %58, %7 : vector<128x128xf32>
    %60 = arith.addf %56, %59 : vector<128x128xf32>
    %c1_i32 = arith.constant 1 : i32
    %c0_28 = arith.constant 0 : index
    %61 = arith.index_cast %c1_i32 : i32 to index
    %c0_29 = arith.constant 0 : index
    %c0_30 = arith.constant 0 : index
    %62 = vector.load %arg3[%c0_28, %61, %c0_29, %c0_30] : memref<1x3x128x128xbf16, #tpu.memory_space<vmem>>, vector<1x1x128x128xbf16>
    %63 = vector.shape_cast %62 : vector<1x1x128x128xbf16> to vector<128x128xbf16>
    %64 = arith.index_cast %c1_i32 : i32 to index
    %c0_31 = arith.constant 0 : index
    %c0_32 = arith.constant 0 : index
    %65 = vector.load %arg9[%64, %c0_31, %c0_32] : memref<3x128x128xbf16, #tpu.memory_space<vmem>>, vector<1x128x128xbf16>
    %66 = vector.shape_cast %65 : vector<1x128x128xbf16> to vector<128x128xbf16>
    %67 = arith.index_cast %c1_i32 : i32 to index
    %c0_33 = arith.constant 0 : index
    %c0_34 = arith.constant 0 : index
    %68 = vector.load %arg10[%67, %c0_33, %c0_34] : memref<3x256x128xbf16, #tpu.memory_space<vmem>>, vector<1x256x128xbf16>
    %69 = vector.shape_cast %68 : vector<1x256x128xbf16> to vector<256x128xbf16>
    %70 = arith.index_cast %c1_i32 : i32 to index
    %c0_35 = arith.constant 0 : index
    %c0_36 = arith.constant 0 : index
    %71 = vector.load %arg11[%70, %c0_35, %c0_36] : memref<3x4x128xf32, #tpu.memory_space<vmem>>, vector<1x4x128xf32>
    %72 = vector.shape_cast %71 : vector<1x4x128xf32> to vector<4x128xf32>
    %73 = vector.extract_strided_slice %72 {offsets = [0, 0], sizes = [1, 128], strides = [1, 1]} : vector<4x128xf32> to vector<1x128xf32>
    %74 = vector.extract_strided_slice %72 {offsets = [1, 0], sizes = [1, 128], strides = [1, 1]} : vector<4x128xf32> to vector<1x128xf32>
    %75 = vector.extract_strided_slice %72 {offsets = [2, 0], sizes = [1, 128], strides = [1, 1]} : vector<4x128xf32> to vector<1x128xf32>
    %76 = vector.extract_strided_slice %72 {offsets = [3, 0], sizes = [1, 128], strides = [1, 1]} : vector<4x128xf32> to vector<1x128xf32>
    %77 = arith.truncf %60 : vector<128x128xf32> to vector<128x128xbf16>
    %cst_37 = arith.constant dense<0.000000e+00> : vector<128x128xf32>
    %78 = tpu.matmul %77, %66, %cst_37 {dimension_numbers = #tpu.dot_dimension_numbers<[1], [0], [0], [1], [0, 0, 1, 1], [], []>} : vector<128x128xbf16>, vector<128x128xbf16>, vector<128x128xf32> -> vector<128x128xf32>
    %79 = arith.truncf %78 : vector<128x128xf32> to vector<128x128xbf16>
    %cst_38 = arith.constant dense<0.000000e+00> : vector<128x128xf32>
    %80 = tpu.matmul %63, %79, %cst_38 {dimension_numbers = #tpu.dot_dimension_numbers<[1], [0], [0], [1], [0, 0, 1, 1], [], []>} : vector<128x128xbf16>, vector<128x128xbf16>, vector<128x128xf32> -> vector<128x128xf32>
    %81 = vector.broadcast %73 : vector<1x128xf32> to vector<128x128xf32>
    %82 = arith.addf %80, %81 : vector<128x128xf32>
    %83 = vector.broadcast %74 : vector<1x128xf32> to vector<128x128xf32>
    %84 = arith.mulf %82, %83 : vector<128x128xf32>
    %85 = vector.broadcast %75 : vector<1x128xf32> to vector<128x128xf32>
    %86 = arith.addf %84, %85 : vector<128x128xf32>
    %cst_39 = arith.constant 0.000000e+00 : f32
    %87 = vector.broadcast %cst_39 : f32 to vector<128x128xf32>
    %88 = arith.cmpf ogt, %86, %87 : vector<128x128xf32>
    %cst_40 = arith.constant 0.00999999977 : f32
    %89 = vector.broadcast %cst_40 : f32 to vector<128x128xf32>
    %90 = arith.mulf %89, %86 : vector<128x128xf32>
    %91 = arith.select %88, %86, %90 : vector<128x128xi1>, vector<128x128xf32>
    %92 = arith.truncf %91 : vector<128x128xf32> to vector<128x128xbf16>
    %93 = tpu.concatenate %92, %77 in 1 : vector<128x128xbf16>, vector<128x128xbf16> -> vector<128x256xbf16>
    %cst_41 = arith.constant dense<0.000000e+00> : vector<128x128xf32>
    %94 = tpu.matmul %93, %69, %cst_41 {dimension_numbers = #tpu.dot_dimension_numbers<[1], [0], [0], [1], [0, 0, 1, 1], [], []>} : vector<128x256xbf16>, vector<256x128xbf16>, vector<128x128xf32> -> vector<128x128xf32>
    %95 = vector.broadcast %76 : vector<1x128xf32> to vector<128x128xf32>
    %96 = arith.addf %94, %95 : vector<128x128xf32>
    %97 = arith.negf %96 : vector<128x128xf32>
    %98 = math.exp %97 : vector<128x128xf32>
    %cst_42 = arith.constant 1.000000e+00 : f32
    %99 = vector.broadcast %cst_42 : f32 to vector<128x128xf32>
    %100 = arith.addf %99, %98 : vector<128x128xf32>
    %101 = arith.divf %99, %100 : vector<128x128xf32>
    %102 = arith.mulf %101, %91 : vector<128x128xf32>
    %cst_43 = arith.constant 1.000000e+00 : f32
    %103 = vector.broadcast %cst_43 : f32 to vector<128x128xf32>
    %104 = arith.subf %103, %101 : vector<128x128xf32>
    %105 = arith.mulf %104, %60 : vector<128x128xf32>
    %106 = arith.addf %102, %105 : vector<128x128xf32>
    %c2_i32 = arith.constant 2 : i32
    %c0_44 = arith.constant 0 : index
    %107 = arith.index_cast %c2_i32 : i32 to index
    %c0_45 = arith.constant 0 : index
    %c0_46 = arith.constant 0 : index
    %108 = vector.load %arg3[%c0_44, %107, %c0_45, %c0_46] : memref<1x3x128x128xbf16, #tpu.memory_space<vmem>>, vector<1x1x128x128xbf16>
    %109 = vector.shape_cast %108 : vector<1x1x128x128xbf16> to vector<128x128xbf16>
    %110 = arith.index_cast %c2_i32 : i32 to index
    %c0_47 = arith.constant 0 : index
    %c0_48 = arith.constant 0 : index
    %111 = vector.load %arg9[%110, %c0_47, %c0_48] : memref<3x128x128xbf16, #tpu.memory_space<vmem>>, vector<1x128x128xbf16>
    %112 = vector.shape_cast %111 : vector<1x128x128xbf16> to vector<128x128xbf16>
    %113 = arith.index_cast %c2_i32 : i32 to index
    %c0_49 = arith.constant 0 : index
    %c0_50 = arith.constant 0 : index
    %114 = vector.load %arg10[%113, %c0_49, %c0_50] : memref<3x256x128xbf16, #tpu.memory_space<vmem>>, vector<1x256x128xbf16>
    %115 = vector.shape_cast %114 : vector<1x256x128xbf16> to vector<256x128xbf16>
    %116 = arith.index_cast %c2_i32 : i32 to index
    %c0_51 = arith.constant 0 : index
    %c0_52 = arith.constant 0 : index
    %117 = vector.load %arg11[%116, %c0_51, %c0_52] : memref<3x4x128xf32, #tpu.memory_space<vmem>>, vector<1x4x128xf32>
    %118 = vector.shape_cast %117 : vector<1x4x128xf32> to vector<4x128xf32>
    %119 = vector.extract_strided_slice %118 {offsets = [0, 0], sizes = [1, 128], strides = [1, 1]} : vector<4x128xf32> to vector<1x128xf32>
    %120 = vector.extract_strided_slice %118 {offsets = [1, 0], sizes = [1, 128], strides = [1, 1]} : vector<4x128xf32> to vector<1x128xf32>
    %121 = vector.extract_strided_slice %118 {offsets = [2, 0], sizes = [1, 128], strides = [1, 1]} : vector<4x128xf32> to vector<1x128xf32>
    %122 = vector.extract_strided_slice %118 {offsets = [3, 0], sizes = [1, 128], strides = [1, 1]} : vector<4x128xf32> to vector<1x128xf32>
    %123 = arith.truncf %106 : vector<128x128xf32> to vector<128x128xbf16>
    %cst_53 = arith.constant dense<0.000000e+00> : vector<128x128xf32>
    %124 = tpu.matmul %123, %112, %cst_53 {dimension_numbers = #tpu.dot_dimension_numbers<[1], [0], [0], [1], [0, 0, 1, 1], [], []>} : vector<128x128xbf16>, vector<128x128xbf16>, vector<128x128xf32> -> vector<128x128xf32>
    %125 = arith.truncf %124 : vector<128x128xf32> to vector<128x128xbf16>
    %cst_54 = arith.constant dense<0.000000e+00> : vector<128x128xf32>
    %126 = tpu.matmul %109, %125, %cst_54 {dimension_numbers = #tpu.dot_dimension_numbers<[1], [0], [0], [1], [0, 0, 1, 1], [], []>} : vector<128x128xbf16>, vector<128x128xbf16>, vector<128x128xf32> -> vector<128x128xf32>
    %127 = vector.broadcast %119 : vector<1x128xf32> to vector<128x128xf32>
    %128 = arith.addf %126, %127 : vector<128x128xf32>
    %129 = vector.broadcast %120 : vector<1x128xf32> to vector<128x128xf32>
    %130 = arith.mulf %128, %129 : vector<128x128xf32>
    %131 = vector.broadcast %121 : vector<1x128xf32> to vector<128x128xf32>
    %132 = arith.addf %130, %131 : vector<128x128xf32>
    %cst_55 = arith.constant 0.000000e+00 : f32
    %133 = vector.broadcast %cst_55 : f32 to vector<128x128xf32>
    %134 = arith.cmpf ogt, %132, %133 : vector<128x128xf32>
    %cst_56 = arith.constant 0.00999999977 : f32
    %135 = vector.broadcast %cst_56 : f32 to vector<128x128xf32>
    %136 = arith.mulf %135, %132 : vector<128x128xf32>
    %137 = arith.select %134, %132, %136 : vector<128x128xi1>, vector<128x128xf32>
    %138 = arith.truncf %137 : vector<128x128xf32> to vector<128x128xbf16>
    %139 = tpu.concatenate %138, %123 in 1 : vector<128x128xbf16>, vector<128x128xbf16> -> vector<128x256xbf16>
    %cst_57 = arith.constant dense<0.000000e+00> : vector<128x128xf32>
    %140 = tpu.matmul %139, %115, %cst_57 {dimension_numbers = #tpu.dot_dimension_numbers<[1], [0], [0], [1], [0, 0, 1, 1], [], []>} : vector<128x256xbf16>, vector<256x128xbf16>, vector<128x128xf32> -> vector<128x128xf32>
    %141 = vector.broadcast %122 : vector<1x128xf32> to vector<128x128xf32>
    %142 = arith.addf %140, %141 : vector<128x128xf32>
    %143 = arith.negf %142 : vector<128x128xf32>
    %144 = math.exp %143 : vector<128x128xf32>
    %cst_58 = arith.constant 1.000000e+00 : f32
    %145 = vector.broadcast %cst_58 : f32 to vector<128x128xf32>
    %146 = arith.addf %145, %144 : vector<128x128xf32>
    %147 = arith.divf %145, %146 : vector<128x128xf32>
    %148 = arith.mulf %147, %137 : vector<128x128xf32>
    %cst_59 = arith.constant 1.000000e+00 : f32
    %149 = vector.broadcast %cst_59 : f32 to vector<128x128xf32>
    %150 = arith.subf %149, %147 : vector<128x128xf32>
    %151 = arith.mulf %150, %106 : vector<128x128xf32>
    %152 = arith.addf %148, %151 : vector<128x128xf32>
    %c3_i32 = arith.constant 3 : i32
    %c0_60 = arith.constant 0 : index
    %c0_61 = arith.constant 0 : index
    %153 = vector.load %arg12[%c0_60, %c0_61] : memref<8x128xbf16, #tpu.memory_space<vmem>>, vector<8x128xbf16>
    %154 = arith.truncf %152 : vector<128x128xf32> to vector<128x128xbf16>
    %cst_62 = arith.constant dense<0.000000e+00> : vector<8x128xf32>
    %155 = tpu.matmul %153, %154, %cst_62 {dimension_numbers = #tpu.dot_dimension_numbers<[1], [0], [0], [1], [0, 0, 1, 1], [], []>} : vector<8x128xbf16>, vector<128x128xbf16>, vector<8x128xf32> -> vector<8x128xf32>
    %156 = tpu.concatenate %155, %14 in 1 : vector<8x128xf32>, vector<8x128xf32> -> vector<8x256xf32>
    %157 = arith.truncf %156 : vector<8x256xf32> to vector<8x256xbf16>
    %c0_63 = arith.constant 0 : index
    %c0_64 = arith.constant 0 : index
    %158 = vector.load %arg6[%c0_63, %c0_64] : memref<256x128xbf16, #tpu.memory_space<vmem>>, vector<256x128xbf16>
    %cst_65 = arith.constant dense<0.000000e+00> : vector<8x128xf32>
    %159 = tpu.matmul %157, %158, %cst_65 {dimension_numbers = #tpu.dot_dimension_numbers<[1], [0], [0], [1], [0, 0, 1, 1], [], []>} : vector<8x256xbf16>, vector<256x128xbf16>, vector<8x128xf32> -> vector<8x128xf32>
    %160 = vector.extract_strided_slice %0 {offsets = [2, 0], sizes = [1, 128], strides = [1, 1]} : vector<4x128xf32> to vector<1x128xf32>
    %161 = vector.broadcast %160 : vector<1x128xf32> to vector<8x128xf32>
    %162 = arith.addf %159, %161 : vector<8x128xf32>
    %cst_66 = arith.constant 0.000000e+00 : f32
    %163 = vector.broadcast %cst_66 : f32 to vector<8x128xf32>
    %164 = arith.cmpf ogt, %162, %163 : vector<8x128xf32>
    %cst_67 = arith.constant 0.00999999977 : f32
    %165 = vector.broadcast %cst_67 : f32 to vector<8x128xf32>
    %166 = arith.mulf %165, %162 : vector<8x128xf32>
    %167 = arith.select %164, %162, %166 : vector<8x128xi1>, vector<8x128xf32>
    %168 = arith.truncf %167 : vector<8x128xf32> to vector<8x128xbf16>
    %c0_68 = arith.constant 0 : index
    %c0_69 = arith.constant 0 : index
    %169 = vector.load %arg7[%c0_68, %c0_69] : memref<128x128xbf16, #tpu.memory_space<vmem>>, vector<128x128xbf16>
    %cst_70 = arith.constant dense<0.000000e+00> : vector<8x128xf32>
    %170 = tpu.matmul %168, %169, %cst_70 {dimension_numbers = #tpu.dot_dimension_numbers<[1], [0], [0], [1], [0, 0, 1, 1], [], []>} : vector<8x128xbf16>, vector<128x128xbf16>, vector<8x128xf32> -> vector<8x128xf32>
    %171 = vector.extract_strided_slice %0 {offsets = [3, 0], sizes = [1, 128], strides = [1, 1]} : vector<4x128xf32> to vector<1x128xf32>
    %172 = vector.broadcast %171 : vector<1x128xf32> to vector<8x128xf32>
    %173 = arith.addf %170, %172 : vector<8x128xf32>
    %174 = arith.negf %173 : vector<8x128xf32>
    %175 = math.exp %174 : vector<8x128xf32>
    %cst_71 = arith.constant 1.000000e+00 : f32
    %176 = vector.broadcast %cst_71 : f32 to vector<8x128xf32>
    %177 = arith.addf %176, %175 : vector<8x128xf32>
    %178 = arith.divf %176, %177 : vector<8x128xf32>
    %c0_72 = arith.constant 0 : index
    %c0_73 = arith.constant 0 : index
    %c0_74 = arith.constant 0 : index
    %179 = vector.load %arg13[%c0_72, %c0_73, %c0_74] : memref<1x8x128xf32, #tpu.memory_space<vmem>>, vector<1x8x128xf32>
    %180 = vector.shape_cast %179 : vector<1x8x128xf32> to vector<8x128xf32>
    %181 = vector.shape_cast %178 : vector<8x128xf32> to vector<1x8x128xf32>
    tpu.vector_store %arg13[%c0_72, %c0_73, %c0_74], %181 {strides = array<i32>} : memref<1x8x128xf32, #tpu.memory_space<vmem>>, vector<1x8x128xf32>,
    return
  }
  func.func @transform_0(%arg0: i32) -> (i32, i32, i32) {
    %c0_i32 = arith.constant 0 : i32
    %c0_i32_0 = arith.constant 0 : i32
    %c0_i32_1 = arith.constant 0 : i32
    return %arg0, %c0_i32, %c0_i32_0 : i32, i32, i32
  }
  func.func @transform_1(%arg0: i32) -> (i32, i32, i32) {
    %c0_i32 = arith.constant 0 : i32
    %c0_i32_0 = arith.constant 0 : i32
    %c0_i32_1 = arith.constant 0 : i32
    return %arg0, %c0_i32, %c0_i32_0 : i32, i32, i32
  }
  func.func @transform_2(%arg0: i32) -> (i32, i32, i32, i32) {
    %c0_i32 = arith.constant 0 : i32
    %c0_i32_0 = arith.constant 0 : i32
    %c0_i32_1 = arith.constant 0 : i32
    %c0_i32_2 = arith.constant 0 : i32
    return %arg0, %c0_i32, %c0_i32_0, %c0_i32_1 : i32, i32, i32, i32
  }
  func.func @transform_3(%arg0: i32) -> (i32, i32) {
    %c0_i32 = arith.constant 0 : i32
    %c0_i32_0 = arith.constant 0 : i32
    %c0_i32_1 = arith.constant 0 : i32
    return %c0_i32, %c0_i32_0 : i32, i32
  }
  func.func @transform_4(%arg0: i32) -> (i32, i32) {
    %c0_i32 = arith.constant 0 : i32
    %c0_i32_0 = arith.constant 0 : i32
    %c0_i32_1 = arith.constant 0 : i32
    return %c0_i32, %c0_i32_0 : i32, i32
  }
  func.func @transform_5(%arg0: i32) -> (i32, i32) {
    %c0_i32 = arith.constant 0 : i32
    %c0_i32_0 = arith.constant 0 : i32
    %c0_i32_1 = arith.constant 0 : i32
    return %c0_i32, %c0_i32_0 : i32, i32
  }
  func.func @transform_6(%arg0: i32) -> (i32, i32) {
    %c0_i32 = arith.constant 0 : i32
    %c0_i32_0 = arith.constant 0 : i32
    %c0_i32_1 = arith.constant 0 : i32
    return %c0_i32, %c0_i32_0 : i32, i32
  }
  func.func @transform_7(%arg0: i32) -> (i32, i32) {
    %c0_i32 = arith.constant 0 : i32
    %c0_i32_0 = arith.constant 0 : i32
    %c0_i32_1 = arith.constant 0 : i32
    return %c0_i32, %c0_i32_0 : i32, i32
  }
  func.func @transform_8(%arg0: i32) -> (i32, i32, i32) {
    %c0_i32 = arith.constant 0 : i32
    %c0_i32_0 = arith.constant 0 : i32
    %c0_i32_1 = arith.constant 0 : i32
    %c0_i32_2 = arith.constant 0 : i32
    return %c0_i32, %c0_i32_0, %c0_i32_1 : i32, i32, i32
  }
  func.func @transform_9(%arg0: i32) -> (i32, i32, i32) {
    %c0_i32 = arith.constant 0 : i32
    %c0_i32_0 = arith.constant 0 : i32
    %c0_i32_1 = arith.constant 0 : i32
    %c0_i32_2 = arith.constant 0 : i32
    return %c0_i32, %c0_i32_0, %c0_i32_1 : i32, i32, i32
  }
  func.func @transform_10(%arg0: i32) -> (i32, i32, i32) {
    %c0_i32 = arith.constant 0 : i32
    %c0_i32_0 = arith.constant 0 : i32
    %c0_i32_1 = arith.constant 0 : i32
    %c0_i32_2 = arith.constant 0 : i32
    return %c0_i32, %c0_i32_0, %c0_i32_1 : i32, i32, i32
  }
  func.func @transform_11(%arg0: i32) -> (i32, i32) {
    %c0_i32 = arith.constant 0 : i32
    %c0_i32_0 = arith.constant 0 : i32
    %c0_i32_1 = arith.constant 0 : i32
    return %c0_i32, %c0_i32_0 : i32, i32
  }
  func.func @transform_12(%arg0: i32) -> (i32, i32, i32) {
    %c0_i32 = arith.constant 0 : i32
    %c0_i32_0 = arith.constant 0 : i32
    %c0_i32_1 = arith.constant 0 : i32
    return %arg0, %c0_i32, %c0_i32_0 : i32, i32, i32
  }
}

</mosaic_0001>

<bundles_post_ra>
// kernel: _lambda_.1
= control target key start
LH: loop header
LB: loop body
LE: loop exit
PB: predicated region body
PF: predicated region fallthrough
CT: control target
= control target key end

     0   :  { %s5337_s21 = smov 0   ;;  %s6897_s0 = inlined_call_operand.vmem [shape: bf16[2,128,32], index: 0, kind: input, shape index: {}]   ;;  %s6898_s1 = inlined_call_operand.vmem [shape: bf16[2,8,128], index: 1, kind: input, shape index: {}]   ;;  %s6899_s2 = inlined_call_operand.vmem [shape: bf16[2,3,128,128], index: 2, kind: input, shape index: {}]   ;;  %s6900_s3 = inlined_call_operand.vmem [shape: bf16[32,128], index: 3, kind: input, shape index: {}]   ;;  %s6901_s4 = inlined_call_operand.vmem [shape: bf16[128,128], index: 4, kind: input, shape index: {}]   ;;  %s6902_s5 = inlined_call_operand.vmem [shape: bf16[256,128], index: 5, kind: input, shape index: {}]   ;;  %s6903_s6 = inlined_call_operand.vmem [shape: bf16[128,128], index: 6, kind: input, shape index: {}]   ;;  %s6904_s7 = inlined_call_operand.vmem [shape: f32[4,128], index: 7, kind: input, shape index: {}]   ;;  %s6905_s8 = inlined_call_operand.vmem [shape: bf16[3,128,128], index: 8, kind: input, shape index: {}]   ;;  %s6906_s9 = inlined_call_operand.vmem [shape: bf16[3,256,128], index: 9, kind: input, shape index: {}]   ;;  %s6907_s10 = inlined_call_operand.vmem [shape: f32[3,4,128], index: 10, kind: input, shape index: {}]   ;;  %s6908_s11 = inlined_call_operand.vmem [shape: bf16[8,128], index: 11, kind: input, shape index: {}]   ;;  %s6909_s12 = inlined_call_operand.vmem [shape: f32[2,8,128], index: 12, kind: output, shape index: {}]  }
   0x1 LB: > { %s4166_s22 = sadd.s32 4294967295, %s5270_s21   ;;  %p4170_p0 = scmp.ge.s32.totalorder %s5270_s21, 1  ;;  %s5270_s21 = sphi %s5337_s21, %s22_s21  }
   0x2   : > { %p381_p1 = scmp.lt.s32.totalorder %s5270_s21, 3 }
   0x4   : > { %p382_p2 = pnand %p4170_p0, %p381_p1 }
   0x6   : > { %385 = sbr.rel (%p382_p2) target bundleno = 2592 (0xa20), region = 68 }
   0xb   : > { %v4927_v0 = vld [vmem:[%s6900_s3 + $0x8] sm:$0xff]  ;;  %p431_p3 = scmp.lt.s32.totalorder %s4166_s22, 1  ;;  %v4926_v1 = vld [vmem:[%s6900_s3] sm:$0xff]  ;;  %vm524_vm0 = vcmask 261120   ;;  %v4951_v6 = vld [vmem:[%s6905_s8 + $0x38] sm:$0xff] }
   0xc   : > { %555 = vmatpush.bf16.msra.mxu0 %v4927_v0  ;;  %5056 = vmatpush.bf16.msra.mxu3 %v4927_v0  ;;  %v4967_v7 = vld [vmem:[%s6906_s9 + $0x78] sm:$0xff]  ;;  %v4950_v8 = vld [vmem:[%s6905_s8 + $0x30] sm:$0xff]  ;;  %v4949_v10 = vld [vmem:[%s6905_s8 + $0x28] sm:$0xff] }
   0xd   : > { %s6937_s22 = smov (!%p431_p3, %s4166_s22), 1  ;;  %854 = vmatpush.bf16.msra.mxu2 %v4951_v6  ;;  %v4966_v9 = vld [vmem:[%s6906_s9 + $0x70] sm:$0xff]  ;;  %v4965_v11 = vld [vmem:[%s6906_s9 + $0x68] sm:$0xff]  ;;  %v4948_v13 = vld [vmem:[%s6905_s8 + $0x20] sm:$0xff] }
   0xe   : > { %s4917_s27 = sshll.u32 %s6937_s22, 6  ;;  %v4964_v14 = vld [vmem:[%s6906_s9 + $0x60] sm:$0xff]  ;;  %v4947_v18 = vld [vmem:[%s6905_s8 + $0x18] sm:$0xff]  ;;  %v4946_v20 = vld [vmem:[%s6905_s8 + $0x10] sm:$0xff]  ;;  %s5058_s16 = smul.u32 192, %s6937_s22 }
   0xf   : > { %s5357_s30 = scalar_lea.vmem %s6897_s0, %s4917_s27  ;;  %v4963_v19 = vld [vmem:[%s6906_s9 + $0x58] sm:$0xff]  ;;  %v4962_v21 = vld [vmem:[%s6906_s9 + $0x50] sm:$0xff]  ;;  %v4945_v22 = vld [vmem:[%s6905_s8 + $0x8] sm:$0xff]  ;;  %s4173_s18 = sshll.u32 %s6937_s22, 2 }
  0x10   : > { %556 = vmatpush.bf16.msra.mxu0 %v4926_v1  ;;  %v4918_v2 = vld [vmem:[%s5357_s30] sm:$0xff]  ;;  %5057 = vmatpush.bf16.msra.mxu3 %v4926_v1  ;;  %v4919_v3 = vld [vmem:[%s5357_s30 + $0x8] sm:$0xff]  ;;  %v4920_v4 = vld [vmem:[%s5357_s30 + $0x10] sm:$0xff]  ;;  %s5512_s19 = scalar_lea.vmem %s6899_s2, %s5058_s16  ;;  %s439_s27 = scalar_lea.vmem %s6898_s1, %s4173_s18 }
  0x11   : > { %v4923_v5 = vld [vmem:[%s5357_s30 + $0x28] sm:$0xff]  ;;  %855 = vmatpush.bf16.msra.mxu2 %v4950_v8  ;;  %v4921_v12 = vld [vmem:[%s5357_s30 + $0x18] sm:$0xff]  ;;  %v4924_v15 = vld [vmem:[%s5357_s30 + $0x30] sm:$0xff] }
  0x12   : > { %v4922_v16 = vld [vmem:[%s5357_s30 + $0x20] sm:$0xff]  ;;  %v4925_v17 = vld [vmem:[%s5357_s30 + $0x38] sm:$0xff]  ;;  %v4961_v23 = vld [vmem:[%s6906_s9 + $0x48] sm:$0xff] }
  0x13   : > { %4216 = vmatmul.msk.bf16.vlgmr.msra.gmra.mxu0 %vm524_vm0, %v4918_v2  ;;  %4221 = vmatmul.msk.bf16.vlgmr.msra.gmra.mxu3 %vm524_vm0, %v4923_v5  ;;  %v4944_v24 = vld [vmem:[%s6905_s8] sm:$0xff] }
  0x14   : > { %1301 = vmatpush.bf16.msrb.mxu0 %v4967_v7  ;;  %v4960_v25 = vld [vmem:[%s6906_s9 + $0x40] sm:$0xff] }
  0x15   : > { %856 = vmatpush.bf16.msra.mxu2 %v4949_v10  ;;  %v450_v26 = vld [vmem:[%s6904_s7] sm:$0xf] }
  0x16   : > { %v5426_v28 = vperm.slane %v450_v26, 0 }
  0x18   : > { %1302 = vmatpush.bf16.msrb.mxu0 %v4966_v9 }
  0x19   : > { %857 = vmatpush.bf16.msra.mxu2 %v4948_v13 }
  0x1c   : > { %1303 = vmatpush.bf16.msrb.mxu0 %v4965_v11 }
  0x1d   : > { %858 = vmatpush.bf16.msra.mxu2 %v4947_v18 }
  0x20   : > { %1304 = vmatpush.bf16.msrb.mxu0 %v4964_v14 }
  0x21   : > { %859 = vmatpush.bf16.msra.mxu2 %v4946_v20 }
  0x23   : > { %4217 = vmatmul.msk.bf16.gmra.mxu0 %vm524_vm0, %v4919_v3  ;;  %4222 = vmatmul.msk.bf16.gmra.mxu3 %vm524_vm0, %v4924_v15 }
  0x24   : > { %1305 = vmatpush.bf16.msrb.mxu0 %v4963_v19 }
  0x25   : > { %860 = vmatpush.bf16.msra.mxu2 %v4945_v22 }
  0x28   : > { %1306 = vmatpush.bf16.msrb.mxu0 %v4962_v21 }
  0x29   : > { %861 = vmatpush.bf16.msra.mxu2 %v4944_v24 }
  0x2c   : > { %1307 = vmatpush.bf16.msrb.mxu0 %v4961_v23 }
  0x30   : > { %1308 = vmatpush.bf16.msrb.mxu0 %v4960_v25 }
  0x33   : > { %4218 = vmatmul.msk.bf16.gmra.mxu0 %vm524_vm0, %v4920_v4  ;;  %4223 = vmatmul.msk.bf16.gmra.mxu3 %vm524_vm0, %v4925_v17 }
  0x43   : > { %4219 = vmatmul.msk.bf16.gmra.mxu0 %vm524_vm0, %v4921_v12 }
  0x53   : > { %4220 = vmatmul.msk.bf16.gmra.mxu0 %vm524_vm0, %v4922_v16 }
  0x90   : > { %v558_v27 = vpop.f32.mrf.mxu0 }
  0x91   : > { %v5429_v29 = vadd.f32 %v558_v27, %v5426_v28 }
  0x93   : > { %v742_v31 = vpack.c.bf16 %v5429_v29, %v5429_v29 }
  0x95   : > { %v774_v34 = vunpack.c.l.b16 %v742_v31 }
  0x96   : > { %v583_v63 = vpop.f32.mrf.mxu3 }
  0x97   : > { %v5479_v12 = vadd.f32 %v583_v63, %v5426_v28 }
  0x98   : > { %v560_v30 = vpop.f32.mrf.mxu0 }
  0x99   : > { %v5434_v32 = vadd.f32 %v560_v30, %v5426_v28  ;;  %v752_v14 = vpack.c.bf16 %v5479_v12, %v5479_v12 }
  0x9b   : > { %v743_v33 = vpack.c.bf16 %v5434_v32, %v5434_v32  ;;  %v784_v16 = vunpack.c.l.b16 %v752_v14  ;;  %v4934_v14 = vld [vmem:[%s6901_s4 + $0x30] sm:$0xff] }
  0x9d   : > { %v775_v35 = vunpack.c.l.b16 %v743_v33 }
  0x9e   : > { %v585_v4 = vpop.f32.mrf.mxu3 }
  0x9f   : > { %v790_v36 = vpack.c.b16 %v775_v35, %v774_v34  ;;  %v5482_v13 = vadd.f32 %v585_v4, %v5426_v28 }
  0xa0   : > { %v563_v37 = vpop.f32.mrf.mxu0 }
  0xa1   : > { %862 = vmatmul.bf16.vlgmr.msra.gmra.mxu2 %v790_v36  ;;  %1309 = vmatmul.bf16.vlgmr.msrb.gmra.mxu0 %v790_v36  ;;  %v5439_v38 = vadd.f32 %v563_v37, %v5426_v28  ;;  %v753_v15 = vpack.c.bf16 %v5482_v13, %v5482_v13 }
  0xa3   : > { %v744_v40 = vpack.c.bf16 %v5439_v38, %v5439_v38  ;;  %v785_v17 = vunpack.c.l.b16 %v753_v15  ;;  %v4933_v15 = vld [vmem:[%s6901_s4 + $0x28] sm:$0xff] }
  0xa5   : > { %v776_v43 = vunpack.c.l.b16 %v744_v40  ;;  %v795_v19 = vpack.c.b16 %v785_v17, %v784_v16  ;;  %v4932_v16 = vld [vmem:[%s6901_s4 + $0x20] sm:$0xff]  ;;  %v4931_v17 = vld [vmem:[%s6901_s4 + $0x18] sm:$0xff] }
  0xa6   : > { %v588_v11 = vpop.f32.mrf.mxu3 }
  0xa7   : > { %v5489_v20 = vadd.f32 %v588_v11, %v5426_v28  ;;  %v4940_v11 = vld [vmem:[%s5512_s19 + $0x20] sm:$0xff] }
  0xa8   : > { %v565_v39 = vpop.f32.mrf.mxu0 }
  0xa9   : > { %v5444_v41 = vadd.f32 %v565_v39, %v5426_v28  ;;  %v754_v23 = vpack.c.bf16 %v5489_v20, %v5489_v20 }
  0xab   : > { %v745_v42 = vpack.c.bf16 %v5444_v41, %v5444_v41  ;;  %v786_v25 = vunpack.c.l.b16 %v754_v23  ;;  %v4928_v23 = vld [vmem:[%s6901_s4] sm:$0xff] }
  0xad   : > { %v777_v44 = vunpack.c.l.b16 %v745_v42 }
  0xae   : > { %v590_v18 = vpop.f32.mrf.mxu3 }
  0xaf   : > { %v791_v45 = vpack.c.b16 %v777_v44, %v776_v43  ;;  %v5492_v21 = vadd.f32 %v590_v18, %v5426_v28  ;;  %v4941_v18 = vld [vmem:[%s5512_s19 + $0x28] sm:$0xff] }
  0xb0   : > { %v568_v46 = vpop.f32.mrf.mxu0 }
  0xb1   : > { %867 = vmatmul.bf16.gmra.mxu2 %v791_v45  ;;  %1314 = vmatmul.bf16.gmra.mxu0 %v791_v45  ;;  %v5449_v47 = vadd.f32 %v568_v46, %v5426_v28  ;;  %v755_v24 = vpack.c.bf16 %v5492_v21, %v5492_v21 }
  0xb3   : > { %v746_v49 = vpack.c.bf16 %v5449_v47, %v5449_v47  ;;  %v787_v26 = vunpack.c.l.b16 %v755_v24  ;;  %v4959_v24 = vld [vmem:[%s6906_s9 + $0x38] sm:$0xff] }
  0xb5   : > { %v778_v52 = vunpack.c.l.b16 %v746_v49  ;;  %v796_v27 = vpack.c.b16 %v787_v26, %v786_v25  ;;  %v598_v25 = vld [vmem:[%s439_s27] sm:$0xf]  ;;  %v4958_v26 = vld [vmem:[%s6906_s9 + $0x30] sm:$0xff]  ;;  %s4175_s27 = sshll.u32 %s6937_s22, 3 }
  0xb6   : > { %v593_v22 = vpop.f32.mrf.mxu3  ;;  %s448_s13 = scalar_lea.vmem %s6909_s12, %s4175_s27 }
  0xb7   : > { %v5499_v31 = vadd.f32 %v593_v22, %v5426_v28  ;;  %v4929_v22 = vld [vmem:[%s6901_s4 + $0x8] sm:$0xff] }
  0xb8   : > { %v570_v48 = vpop.f32.mrf.mxu0 }
  0xb9   : > { %v5454_v50 = vadd.f32 %v570_v48, %v5426_v28  ;;  %v756_v34 = vpack.c.bf16 %v5499_v31, %v5499_v31 }
  0xbb   : > { %v747_v51 = vpack.c.bf16 %v5454_v50, %v5454_v50  ;;  %v788_v36 = vunpack.c.l.b16 %v756_v34  ;;  %v4956_v34 = vld [vmem:[%s6906_s9 + $0x20] sm:$0xff] }
  0xbd   : > { %v779_v53 = vunpack.c.l.b16 %v747_v51 }
  0xbe   : > { %v595_v30 = vpop.f32.mrf.mxu3 }
  0xbf   : > { %v792_v54 = vpack.c.b16 %v779_v53, %v778_v52  ;;  %v5502_v33 = vadd.f32 %v595_v30, %v5426_v28  ;;  %v4957_v30 = vld [vmem:[%s6906_s9 + $0x28] sm:$0xff] }
  0xc0   : > { %v573_v55 = vpop.f32.mrf.mxu0 }
  0xc1   : > { %872 = vmatmul.bf16.gmra.mxu2 %v792_v54  ;;  %1319 = vmatmul.bf16.gmra.mxu0 %v792_v54  ;;  %v5459_v56 = vadd.f32 %v573_v55, %v5426_v28  ;;  %v757_v35 = vpack.c.bf16 %v5502_v33, %v5502_v33 }
  0xc3   : > { %v748_v58 = vpack.c.bf16 %v5459_v56, %v5459_v56  ;;  %v789_v37 = vunpack.c.l.b16 %v757_v35  ;;  %v4955_v35 = vld [vmem:[%s6906_s9 + $0x18] sm:$0xff] }
  0xc5   : > { %v780_v61 = vunpack.c.l.b16 %v748_v58  ;;  %v797_v39 = vpack.c.b16 %v789_v37, %v788_v36  ;;  %v4943_v36 = vld [vmem:[%s5512_s19 + $0x38] sm:$0xff]  ;;  %v4954_v37 = vld [vmem:[%s6906_s9 + $0x10] sm:$0xff] }
  0xc8   : > { %v575_v57 = vpop.f32.mrf.mxu0 }
  0xc9   : > { %v5464_v59 = vadd.f32 %v575_v57, %v5426_v28 }
  0xcb   : > { %v749_v60 = vpack.c.bf16 %v5464_v59, %v5464_v59 }
  0xcd   : > { %v781_v62 = vunpack.c.l.b16 %v749_v60 }
  0xcf   : > { %v793_v0 = vpack.c.b16 %v781_v62, %v780_v61 }
  0xd0   : > { %v578_v1 = vpop.f32.mrf.mxu0 }
  0xd1   : > { %877 = vmatmul.bf16.gmra.mxu2 %v793_v0  ;;  %1324 = vmatmul.bf16.gmra.mxu0 %v793_v0  ;;  %v5469_v2 = vadd.f32 %v578_v1, %v5426_v28 }
  0xd3   : > { %v750_v5 = vpack.c.bf16 %v5469_v2, %v5469_v2 }
  0xd5   : > { %v782_v8 = vunpack.c.l.b16 %v750_v5  ;;  %v4936_v5 = vld [vmem:[%s5512_s19] sm:$0xff] }
  0xd8   : > { %v580_v3 = vpop.f32.mrf.mxu0 }
  0xd9   : > { %v5474_v6 = vadd.f32 %v580_v3, %v5426_v28 }
  0xdb   : > { %v751_v7 = vpack.c.bf16 %v5474_v6, %v5474_v6 }
  0xdd   : > { %v783_v9 = vunpack.c.l.b16 %v751_v7  ;;  %v4937_v7 = vld [vmem:[%s5512_s19 + $0x8] sm:$0xff] }
  0xdf   : > { %v794_v10 = vpack.c.b16 %v783_v9, %v782_v8  ;;  %v4938_v8 = vld [vmem:[%s5512_s19 + $0x10] sm:$0xff]  ;;  %v4939_v9 = vld [vmem:[%s5512_s19 + $0x18] sm:$0xff] }
  0xe1   : > { %882 = vmatmul.bf16.gmra.mxu2 %v794_v10  ;;  %1329 = vmatmul.bf16.gmra.mxu0 %v794_v10  ;;  %v4935_v10 = vld [vmem:[%s6901_s4 + $0x38] sm:$0xff] }
  0xe2   : > { %664 = vmatpush.bf16.msra.mxu1 %v4935_v10 }
  0xe6   : > { %665 = vmatpush.bf16.msra.mxu1 %v4934_v14 }
  0xea   : > { %666 = vmatpush.bf16.msra.mxu1 %v4933_v15 }
  0xee   : > { %667 = vmatpush.bf16.msra.mxu1 %v4932_v16 }
  0xf1   : > { %887 = vmatmul.bf16.gmra.mxu2 %v795_v19  ;;  %1334 = vmatmul.bf16.gmra.mxu0 %v795_v19  ;;  %v4930_v19 = vld [vmem:[%s6901_s4 + $0x10] sm:$0xff] }
  0xf2   : > { %668 = vmatpush.bf16.msra.mxu1 %v4931_v17 }
  0xf6   : > { %669 = vmatpush.bf16.msra.mxu1 %v4930_v19 }
  0xfa   : > { %670 = vmatpush.bf16.msra.mxu1 %v4929_v22 }
  0xfe   : > { %671 = vmatpush.bf16.msra.mxu1 %v4928_v23 }
 0x101   : > { %892 = vmatmul.bf16.gmra.mxu2 %v796_v27  ;;  %1339 = vmatmul.bf16.gmra.mxu0 %v796_v27  ;;  %v4942_v27 = vld [vmem:[%s5512_s19 + $0x30] sm:$0xff] }
 0x102   : > { %1252 = vmatpush.bf16.msrb.mxu1 %v4959_v24 }
 0x103   : > { %672 = vmatmul.bf16.vlgmr.msra.gmra.mxu1 %v598_v25 }
 0x106   : > { %1253 = vmatpush.bf16.msrb.mxu1 %v4958_v26 }
 0x10a   : > { %1254 = vmatpush.bf16.msrb.mxu1 %v4957_v30 }
 0x10e   : > { %1255 = vmatpush.bf16.msrb.mxu1 %v4956_v34 }
 0x111   : > { %897 = vmatmul.bf16.gmra.mxu2 %v797_v39  ;;  %1344 = vmatmul.bf16.gmra.mxu0 %v797_v39  ;;  %v4953_v39 = vld [vmem:[%s6906_s9 + $0x8] sm:$0xff] }
 0x112   : > { %1256 = vmatpush.bf16.msrb.mxu1 %v4955_v35 }
 0x116   : > { %1257 = vmatpush.bf16.msrb.mxu1 %v4954_v37 }
 0x11a   : > { %1258 = vmatpush.bf16.msrb.mxu1 %v4953_v39 }
 0x124   : > { %v863_v40 = vpop.f32.mrf.mxu2 }
 0x12c   : > { %v865_v42 = vpop.f32.mrf.mxu2 }
 0x12d   : > { %v903_v4 = vpack.c.bf16 %v865_v42, %v863_v40  ;;  %v4952_v40 = vld [vmem:[%s6906_s9] sm:$0xff] }
 0x12e   : > { %1259 = vmatpush.bf16.msrb.mxu1 %v4952_v40  ;;  %v5577_v42 = vld [vmem:[%s6907_s10] sm:$0xf] }
 0x134   : > { %v868_v43 = vpop.f32.mrf.mxu2 }
 0x13c   : > { %v870_v44 = vpop.f32.mrf.mxu2 }
 0x13d   : > { %v904_v3 = vpack.c.bf16 %v870_v44, %v868_v43  ;;  %v5580_v43 = vperm.slane %v5577_v42, 0  ;;  %v5583_v44 = vperm.slane %v5577_v42, 1 }
 0x144   : > { %v873_v45 = vpop.f32.mrf.mxu2 }
 0x14c   : > { %v875_v46 = vpop.f32.mrf.mxu2 }
 0x14d   : > { %v905_v1 = vpack.c.bf16 %v875_v46, %v873_v45 }
 0x154   : > { %v878_v48 = vpop.f32.mrf.mxu2 }
 0x15c   : > { %v880_v28 = vpop.f32.mrf.mxu2 }
 0x15d   : > { %v906_v0 = vpack.c.bf16 %v880_v28, %v878_v48  ;;  %v5587_v48 = vperm.slane %v5577_v42, 2 }
 0x164   : > { %v883_v49 = vpop.f32.mrf.mxu2 }
 0x16c   : > { %v885_v51 = vpop.f32.mrf.mxu2 }
 0x16d   : > { %v907_v63 = vpack.c.bf16 %v885_v51, %v883_v49 }
 0x174   : > { %v888_v52 = vpop.f32.mrf.mxu2 }
 0x17c   : > { %v890_v53 = vpop.f32.mrf.mxu2 }
 0x17d   : > { %v908_v62 = vpack.c.bf16 %v890_v53, %v888_v52 }
 0x184   : > { %v893_v54 = vpop.f32.mrf.mxu2 }
 0x18c   : > { %v895_v55 = vpop.f32.mrf.mxu2 }
 0x18d   : > { %v909_v61 = vpack.c.bf16 %v895_v55, %v893_v54 }
 0x194   : > { %v898_v57 = vpop.f32.mrf.mxu2 }
 0x19c   : > { %v900_v58 = vpop.f32.mrf.mxu2 }
 0x19d   : > { %v910_v60 = vpack.c.bf16 %v900_v58, %v898_v57 }
 0x19f   : > { %960 = vmatpush.bf16.msrb.mxu3 %v910_v60 }
 0x1a3   : > { %961 = vmatpush.bf16.msrb.mxu3 %v909_v61 }
 0x1a7   : > { %962 = vmatpush.bf16.msrb.mxu3 %v908_v62 }
 0x1ab   : > { %963 = vmatpush.bf16.msrb.mxu3 %v907_v63 }
 0x1af   : > { %964 = vmatpush.bf16.msrb.mxu3 %v906_v0 }
 0x1b3   : > { %965 = vmatpush.bf16.msrb.mxu3 %v905_v1 }
 0x1b7   : > { %966 = vmatpush.bf16.msrb.mxu3 %v904_v3 }
 0x1bb   : > { %967 = vmatpush.bf16.msrb.mxu3 %v903_v4 }
 0x1be   : > { %968 = vmatmul.bf16.vlgmr.msrb.gmra.mxu3 %v4936_v5 }
 0x1ce   : > { %973 = vmatmul.bf16.gmra.mxu3 %v4937_v7 }
 0x1de   : > { %978 = vmatmul.bf16.gmra.mxu3 %v4938_v8 }
 0x1ee   : > { %983 = vmatmul.bf16.gmra.mxu3 %v4939_v9 }
 0x1fe   : > { %988 = vmatmul.bf16.gmra.mxu3 %v4940_v11 }
 0x20e   : > { %993 = vmatmul.bf16.gmra.mxu3 %v4941_v18 }
 0x21e   : > { %998 = vmatmul.bf16.gmra.mxu3 %v4942_v27 }
 0x22e   : > { %1003 = vmatmul.bf16.gmra.mxu3 %v4943_v36 }
 0x241   : > { %v969_v45 = vpop.f32.mrf.mxu3 }
 0x242   : > { %v970_v46 = vadd.f32 %v969_v45, %v5580_v43 }
 0x244   : > { %v1010_v28 = vmul.f32 %v5583_v44, %v970_v46 }
 0x246   : > { %v1027_v49 = vadd.f32 %v5587_v48, %v1010_v28 }
 0x248   : > { %v1059_v52 = vmul.f32 0.01, %v1027_v49  ;;  %vm1043_vm1 = vcmp.gt.f32.partialorder %v1027_v49, 0.0 }
 0x249   : > { %v971_v51 = vpop.f32.mrf.mxu3 }
 0x24a   : > { %v972_v53 = vadd.f32 %v971_v51, %v5580_v43  ;;  %v5594_v57 = vsel %vm1043_vm1, %v1027_v49, %v1059_v52 }
 0x24b   : > { %v1091_v61 = vpack.c.bf16 %v5594_v57, %v5594_v57 }
 0x24c   : > { %v1011_v54 = vmul.f32 %v5583_v44, %v972_v53 }
 0x24d   : > { %v1123_v3 = vunpack.c.l.b16 %v1091_v61 }
 0x24e   : > { %v1028_v55 = vadd.f32 %v5587_v48, %v1011_v54 }
 0x250   : > { %v1060_v58 = vmul.f32 0.01, %v1028_v55  ;;  %vm1044_vm2 = vcmp.gt.f32.partialorder %v1028_v55, 0.0 }
 0x251   : > { %v974_v60 = vpop.f32.mrf.mxu3 }
 0x252   : > { %v975_v62 = vadd.f32 %v974_v60, %v5580_v43  ;;  %v5599_v63 = vsel %vm1044_vm2, %v1028_v55, %v1060_v58 }
 0x253   : > { %v1092_v0 = vpack.c.bf16 %v5599_v63, %v5599_v63 }
 0x254   : > { %v1012_v1 = vmul.f32 %v5583_v44, %v975_v62 }
 0x255   : > { %v1124_v4 = vunpack.c.l.b16 %v1092_v0 }
 0x256   : > { %v1029_v5 = vadd.f32 %v5587_v48, %v1012_v1 }
 0x257   : > { %v1139_v7 = vpack.c.b16 %v1124_v4, %v1123_v3 }
 0x258   : > { %v1061_v9 = vmul.f32 0.01, %v1029_v5  ;;  %vm1045_vm3 = vcmp.gt.f32.partialorder %v1029_v5, 0.0 }
 0x259   : > { %v976_v8 = vpop.f32.mrf.mxu3  ;;  %1260 = vmatmul.bf16.vlgmr.msrb.gmra.mxu1 %v1139_v7 }
 0x25a   : > { %v977_v10 = vadd.f32 %v976_v8, %v5580_v43  ;;  %v5608_v15 = vsel %vm1045_vm3, %v1029_v5, %v1061_v9 }
 0x25b   : > { %v1093_v18 = vpack.c.bf16 %v5608_v15, %v5608_v15 }
 0x25c   : > { %v1013_v11 = vmul.f32 %v5583_v44, %v977_v10 }
 0x25d   : > { %v1125_v25 = vunpack.c.l.b16 %v1093_v18 }
 0x25e   : > { %v1030_v14 = vadd.f32 %v5587_v48, %v1013_v11 }
 0x260   : > { %vm1046_vm4 = vcmp.gt.f32.partialorder %v1030_v14, 0.0  ;;  %v1062_v16 = vmul.f32 0.01, %v1030_v14 }
 0x261   : > { %v979_v17 = vpop.f32.mrf.mxu3 }
 0x262   : > { %v980_v19 = vadd.f32 %v979_v17, %v5580_v43  ;;  %v5613_v22 = vsel %vm1046_vm4, %v1030_v14, %v1062_v16 }
 0x263   : > { %v1094_v23 = vpack.c.bf16 %v5613_v22, %v5613_v22 }
 0x264   : > { %v1014_v24 = vmul.f32 %v5583_v44, %v980_v19 }
 0x265   : > { %v1126_v26 = vunpack.c.l.b16 %v1094_v23 }
 0x266   : > { %v1031_v27 = vadd.f32 %v5587_v48, %v1014_v24 }
 0x267   : > { %v1140_v30 = vpack.c.b16 %v1126_v26, %v1125_v25 }
 0x268   : > { %v1063_v35 = vmul.f32 0.01, %v1031_v27  ;;  %vm1047_vm5 = vcmp.gt.f32.partialorder %v1031_v27, 0.0 }
 0x269   : > { %v981_v34 = vpop.f32.mrf.mxu3  ;;  %1265 = vmatmul.bf16.gmra.mxu1 %v1140_v30 }
 0x26a   : > { %v982_v36 = vadd.f32 %v981_v34, %v5580_v43  ;;  %v5622_v40 = vsel %vm1047_vm5, %v1031_v27, %v1063_v35 }
 0x26b   : > { %v1095_v28 = vpack.c.bf16 %v5622_v40, %v5622_v40 }
 0x26c   : > { %v1015_v37 = vmul.f32 %v5583_v44, %v982_v36 }
 0x26d   : > { %v1127_v54 = vunpack.c.l.b16 %v1095_v28 }
 0x26e   : > { %v1032_v39 = vadd.f32 %v5587_v48, %v1015_v37 }
 0x270   : > { %vm1048_vm6 = vcmp.gt.f32.partialorder %v1032_v39, 0.0  ;;  %v1064_v45 = vmul.f32 0.01, %v1032_v39 }
 0x271   : > { %v984_v46 = vpop.f32.mrf.mxu3 }
 0x272   : > { %v985_v49 = vadd.f32 %v984_v46, %v5580_v43  ;;  %v5627_v51 = vsel %vm1048_vm6, %v1032_v39, %v1064_v45 }
 0x273   : > { %v1096_v52 = vpack.c.bf16 %v5627_v51, %v5627_v51 }
 0x274   : > { %v1016_v53 = vmul.f32 %v5583_v44, %v985_v49 }
 0x275   : > { %v1128_v55 = vunpack.c.l.b16 %v1096_v52 }
 0x276   : > { %v1033_v58 = vadd.f32 %v5587_v48, %v1016_v53 }
 0x277   : > { %v1141_v60 = vpack.c.b16 %v1128_v55, %v1127_v54 }
 0x278   : > { %v1065_v62 = vmul.f32 0.01, %v1033_v58  ;;  %vm1049_vm7 = vcmp.gt.f32.partialorder %v1033_v58, 0.0 }
 0x279   : > { %v986_v61 = vpop.f32.mrf.mxu3  ;;  %1270 = vmatmul.bf16.gmra.mxu1 %v1141_v60 }
 0x27a   : > { %v987_v0 = vadd.f32 %v986_v61, %v5580_v43  ;;  %v5636_v4 = vsel %vm1049_vm7, %v1033_v58, %v1065_v62 }
 0x27b   : > { %v1097_v8 = vpack.c.bf16 %v5636_v4, %v5636_v4 }
 0x27c   : > { %v1017_v1 = vmul.f32 %v5583_v44, %v987_v0  ;;  %v5666_v0 = vpop.f32.mrf.mxu1 }
 0x27d   : > { %v1129_v16 = vunpack.c.l.b16 %v1097_v8 }
 0x27e   : > { %v1034_v3 = vadd.f32 %v5587_v48, %v1017_v1 }
 0x280   : > { %vm1050_vm8 = vcmp.gt.f32.partialorder %v1034_v3, 0.0  ;;  %v1066_v5 = vmul.f32 0.01, %v1034_v3 }
 0x281   : > { %v989_v7 = vpop.f32.mrf.mxu3 }
 0x282   : > { %v990_v9 = vadd.f32 %v989_v7, %v5580_v43  ;;  %v5641_v10 = vsel %vm1050_vm8, %v1034_v3, %v1066_v5 }
 0x283   : > { %v1098_v11 = vpack.c.bf16 %v5641_v10, %v5641_v10 }
 0x284   : > { %v1018_v14 = vmul.f32 %v5583_v44, %v990_v9 }
 0x285   : > { %v1130_v17 = vunpack.c.l.b16 %v1098_v11 }
 0x286   : > { %v1035_v18 = vadd.f32 %v5587_v48, %v1018_v14 }
 0x287   : > { %v1142_v19 = vpack.c.b16 %v1130_v17, %v1129_v16 }
 0x288   : > { %v1067_v24 = vmul.f32 0.01, %v1035_v18  ;;  %vm1051_vm9 = vcmp.gt.f32.partialorder %v1035_v18, 0.0 }
 0x289   : > { %v991_v23 = vpop.f32.mrf.mxu3  ;;  %1275 = vmatmul.bf16.gmra.mxu1 %v1142_v19 }
 0x28a   : > { %v992_v25 = vadd.f32 %v991_v23, %v5580_v43  ;;  %v5650_v30 = vsel %vm1051_vm9, %v1035_v18, %v1067_v24  ;;  %v675_v18 = vpop.f32.mrf.mxu1 }
 0x28b   : > { %v1099_v36 = vpack.c.bf16 %v5650_v30, %v5650_v30 }
 0x28c   : > { %v1019_v26 = vmul.f32 %v5583_v44, %v992_v25 }
 0x28d   : > { %v1131_v28 = vunpack.c.l.b16 %v1099_v36 }
 0x28e   : > { %v1036_v27 = vadd.f32 %v5587_v48, %v1019_v26 }
 0x290   : > { %vm1052_vm10 = vcmp.gt.f32.partialorder %v1036_v27, 0.0  ;;  %v1068_v34 = vmul.f32 0.01, %v1036_v27 }
 0x291   : > { %v994_v35 = vpop.f32.mrf.mxu3 }
 0x292   : > { %v995_v37 = vadd.f32 %v994_v35, %v5580_v43  ;;  %v5655_v39 = vsel %vm1052_vm10, %v1036_v27, %v1068_v34 }
 0x293   : > { %v1100_v45 = vpack.c.bf16 %v5655_v39, %v5655_v39 }
 0x294   : > { %v1020_v46 = vmul.f32 %v5583_v44, %v995_v37 }
 0x295   : > { %v1132_v49 = vunpack.c.l.b16 %v1100_v45 }
 0x296   : > { %v1037_v52 = vadd.f32 %v5587_v48, %v1020_v46 }
 0x297   : > { %v1143_v53 = vpack.c.b16 %v1132_v49, %v1131_v28 }
 0x298   : > { %v1069_v55 = vmul.f32 0.01, %v1037_v52  ;;  %vm1053_vm11 = vcmp.gt.f32.partialorder %v1037_v52, 0.0 }
 0x299   : > { %v996_v54 = vpop.f32.mrf.mxu3  ;;  %1280 = vmatmul.bf16.gmra.mxu1 %v1143_v53 }
 0x29a   : > { %v997_v58 = vadd.f32 %v996_v54, %v5580_v43  ;;  %v5664_v62 = vsel %vm1053_vm11, %v1037_v52, %v1069_v55 }
 0x29b   : > { %v1101_v5 = vpack.c.bf16 %v5664_v62, %v5664_v62 }
 0x29c   : > { %v1021_v60 = vmul.f32 %v5583_v44, %v997_v58 }
 0x29d   : > { %v1133_v14 = vunpack.c.l.b16 %v1101_v5 }
 0x29e   : > { %v1038_v61 = vadd.f32 %v5587_v48, %v1021_v60  ;;  %v1310_v60 = vpop.f32.mrf.mxu0 }
 0x2a0   : > { %vm1054_vm12 = vcmp.gt.f32.partialorder %v1038_v61, 0.0  ;;  %v1070_v1 = vmul.f32 0.01, %v1038_v61 }
 0x2a1   : > { %v999_v3 = vpop.f32.mrf.mxu3 }
 0x2a2   : > { %v1000_v7 = vadd.f32 %v999_v3, %v5580_v43  ;;  %v5671_v8 = vsel %vm1054_vm12, %v1038_v61, %v1070_v1 }
 0x2a3   : > { %v1102_v9 = vpack.c.bf16 %v5671_v8, %v5671_v8 }
 0x2a4   : > { %v1022_v11 = vmul.f32 %v5583_v44, %v1000_v7 }
 0x2a5   : > { %v1134_v16 = vunpack.c.l.b16 %v1102_v9 }
 0x2a6   : > { %v1039_v17 = vadd.f32 %v5587_v48, %v1022_v11 }
 0x2a7   : > { %v1144_v19 = vpack.c.b16 %v1134_v16, %v1133_v14 }
 0x2a8   : > { %v1071_v24 = vmul.f32 0.01, %v1039_v17  ;;  %vm1055_vm13 = vcmp.gt.f32.partialorder %v1039_v17, 0.0 }
 0x2a9   : > { %v1001_v23 = vpop.f32.mrf.mxu3  ;;  %1285 = vmatmul.bf16.gmra.mxu1 %v1144_v19 }
 0x2aa   : > { %v1002_v25 = vadd.f32 %v1001_v23, %v5580_v43  ;;  %v5680_v34 = vsel %vm1055_vm13, %v1039_v17, %v1071_v24  ;;  %v1312_v17 = vpop.f32.mrf.mxu0  ;;  %v4982_v24 = vld [vmem:[%s6905_s8 + $0x70] sm:$0xff] }
 0x2ab   : > { %v1103_v37 = vpack.c.bf16 %v5680_v34, %v5680_v34 }
 0x2ac   : > { %v1023_v26 = vmul.f32 %v5583_v44, %v1002_v25  ;;  %v4998_v25 = vld [vmem:[%s6906_s9 + $0xf0] sm:$0xff] }
 0x2ad   : > { %v1135_v52 = vunpack.c.l.b16 %v1103_v37  ;;  %v4980_v37 = vld [vmem:[%s6905_s8 + $0x60] sm:$0xff] }
 0x2ae   : > { %v1040_v27 = vadd.f32 %v5587_v48, %v1023_v26  ;;  %v4981_v26 = vld [vmem:[%s6905_s8 + $0x68] sm:$0xff] }
 0x2b0   : > { %vm1056_vm14 = vcmp.gt.f32.partialorder %v1040_v27, 0.0  ;;  %v1072_v35 = vmul.f32 0.01, %v1040_v27 }
 0x2b1   : > { %v1004_v36 = vpop.f32.mrf.mxu3 }
 0x2b2   : > { %v1005_v45 = vadd.f32 %v1004_v36, %v5580_v43  ;;  %v5685_v46 = vsel %vm1056_vm14, %v1040_v27, %v1072_v35  ;;  %v1315_v23 = vpop.f32.mrf.mxu0  ;;  %v4997_v27 = vld [vmem:[%s6906_s9 + $0xe8] sm:$0xff]  ;;  %v5721_v35 = vperm.slane %v5577_v42, 3  ;;  %v4979_v42 = vld [vmem:[%s6905_s8 + $0x58] sm:$0xff] }
 0x2b3   : > { %v1104_v28 = vpack.c.bf16 %v5685_v46, %v5685_v46 }
 0x2b4   : > { %v1024_v49 = vmul.f32 %v5583_v44, %v1005_v45  ;;  %v4996_v45 = vld [vmem:[%s6906_s9 + $0xe0] sm:$0xff] }
 0x2b5   : > { %v1136_v53 = vunpack.c.l.b16 %v1104_v28 }
 0x2b6   : > { %v1041_v54 = vadd.f32 %v5587_v48, %v1024_v49 }
 0x2b7   : > { %v1145_v55 = vpack.c.b16 %v1136_v53, %v1135_v52  ;;  %v4995_v53 = vld [vmem:[%s6906_s9 + $0xd8] sm:$0xff] }
 0x2b8   : > { %v1073_v61 = vmul.f32 0.01, %v1041_v54  ;;  %vm1057_vm15 = vcmp.gt.f32.partialorder %v1041_v54, 0.0 }
 0x2b9   : > { %v1006_v58 = vpop.f32.mrf.mxu3  ;;  %1290 = vmatmul.bf16.gmra.mxu1 %v1145_v55 }
 0x2ba   : > { %v1007_v1 = vadd.f32 %v1006_v58, %v5580_v43  ;;  %v5694_v7 = vsel %vm1057_vm15, %v1041_v54, %v1073_v61  ;;  %v1317_v49 = vpop.f32.mrf.mxu0  ;;  %v4978_v58 = vld [vmem:[%s6905_s8 + $0x50] sm:$0xff] }
 0x2bb   : > { %v1105_v11 = vpack.c.bf16 %v5694_v7, %v5694_v7 }
 0x2bc   : > { %v1025_v3 = vmul.f32 %v5583_v44, %v1007_v1  ;;  %v4983_v44 = vld [vmem:[%s6905_s8 + $0x78] sm:$0xff] }
 0x2bd   : > { %v1137_v18 = vunpack.c.l.b16 %v1105_v11  ;;  %1899 = vmatpush.bf16.msrb.mxu2 %v4983_v44 }
 0x2be   : > { %v1042_v5 = vadd.f32 %v5587_v48, %v1025_v3  ;;  %v4999_v48 = vld [vmem:[%s6906_s9 + $0xf8] sm:$0xff] }
 0x2bf   : > { %2346 = vmatpush.bf16.msra.mxu0 %v4999_v48 }
 0x2c0   : > { %vm1058_vm0 = vcmp.gt.f32.partialorder %v1042_v5, 0.0  ;;  %v1074_v9 = vmul.f32 0.01, %v1042_v5 }
 0x2c1   : > { %1900 = vmatpush.bf16.msrb.mxu2 %v4982_v24 }
 0x2c2   : > { %v5698_v14 = vsel %vm1058_vm0, %v1042_v5, %v1074_v9  ;;  %v1320_v3 = vpop.f32.mrf.mxu0  ;;  %v4977_v5 = vld [vmem:[%s6905_s8 + $0x48] sm:$0xff] }
 0x2c3   : > { %v1106_v16 = vpack.c.bf16 %v5698_v14, %v5698_v14  ;;  %2347 = vmatpush.bf16.msra.mxu0 %v4998_v25  ;;  %v4993_v9 = vld [vmem:[%s6906_s9 + $0xc8] sm:$0xff] }
 0x2c5   : > { %v1138_v43 = vunpack.c.l.b16 %v1106_v16  ;;  %1901 = vmatpush.bf16.msrb.mxu2 %v4981_v26 }
 0x2c7   : > { %v1146_v19 = vpack.c.b16 %v1138_v43, %v1137_v18  ;;  %2348 = vmatpush.bf16.msra.mxu0 %v4997_v27 }
 0x2c9   : > { %1295 = vmatmul.bf16.gmra.mxu1 %v1146_v19  ;;  %1902 = vmatpush.bf16.msrb.mxu2 %v4980_v37  ;;  %v4992_v19 = vld [vmem:[%s6906_s9 + $0xc0] sm:$0xff] }
 0x2ca   : > { %v1322_v27 = vpop.f32.mrf.mxu0 }
 0x2cb   : > { %2349 = vmatpush.bf16.msra.mxu0 %v4996_v45 }
 0x2cd   : > { %1903 = vmatpush.bf16.msrb.mxu2 %v4979_v42 }
 0x2cf   : > { %2350 = vmatpush.bf16.msra.mxu0 %v4995_v53 }
 0x2d1   : > { %1904 = vmatpush.bf16.msrb.mxu2 %v4978_v58 }
 0x2d5   : > { %1905 = vmatpush.bf16.msrb.mxu2 %v4977_v5 }
 0x2d6   : > { %v1261_v36 = vpop.f32.mrf.mxu1 }
 0x2d7   : > { %v1262_v28 = vadd.f32 %v1261_v36, %v5721_v35 }
 0x2d9   : > { %v1311_v52 = vadd.f32 %v1310_v60, %v1262_v28  ;;  %v4994_v60 = vld [vmem:[%s6906_s9 + $0xd0] sm:$0xff] }
 0x2da   : > { %2351 = vmatpush.bf16.msra.mxu0 %v4994_v60 }
 0x2db   : > { %v4384_v54 = vmul.f32 -1.442695, %v1311_v52 }
 0x2dd   : > { %5067 = vpow2.f32 %v4384_v54 }
 0x2de   : > { %v1263_v55 = vpop.f32.mrf.mxu1  ;;  %2352 = vmatpush.bf16.msra.mxu0 %v4993_v9 }
 0x2df   : > { %v1264_v61 = vadd.f32 %v1263_v55, %v5721_v35 }
 0x2e1   : > { %v1313_v1 = vadd.f32 %v1312_v17, %v1264_v61  ;;  %v4976_v17 = vld [vmem:[%s6905_s8 + $0x40] sm:$0xff] }
 0x2e2   : > { %1906 = vmatpush.bf16.msrb.mxu2 %v4976_v17  ;;  %2353 = vmatpush.bf16.msra.mxu0 %v4992_v19 }
 0x2e3   : > { %v5068_v11 = vpop.eup %5067  ;;  %v4385_v16 = vmul.f32 -1.442695, %v1313_v1 }
 0x2e4   : > { %v1398_v18 = vadd.f32 1.0, %v5068_v11 }
 0x2e5   : > { %5069 = vpow2.f32 %v4385_v16  ;;  %v5757_v16 = vpop.f32.mrf.mxu0 }
 0x2e6   : > { %5071 = vrcp.f32 %v1398_v18  ;;  %v1266_v43 = vpop.f32.mrf.mxu1  ;;  %v1425_v42 = vand.u32 2147483648, %v1398_v18  ;;  %v1423_v55 = vand.u32 2147483647, %v1398_v18  ;;  %vm1419_vm2 = vweird.f32 %v1398_v18 }
 0x2e7   : > { %v1267_v44 = vadd.f32 %v1266_v43, %v5721_v35 }
 0x2e8   : > { %v1426_v5 = vor.u32 1.1754944e-38, %v1425_v42  ;;  %vm1424_vm4 = vcmp.eq.f32.partialorder %v1423_v55, 8.507059e+37 }
 0x2e9   : > { %v1316_v48 = vadd.f32 %v1315_v23, %v1267_v44 }
 0x2eb   : > { %v5070_v24 = vpop.eup %5069  ;;  %v4386_v25 = vmul.f32 -1.442695, %v1316_v48 }
 0x2ec   : > { %v5072_v26 = vpop.eup %5071  ;;  %v1399_v36 = vadd.f32 1.0, %v5070_v24 }
 0x2ed   : > { %v1415_v37 = vmul.f32 %v5072_v26, %v1398_v18  ;;  %5073 = vpow2.f32 %v4386_v25  ;;  %vm1420_vm1 = vweird.f32 %v5072_v26 }
 0x2ee   : > { %5075 = vrcp.f32 %v1399_v36  ;;  %v1268_v45 = vpop.f32.mrf.mxu1  ;;  %vm1421_vm3 = vmor %vm1419_vm2, %vm1420_vm1  ;;  %v1438_v48 = vand.u32 2147483647, %v1399_v36  ;;  %v1440_v24 = vand.u32 2147483648, %v1399_v36  ;;  %vm1434_vm6 = vweird.f32 %v1399_v36 }
 0x2ef   : > { %v1416_v28 = vsub.f32 1.0, %v1415_v37  ;;  %v1269_v52 = vadd.f32 %v1268_v45, %v5721_v35 }
 0x2f0   : > { %vm1439_vm8 = vcmp.eq.f32.partialorder %v1438_v48, 8.507059e+37 }
 0x2f1   : > { %v1318_v53 = vadd.f32 %v1317_v49, %v1269_v52  ;;  %v1417_v54 = vmul.f32 %v5072_v26, %v1416_v28 }
 0x2f3   : > { %v5074_v58 = vpop.eup %5073  ;;  %v4387_v60 = vmul.f32 -1.442695, %v1318_v53  ;;  %v1418_v23 = vadd.f32 %v5072_v26, %v1417_v54  ;;  %v1441_v53 = vor.u32 1.1754944e-38, %v1440_v24 }
 0x2f4   : > { %v5076_v61 = vpop.eup %5075  ;;  %v1400_v1 = vadd.f32 1.0, %v5074_v58 }
 0x2f5   : > { %v1430_v9 = vmul.f32 %v5076_v61, %v1399_v36  ;;  %5077 = vpow2.f32 %v4387_v60  ;;  %v1422_v11 = vsel %vm1421_vm3, %v5072_v26, %v1418_v23  ;;  %vm1435_vm5 = vweird.f32 %v5076_v61 }
 0x2f6   : > { %5079 = vrcp.f32 %v1400_v1  ;;  %v1271_v43 = vpop.f32.mrf.mxu1  ;;  %v1427_v49 = vsel %vm1424_vm4, %v1426_v5, %v1422_v11  ;;  %vm1436_vm7 = vmor %vm1434_vm6, %vm1435_vm5  ;;  %v1453_v11 = vand.u32 2147483647, %v1400_v1  ;;  %vm1449_vm10 = vweird.f32 %v1400_v1 }
 0x2f7   : > { %v1431_v17 = vsub.f32 1.0, %v1430_v9  ;;  %v1272_v19 = vadd.f32 %v1271_v43, %v5721_v35  ;;  %v1670_v44 = vsub.f32 1.0, %v1427_v49  ;;  %v1654_v58 = vmul.f32 %v1427_v49, %v5594_v57  ;;  %v5768_v9 = vpop.f32.mrf.mxu0 }
 0x2f8   : > { %v1455_v43 = vand.u32 2147483648, %v1400_v1  ;;  %vm1454_vm12 = vcmp.eq.f32.partialorder %v1453_v11, 8.507059e+37 }
 0x2f9   : > { %v1321_v18 = vadd.f32 %v1320_v3, %v1272_v19  ;;  %v1432_v25 = vmul.f32 %v5076_v61, %v1431_v17  ;;  %v1686_v26 = vmul.f32 %v1670_v44, %v5429_v29 }
 0x2fb   : > { %v5078_v37 = vpop.eup %5077  ;;  %v4388_v45 = vmul.f32 -1.442695, %v1321_v18  ;;  %v1433_v28 = vadd.f32 %v5076_v61, %v1432_v25  ;;  %v5766_v29 = vadd.f32 %v1686_v26, %v1654_v58 }
 0x2fc   : > { %v5080_v52 = vpop.eup %5079  ;;  %v5761_v42 = vadd.f32 1.0, %v5078_v37 }
 0x2fd   : > { %v1445_v54 = vmul.f32 %v5080_v52, %v1400_v1  ;;  %5081 = vpow2.f32 %v4388_v45  ;;  %v1437_v55 = vsel %vm1436_vm7, %v5076_v61, %v1433_v28  ;;  %vm1450_vm9 = vweird.f32 %v5080_v52 }
 0x2fe   : > { %5083 = vrcp.f32 %v5761_v42  ;;  %v1273_v3 = vpop.f32.mrf.mxu1  ;;  %v1442_v60 = vsel %vm1439_vm8, %v1441_v53, %v1437_v55  ;;  %v1787_v24 = vpack.c.bf16 %v5766_v29, %v5766_v29  ;;  %vm1451_vm11 = vmor %vm1449_vm10, %vm1450_vm9  ;;  %v1468_v58 = vand.u32 2147483647, %v5761_v42 }
 0x2ff   : > { %v1446_v23 = vsub.f32 1.0, %v1445_v54  ;;  %v1274_v36 = vadd.f32 %v1273_v3, %v5721_v35  ;;  %v1671_v5 = vsub.f32 1.0, %v1442_v60  ;;  %v1655_v61 = vmul.f32 %v1442_v60, %v5599_v63 }
 0x300   : > { %v1819_v54 = vunpack.c.l.b16 %v1787_v24  ;;  %v1470_v3 = vand.u32 2147483648, %v5761_v42  ;;  %vm1464_vm14 = vweird.f32 %v5761_v42  ;;  %vm1469_vm0 = vcmp.eq.f32.partialorder %v1468_v58, 8.507059e+37 }
 0x301   : > { %v1323_v17 = vadd.f32 %v1322_v27, %v1274_v36  ;;  %v1687_v57 = vmul.f32 %v1671_v5, %v5434_v32  ;;  %v1447_v49 = vmul.f32 %v5080_v52, %v1446_v23  ;;  %v1456_v27 = vor.u32 1.1754944e-38, %v1455_v43 }
 0x303   : > { %v5082_v19 = vpop.eup %5081  ;;  %v4389_v44 = vmul.f32 -1.442695, %v1323_v17  ;;  %v5772_v48 = vadd.f32 %v1687_v57, %v1655_v61  ;;  %v1448_v18 = vadd.f32 %v5080_v52, %v1447_v49 }
 0x304   : > { %v5084_v25 = vpop.eup %5083  ;;  %v5776_v37 = vadd.f32 1.0, %v5082_v19  ;;  %v1471_v19 = vor.u32 1.1754944e-38, %v1470_v3 }
 0x305   : > { %v1460_v63 = vmul.f32 %v5084_v25, %v5761_v42  ;;  %5085 = vpow2.f32 %v4389_v44  ;;  %v1788_v32 = vpack.c.bf16 %v5772_v48, %v5772_v48  ;;  %v1452_v1 = vsel %vm1451_vm11, %v5080_v52, %v1448_v18  ;;  %v1330_v52 = vpop.f32.mrf.mxu0 }
 0x306   : > { %5087 = vrcp.f32 %v5776_v37  ;;  %v1276_v45 = vpop.f32.mrf.mxu1  ;;  %v1457_v28 = vsel %vm1454_vm12, %v1456_v27, %v1452_v1  ;;  %vm1465_vm13 = vweird.f32 %v5084_v25  ;;  %v1483_v1 = vand.u32 2147483647, %v5776_v37 }
 0x307   : > { %v1461_v26 = vsub.f32 1.0, %v1460_v63  ;;  %v1277_v53 = vadd.f32 %v1276_v45, %v5721_v35  ;;  %v1820_v55 = vunpack.c.l.b16 %v1788_v32  ;;  %v1672_v60 = vsub.f32 1.0, %v1457_v28  ;;  %vm1466_vm15 = vmor %vm1464_vm14, %vm1465_vm13 }
 0x308   : > { %v1656_v24 = vmul.f32 %v1457_v28, %v5608_v15  ;;  %v1485_v45 = vand.u32 2147483648, %v5776_v37  ;;  %vm1479_vm2 = vweird.f32 %v5776_v37  ;;  %vm1484_vm4 = vcmp.eq.f32.partialorder %v1483_v1, 8.507059e+37 }
 0x309   : > { %v1326_v23 = vadd.f32 %v5757_v16, %v1277_v53  ;;  %v1835_v36 = vpack.c.b16 %v1820_v55, %v1819_v54  ;;  %v1462_v5 = vmul.f32 %v5084_v25, %v1461_v26  ;;  %v1688_v61 = vmul.f32 %v1672_v60, %v5439_v38 }
 0x30b   : > { %v5086_v11 = vpop.eup %5085  ;;  %v4390_v43 = vmul.f32 -1.442695, %v1326_v23  ;;  %1907 = vmatmul.bf16.vlgmr.msrb.gmra.mxu2 %v1835_v36  ;;  %2354 = vmatmul.bf16.vlgmr.msra.gmra.mxu0 %v1835_v36  ;;  %v1463_v17 = vadd.f32 %v5084_v25, %v1462_v5  ;;  %v5795_v32 = vadd.f32 %v1688_v61, %v1656_v24 }
 0x30c   : > { %v5088_v57 = vpop.eup %5087  ;;  %v5789_v49 = vadd.f32 1.0, %v5086_v11 }
 0x30d   : > { %v1475_v16 = vmul.f32 %v5088_v57, %v5776_v37  ;;  %5089 = vpow2.f32 %v4390_v43  ;;  %v1467_v44 = vsel %vm1466_vm15, %v5084_v25, %v1463_v17  ;;  %vm1480_vm1 = vweird.f32 %v5088_v57  ;;  %v1332_v23 = vpop.f32.mrf.mxu0 }
 0x30e   : > { %5091 = vrcp.f32 %v5789_v49  ;;  %v1278_v18 = vpop.f32.mrf.mxu1  ;;  %v1472_v27 = vsel %vm1469_vm0, %v1471_v19, %v1467_v44  ;;  %v1789_v58 = vpack.c.bf16 %v5795_v32, %v5795_v32  ;;  %vm1481_vm3 = vmor %vm1479_vm2, %vm1480_vm1  ;;  %v1500_v44 = vand.u32 2147483648, %v5789_v49 }
 0x30f   : > { %v1476_v63 = vsub.f32 1.0, %v1475_v16  ;;  %v1279_v42 = vadd.f32 %v1278_v18, %v5721_v35  ;;  %v1673_v38 = vsub.f32 1.0, %v1472_v27  ;;  %v1657_v25 = vmul.f32 %v1472_v27, %v5613_v22 }
 0x310   : > { %v1486_v22 = vor.u32 1.1754944e-38, %v1485_v45  ;;  %v1821_v61 = vunpack.c.l.b16 %v1789_v58  ;;  %v1498_v16 = vand.u32 2147483647, %v5789_v49  ;;  %vm1494_vm6 = vweird.f32 %v5789_v49 }
 0x311   : > { %v1328_v26 = vadd.f32 %v5768_v9, %v1279_v42  ;;  %v1689_v15 = vmul.f32 %v1673_v38, %v5444_v41  ;;  %v1477_v28 = vmul.f32 %v5088_v57, %v1476_v63 }
 0x312   : > { %vm1499_vm8 = vcmp.eq.f32.partialorder %v1498_v16, 8.507059e+37 }
 0x313   : > { %v5090_v53 = vpop.eup %5089  ;;  %v4391_v54 = vmul.f32 -1.442695, %v1328_v26  ;;  %v5803_v55 = vadd.f32 %v1689_v15, %v1657_v25  ;;  %v1478_v3 = vadd.f32 %v5088_v57, %v1477_v28  ;;  %v1501_v25 = vor.u32 1.1754944e-38, %v1500_v44 }
 0x314   : > { %v5092_v60 = vpop.eup %5091  ;;  %v5807_v36 = vadd.f32 1.0, %v5090_v53 }
 0x315   : > { %v1490_v41 = vmul.f32 %v5092_v60, %v5789_v49  ;;  %5093 = vpow2.f32 %v4391_v54  ;;  %v1790_v9 = vpack.c.bf16 %v5803_v55, %v5803_v55  ;;  %v1482_v37 = vsel %vm1481_vm3, %v5088_v57, %v1478_v3  ;;  %v1335_v53 = vpop.f32.mrf.mxu0 }
 0x316   : > { %5095 = vrcp.f32 %v5807_v36  ;;  %v1281_v5 = vpop.f32.mrf.mxu1  ;;  %v1487_v11 = vsel %vm1484_vm4, %v1486_v22, %v1482_v37  ;;  %vm1495_vm5 = vweird.f32 %v5092_v60  ;;  %vm1509_vm10 = vweird.f32 %v5807_v36 }
 0x317   : > { %v1491_v43 = vsub.f32 1.0, %v1490_v41  ;;  %v1282_v17 = vadd.f32 %v1281_v5, %v5721_v35  ;;  %v1822_v19 = vunpack.c.l.b16 %v1790_v9  ;;  %v1674_v24 = vsub.f32 1.0, %v1487_v11  ;;  %vm1496_vm7 = vmor %vm1494_vm6, %vm1495_vm5 }
 0x318   : > { %v1658_v28 = vmul.f32 %v1487_v11, %v5622_v40  ;;  %v1513_v41 = vand.u32 2147483647, %v5807_v36  ;;  %v1515_v9 = vand.u32 2147483648, %v5807_v36 }
 0x319   : > { %v1331_v18 = vadd.f32 %v1330_v52, %v1282_v17  ;;  %v1836_v27 = vpack.c.b16 %v1822_v19, %v1821_v61  ;;  %v1492_v63 = vmul.f32 %v5092_v60, %v1491_v43  ;;  %v1690_v1 = vmul.f32 %v1674_v24, %v5449_v47 }
 0x31a   : > { %vm1514_vm12 = vcmp.eq.f32.partialorder %v1513_v41, 8.507059e+37 }
 0x31b   : > { %v5094_v42 = vpop.eup %5093  ;;  %v4392_v57 = vmul.f32 -1.442695, %v1331_v18  ;;  %1912 = vmatmul.bf16.gmra.mxu2 %v1836_v27  ;;  %2359 = vmatmul.bf16.gmra.mxu0 %v1836_v27  ;;  %v1493_v38 = vadd.f32 %v5092_v60, %v1492_v63  ;;  %v5825_v22 = vadd.f32 %v1690_v1, %v1658_v28 }
 0x31c   : > { %v5096_v45 = vpop.eup %5095  ;;  %v5819_v26 = vadd.f32 1.0, %v5094_v42 }
 0x31d   : > { %v1505_v52 = vmul.f32 %v5096_v45, %v5807_v36  ;;  %5097 = vpow2.f32 %v4392_v57  ;;  %v1497_v15 = vsel %vm1496_vm7, %v5092_v60, %v1493_v38  ;;  %vm1510_vm9 = vweird.f32 %v5096_v45  ;;  %v1337_v38 = vpop.f32.mrf.mxu0 }
 0x31e   : > { %5099 = vrcp.f32 %v5819_v26  ;;  %v1283_v54 = vpop.f32.mrf.mxu1  ;;  %v1502_v58 = vsel %vm1499_vm8, %v1501_v25, %v1497_v15  ;;  %v1791_v61 = vpack.c.bf16 %v5825_v22, %v5825_v22  ;;  %vm1511_vm11 = vmor %vm1509_vm10, %vm1510_vm9  ;;  %v1528_v1 = vand.u32 2147483647, %v5819_v26 }
 0x31f   : > { %v1506_v49 = vsub.f32 1.0, %v1505_v52  ;;  %v1284_v47 = vadd.f32 %v1283_v54, %v5721_v35  ;;  %v1675_v3 = vsub.f32 1.0, %v1502_v58  ;;  %v1659_v60 = vmul.f32 %v1502_v58, %v5627_v51 }
 0x320   : > { %v1516_v51 = vor.u32 1.1754944e-38, %v1515_v9  ;;  %v1823_v42 = vunpack.c.l.b16 %v1791_v61  ;;  %v1530_v25 = vand.u32 2147483648, %v5819_v26  ;;  %vm1524_vm14 = vweird.f32 %v5819_v26 }
 0x321   : > { %v1333_v37 = vadd.f32 %v1332_v23, %v1284_v47  ;;  %v1691_v40 = vmul.f32 %v1675_v3, %v5454_v50  ;;  %v1507_v5 = vmul.f32 %v5096_v45, %v1506_v49  ;;  %vm1529_vm0 = vcmp.eq.f32.partialorder %v1528_v1, 8.507059e+37 }
 0x322   : > { %v1531_v9 = vor.u32 1.1754944e-38, %v1530_v25 }
 0x323   : > { %v5098_v11 = vpop.eup %5097  ;;  %v4393_v43 = vmul.f32 -1.442695, %v1333_v37  ;;  %v5832_v17 = vadd.f32 %v1691_v40, %v1659_v60  ;;  %v1508_v19 = vadd.f32 %v5096_v45, %v1507_v5 }
 0x324   : > { %v5100_v16 = vpop.eup %5099  ;;  %v5836_v44 = vadd.f32 1.0, %v5098_v11 }
 0x325   : > { %v1520_v50 = vmul.f32 %v5100_v16, %v5819_v26  ;;  %5101 = vpow2.f32 %v4393_v43  ;;  %v1792_v23 = vpack.c.bf16 %v5832_v17, %v5832_v17  ;;  %v1512_v36 = vsel %vm1511_vm11, %v5096_v45, %v1508_v19 }
 0x326   : > { %5103 = vrcp.f32 %v5836_v44  ;;  %v1286_v24 = vpop.f32.mrf.mxu1  ;;  %v1517_v18 = vsel %vm1514_vm12, %v1516_v51, %v1512_v36  ;;  %vm1525_vm13 = vweird.f32 %v5100_v16  ;;  %v1543_v61 = vand.u32 2147483647, %v5836_v44 }
 0x327   : > { %v1521_v27 = vsub.f32 1.0, %v1520_v50  ;;  %v1287_v63 = vadd.f32 %v1286_v24, %v5721_v35  ;;  %v1824_v57 = vunpack.c.l.b16 %v1792_v23  ;;  %v1676_v52 = vsub.f32 1.0, %v1517_v18  ;;  %vm1526_vm15 = vmor %vm1524_vm14, %vm1525_vm13  ;;  %v1340_v23 = vpop.f32.mrf.mxu0 }
 0x328   : > { %v1660_v60 = vmul.f32 %v1517_v18, %v5636_v4  ;;  %v1545_v19 = vand.u32 2147483648, %v5836_v44  ;;  %vm1539_vm2 = vweird.f32 %v5836_v44  ;;  %vm1544_vm4 = vcmp.eq.f32.partialorder %v1543_v61, 8.507059e+37 }
 0x329   : > { %v1336_v15 = vadd.f32 %v1335_v53, %v1287_v63  ;;  %v1837_v28 = vpack.c.b16 %v1824_v57, %v1823_v42  ;;  %v1522_v54 = vmul.f32 %v5100_v16, %v1521_v27  ;;  %v1692_v47 = vmul.f32 %v1676_v52, %v5459_v56 }
 0x32b   : > { %v5102_v45 = vpop.eup %5101  ;;  %v4394_v58 = vmul.f32 -1.442695, %v1336_v15  ;;  %1917 = vmatmul.bf16.gmra.mxu2 %v1837_v28  ;;  %2364 = vmatmul.bf16.gmra.mxu0 %v1837_v28  ;;  %v1523_v49 = vadd.f32 %v5100_v16, %v1522_v54  ;;  %v5854_v43 = vadd.f32 %v1692_v47, %v1660_v60 }
 0x32c   : > { %v5104_v3 = vpop.eup %5103  ;;  %v5848_v41 = vadd.f32 1.0, %v5102_v45 }
 0x32d   : > { %v1535_v53 = vmul.f32 %v5104_v3, %v5836_v44  ;;  %5105 = vpow2.f32 %v4394_v58  ;;  %v1527_v37 = vsel %vm1526_vm15, %v5100_v16, %v1523_v49  ;;  %vm1540_vm1 = vweird.f32 %v5104_v3 }
 0x32e   : > { %5107 = vrcp.f32 %v5848_v41  ;;  %v1288_v40 = vpop.f32.mrf.mxu1  ;;  %v1532_v5 = vsel %vm1529_vm0, %v1531_v9, %v1527_v37  ;;  %v1793_v27 = vpack.c.bf16 %v5854_v43, %v5854_v43  ;;  %vm1541_vm3 = vmor %vm1539_vm2, %vm1540_vm1  ;;  %v1558_v45 = vand.u32 2147483647, %v5848_v41 }
 0x32f   : > { %v1536_v11 = vsub.f32 1.0, %v1535_v53  ;;  %v1289_v26 = vadd.f32 %v1288_v40, %v5721_v35  ;;  %v1677_v56 = vsub.f32 1.0, %v1532_v5  ;;  %v1661_v16 = vmul.f32 %v1532_v5, %v5641_v10 }
 0x330   : > { %v1546_v10 = vor.u32 1.1754944e-38, %v1545_v19  ;;  %v1825_v28 = vunpack.c.l.b16 %v1793_v27  ;;  %v1560_v58 = vand.u32 2147483648, %v5848_v41  ;;  %vm1554_vm6 = vweird.f32 %v5848_v41 }
 0x331   : > { %v1338_v51 = vadd.f32 %v1337_v38, %v1289_v26  ;;  %v1693_v4 = vmul.f32 %v1677_v56, %v5464_v59  ;;  %v1537_v50 = vmul.f32 %v5104_v3, %v1536_v11  ;;  %v1342_v11 = vpop.f32.mrf.mxu0  ;;  %vm1559_vm8 = vcmp.eq.f32.partialorder %v1558_v45, 8.507059e+37 }
 0x332   : > { %v1561_v56 = vor.u32 1.1754944e-38, %v1560_v58 }
 0x333   : > { %v5106_v36 = vpop.eup %5105  ;;  %v4395_v24 = vmul.f32 -1.442695, %v1338_v51  ;;  %v5861_v18 = vadd.f32 %v1693_v4, %v1661_v16  ;;  %v1538_v63 = vadd.f32 %v5104_v3, %v1537_v50 }
 0x334   : > { %v5108_v42 = vpop.eup %5107  ;;  %v5865_v57 = vadd.f32 1.0, %v5106_v36 }
 0x335   : > { %v1550_v59 = vmul.f32 %v5108_v42, %v5848_v41  ;;  %5109 = vpow2.f32 %v4395_v24  ;;  %v1794_v44 = vpack.c.bf16 %v5861_v18, %v5861_v18  ;;  %v1542_v38 = vsel %vm1541_vm3, %v5104_v3, %v1538_v63 }
 0x336   : > { %5111 = vrcp.f32 %v5865_v57  ;;  %v1291_v1 = vpop.f32.mrf.mxu1  ;;  %v1547_v25 = vsel %vm1544_vm4, %v1546_v10, %v1542_v38  ;;  %vm1555_vm5 = vweird.f32 %v5108_v42  ;;  %v1573_v36 = vand.u32 2147483647, %v5865_v57 }
 0x337   : > { %v1551_v52 = vsub.f32 1.0, %v1550_v59  ;;  %v1292_v15 = vadd.f32 %v1291_v1, %v5721_v35  ;;  %v1826_v54 = vunpack.c.l.b16 %v1794_v44  ;;  %v1678_v49 = vsub.f32 1.0, %v1547_v25  ;;  %vm1556_vm7 = vmor %vm1554_vm6, %vm1555_vm5 }
 0x338   : > { %v1662_v51 = vmul.f32 %v1547_v25, %v5650_v30  ;;  %v1575_v24 = vand.u32 2147483648, %v5865_v57  ;;  %vm1569_vm10 = vweird.f32 %v5865_v57  ;;  %vm1574_vm12 = vcmp.eq.f32.partialorder %v1573_v36, 8.507059e+37 }
 0x339   : > { %v1341_v47 = vadd.f32 %v1340_v23, %v1292_v15  ;;  %v1838_v9 = vpack.c.b16 %v1826_v54, %v1825_v28  ;;  %v1552_v53 = vmul.f32 %v5108_v42, %v1551_v52  ;;  %v1694_v40 = vmul.f32 %v1678_v49, %v5469_v2  ;;  %v1345_v28 = vpop.f32.mrf.mxu0 }
 0x33b   : > { %v5110_v37 = vpop.eup %5109  ;;  %v4396_v3 = vmul.f32 -1.442695, %v1341_v47  ;;  %1922 = vmatmul.bf16.gmra.mxu2 %v1838_v9  ;;  %2369 = vmatmul.bf16.gmra.mxu0 %v1838_v9  ;;  %v1553_v60 = vadd.f32 %v5108_v42, %v1552_v53  ;;  %v5883_v23 = vadd.f32 %v1694_v40, %v1662_v51 }
 0x33c   : > { %v5112_v5 = vpop.eup %5111  ;;  %v5877_v26 = vadd.f32 1.0, %v5110_v37 }
 0x33d   : > { %v1565_v61 = vmul.f32 %v5112_v5, %v5865_v57  ;;  %5113 = vpow2.f32 %v4396_v3  ;;  %v1557_v19 = vsel %vm1556_vm7, %v5108_v42, %v1553_v60  ;;  %vm1570_vm9 = vweird.f32 %v5112_v5 }
 0x33e   : > { %5115 = vrcp.f32 %v5877_v26  ;;  %v1293_v16 = vpop.f32.mrf.mxu1  ;;  %v1562_v4 = vsel %vm1559_vm8, %v1561_v56, %v1557_v19  ;;  %v1795_v38 = vpack.c.bf16 %v5883_v23, %v5883_v23  ;;  %vm1571_vm11 = vmor %vm1569_vm10, %vm1570_vm9  ;;  %v1588_v53 = vand.u32 2147483647, %v5877_v26 }
 0x33f   : > { %v1566_v41 = vsub.f32 1.0, %v1565_v61  ;;  %v1294_v2 = vadd.f32 %v1293_v16, %v5721_v35  ;;  %v1679_v50 = vsub.f32 1.0, %v1562_v4  ;;  %v1663_v63 = vmul.f32 %v1562_v4, %v5655_v39 }
 0x340   : > { %v1576_v39 = vor.u32 1.1754944e-38, %v1575_v24  ;;  %v1827_v47 = vunpack.c.l.b16 %v1795_v38  ;;  %v1590_v37 = vand.u32 2147483648, %v5877_v26  ;;  %vm1584_vm14 = vweird.f32 %v5877_v26 }
 0x341   : > { %v1343_v27 = vadd.f32 %v1342_v11, %v1294_v2  ;;  %v1695_v30 = vmul.f32 %v1679_v50, %v5474_v6  ;;  %v1567_v42 = vmul.f32 %v5112_v5, %v1566_v41  ;;  %vm1589_vm0 = vcmp.eq.f32.partialorder %v1588_v53, 8.507059e+37 }
 0x342   : > { %v1591_v4 = vor.u32 1.1754944e-38, %v1590_v37 }
 0x343   : > { %v5114_v10 = vpop.eup %5113  ;;  %v4397_v59 = vmul.f32 -1.442695, %v1343_v27  ;;  %v5890_v44 = vadd.f32 %v1695_v30, %v1663_v63  ;;  %v1568_v1 = vadd.f32 %v5112_v5, %v1567_v42 }
 0x344   : > { %v5116_v25 = vpop.eup %5115  ;;  %v5894_v52 = vadd.f32 1.0, %v5114_v10 }
 0x345   : > { %v1580_v6 = vmul.f32 %v5116_v25, %v5877_v26  ;;  %5117 = vpow2.f32 %v4397_v59  ;;  %v1796_v57 = vpack.c.bf16 %v5890_v44, %v5890_v44  ;;  %v1572_v15 = vsel %vm1571_vm11, %v5112_v5, %v1568_v1 }
 0x346   : > { %5119 = vrcp.f32 %v5894_v52  ;;  %v1296_v54 = vpop.f32.mrf.mxu1  ;;  %v1577_v45 = vsel %vm1574_vm12, %v1576_v39, %v1572_v15  ;;  %vm1585_vm13 = vweird.f32 %v5116_v25  ;;  %v1603_v42 = vand.u32 2147483647, %v5894_v52 }
 0x347   : > { %v1581_v58 = vsub.f32 1.0, %v1580_v6  ;;  %v1297_v49 = vadd.f32 %v1296_v54, %v5721_v35  ;;  %v1828_v9 = vunpack.c.l.b16 %v1796_v57  ;;  %v1680_v3 = vsub.f32 1.0, %v1577_v45  ;;  %vm1586_vm15 = vmor %vm1584_vm14, %vm1585_vm13 }
 0x348   : > { %v1664_v50 = vmul.f32 %v1577_v45, %v5664_v62  ;;  %v1605_v10 = vand.u32 2147483648, %v5894_v52  ;;  %vm1599_vm2 = vweird.f32 %v5894_v52  ;;  %vm1604_vm4 = vcmp.eq.f32.partialorder %v1603_v42, 8.507059e+37 }
 0x349   : > { %v1346_v60 = vadd.f32 %v1345_v28, %v1297_v49  ;;  %v1839_v40 = vpack.c.b16 %v1828_v9, %v1827_v47  ;;  %v1582_v11 = vmul.f32 %v5116_v25, %v1581_v58  ;;  %v1696_v19 = vmul.f32 %v1680_v3, %v5479_v12  ;;  %v1347_v12 = vpop.f32.mrf.mxu0 }
 0x34a   : > { %v1606_v54 = vor.u32 1.1754944e-38, %v1605_v10 }
 0x34b   : > { %v5118_v5 = vpop.eup %5117  ;;  %v4398_v56 = vmul.f32 -1.442695, %v1346_v60  ;;  %1927 = vmatmul.bf16.gmra.mxu2 %v1839_v40  ;;  %2374 = vmatmul.bf16.gmra.mxu0 %v1839_v40  ;;  %v1583_v61 = vadd.f32 %v5116_v25, %v1582_v11  ;;  %v5909_v30 = vadd.f32 %v1696_v19, %v1664_v50 }
 0x34c   : > { %v5120_v51 = vpop.eup %5119  ;;  %v1411_v16 = vadd.f32 1.0, %v5118_v5 }
 0x34d   : > { %v1595_v41 = vmul.f32 %v5120_v51, %v5894_v52  ;;  %5121 = vpow2.f32 %v4398_v56  ;;  %v1587_v2 = vsel %vm1586_vm15, %v5116_v25, %v1583_v61  ;;  %vm1600_vm1 = vweird.f32 %v5120_v51 }
 0x34e   : > { %5123 = vrcp.f32 %v1411_v16  ;;  %v1298_v36 = vpop.f32.mrf.mxu1  ;;  %v1592_v24 = vsel %vm1589_vm0, %v1591_v4, %v1587_v2  ;;  %v1797_v6 = vpack.c.bf16 %v5909_v30, %v5909_v30  ;;  %vm1601_vm3 = vmor %vm1599_vm2, %vm1600_vm1  ;;  %v1620_v53 = vand.u32 2147483648, %v1411_v16 }
 0x34f   : > { %v1596_v27 = vsub.f32 1.0, %v1595_v41  ;;  %v1299_v63 = vadd.f32 %v1298_v36, %v5721_v35  ;;  %v1681_v26 = vsub.f32 1.0, %v1592_v24  ;;  %v1665_v38 = vmul.f32 %v1592_v24, %v5671_v8 }
 0x350   : > { %v1829_v49 = vunpack.c.l.b16 %v1797_v6  ;;  %v1618_v60 = vand.u32 2147483647, %v1411_v16  ;;  %vm1614_vm6 = vweird.f32 %v1411_v16  ;;  %v1621_v19 = vor.u32 1.1754944e-38, %v1620_v53 }
 0x351   : > { %v1348_v59 = vadd.f32 %v1347_v12, %v1299_v63  ;;  %v1697_v62 = vmul.f32 %v1681_v26, %v5482_v13  ;;  %v1597_v1 = vmul.f32 %v5120_v51, %v1596_v27 }
 0x352   : > { %vm1619_vm8 = vcmp.eq.f32.partialorder %v1618_v60, 8.507059e+37 }
 0x353   : > { %v5122_v25 = vpop.eup %5121  ;;  %v4399_v39 = vmul.f32 -1.442695, %v1348_v59  ;;  %v5916_v35 = vadd.f32 %v1697_v62, %v1665_v38  ;;  %v1598_v57 = vadd.f32 %v5120_v51, %v1597_v1 }
 0x354   : > { %v5124_v15 = vpop.eup %5123  ;;  %v1412_v28 = vadd.f32 1.0, %v5122_v25 }
 0x355   : > { %v1610_v8 = vmul.f32 %v5124_v15, %v1411_v16  ;;  %5125 = vpow2.f32 %v4399_v39  ;;  %v1798_v13 = vpack.c.bf16 %v5916_v35, %v5916_v35  ;;  %v1602_v52 = vsel %vm1601_vm3, %v5120_v51, %v1598_v57 }
 0x356   : > { %5127 = vrcp.f32 %v1412_v28  ;;  %v1607_v45 = vsel %vm1604_vm4, %v1606_v54, %v1602_v52  ;;  %vm1615_vm5 = vweird.f32 %v5124_v15  ;;  %v1633_v27 = vand.u32 2147483647, %v1412_v28 }
 0x357   : > { %v1611_v58 = vsub.f32 1.0, %v1610_v8  ;;  %v1830_v47 = vunpack.c.l.b16 %v1798_v13  ;;  %v1682_v9 = vsub.f32 1.0, %v1607_v45  ;;  %vm1616_vm7 = vmor %vm1614_vm6, %vm1615_vm5  ;;  %v1666_v41 = vmul.f32 %v1607_v45, %v5680_v34 }
 0x358   : > { %v1635_v63 = vand.u32 2147483648, %v1412_v28  ;;  %vm1629_vm10 = vweird.f32 %v1412_v28  ;;  %vm1634_vm12 = vcmp.eq.f32.partialorder %v1633_v27, 8.507059e+37 }
 0x359   : > { %v1840_v37 = vpack.c.b16 %v1830_v47, %v1829_v49  ;;  %v1612_v3 = vmul.f32 %v5124_v15, %v1611_v58  ;;  %v1698_v5 = vmul.f32 %v1682_v9, %v5489_v20 }
 0x35a   : > { %v1636_v59 = vor.u32 1.1754944e-38, %v1635_v63 }
 0x35b   : > { %v5126_v40 = vpop.eup %5125  ;;  %1932 = vmatmul.bf16.gmra.mxu2 %v1840_v37  ;;  %2379 = vmatmul.bf16.gmra.mxu0 %v1840_v37  ;;  %v1613_v11 = vadd.f32 %v5124_v15, %v1612_v3  ;;  %v5925_v24 = vadd.f32 %v1698_v5, %v1666_v41 }
 0x35c   : > { %v5128_v56 = vpop.eup %5127  ;;  %v1413_v61 = vadd.f32 1.0, %v5126_v40 }
 0x35d   : > { %v1625_v51 = vmul.f32 %v5128_v56, %v1412_v28  ;;  %v1617_v4 = vsel %vm1616_vm7, %v5124_v15, %v1613_v11  ;;  %vm1630_vm9 = vweird.f32 %v5128_v56  ;;  %v1799_v42 = vpack.c.bf16 %v5925_v24, %v5925_v24 }
 0x35e   : > { %5129 = vrcp.f32 %v1413_v61  ;;  %v1622_v2 = vsel %vm1619_vm8, %v1621_v19, %v1617_v4  ;;  %vm1631_vm11 = vmor %vm1629_vm10, %vm1630_vm9  ;;  %v1650_v57 = vand.u32 2147483648, %v1413_v61  ;;  %v1648_v8 = vand.u32 2147483647, %v1413_v61 }
 0x35f   : > { %v1626_v50 = vsub.f32 1.0, %v1625_v51  ;;  %v1683_v36 = vsub.f32 1.0, %v1622_v2  ;;  %v1667_v16 = vmul.f32 %v1622_v2, %v5685_v46  ;;  %v1831_v25 = vunpack.c.l.b16 %v1799_v42 }
 0x360   : > { %vm1644_vm14 = vweird.f32 %v1413_v61  ;;  %v1651_v52 = vor.u32 1.1754944e-38, %v1650_v57  ;;  %vm1649_vm0 = vcmp.eq.f32.partialorder %v1648_v8, 8.507059e+37  ;;  %v4973_v57 = vld [vmem:[%s5512_s19 + $0x68] sm:$0xff]  ;;  %v4974_v8 = vld [vmem:[%s5512_s19 + $0x70] sm:$0xff] }
 0x361   : > { %v1699_v20 = vmul.f32 %v1683_v36, %v5492_v21  ;;  %v1627_v26 = vmul.f32 %v5128_v56, %v1626_v50 }
 0x363   : > { %v5929_v12 = vadd.f32 %v1699_v20, %v1667_v16  ;;  %v1628_v34 = vadd.f32 %v5128_v56, %v1627_v26 }
 0x364   : > { %v5130_v10 = vpop.eup %5129 }
 0x365   : > { %v1640_v38 = vmul.f32 %v5130_v10, %v1413_v61  ;;  %v1800_v62 = vpack.c.bf16 %v5929_v12, %v5929_v12  ;;  %v1632_v1 = vsel %vm1631_vm11, %v5128_v56, %v1628_v34  ;;  %vm1645_vm13 = vweird.f32 %v5130_v10 }
 0x366   : > { %v1637_v46 = vsel %vm1634_vm12, %v1636_v59, %v1632_v1  ;;  %vm1646_vm15 = vmor %vm1644_vm14, %vm1645_vm13 }
 0x367   : > { %v1641_v21 = vsub.f32 1.0, %v1640_v38  ;;  %v1832_v39 = vunpack.c.l.b16 %v1800_v62  ;;  %v1684_v6 = vsub.f32 1.0, %v1637_v46  ;;  %v1668_v58 = vmul.f32 %v1637_v46, %v5694_v7  ;;  %v4968_v46 = vld [vmem:[%s5512_s19 + $0x40] sm:$0xff] }
 0x369   : > { %v1841_v15 = vpack.c.b16 %v1832_v39, %v1831_v25  ;;  %v1642_v54 = vmul.f32 %v5130_v10, %v1641_v21  ;;  %v1700_v13 = vmul.f32 %v1684_v6, %v5499_v31  ;;  %v4969_v21 = vld [vmem:[%s5512_s19 + $0x48] sm:$0xff]  ;;  %v4970_v25 = vld [vmem:[%s5512_s19 + $0x50] sm:$0xff]  ;;  %v4971_v39 = vld [vmem:[%s5512_s19 + $0x58] sm:$0xff] }
 0x36a   : > { %v4972_v6 = vld [vmem:[%s5512_s19 + $0x60] sm:$0xff] }
 0x36b   : > { %1937 = vmatmul.bf16.gmra.mxu2 %v1841_v15  ;;  %2384 = vmatmul.bf16.gmra.mxu0 %v1841_v15  ;;  %v1643_v28 = vadd.f32 %v5130_v10, %v1642_v54  ;;  %v5937_v9 = vadd.f32 %v1700_v13, %v1668_v58  ;;  %v4991_v15 = vld [vmem:[%s6906_s9 + $0xb8] sm:$0xff]  ;;  %v4990_v54 = vld [vmem:[%s6906_s9 + $0xb0] sm:$0xff]  ;;  %v4988_v13 = vld [vmem:[%s6906_s9 + $0xa0] sm:$0xff] }
 0x36c   : > { %2297 = vmatpush.bf16.msra.mxu1 %v4991_v15  ;;  %v4986_v58 = vld [vmem:[%s6906_s9 + $0x90] sm:$0xff] }
 0x36d   : > { %v1647_v45 = vsel %vm1646_vm15, %v5130_v10, %v1643_v28  ;;  %v1801_v60 = vpack.c.bf16 %v5937_v9, %v5937_v9  ;;  %v4989_v28 = vld [vmem:[%s6906_s9 + $0xa8] sm:$0xff] }
 0x36e   : > { %v1652_v49 = vsel %vm1649_vm0, %v1651_v52, %v1647_v45  ;;  %v4975_v52 = vld [vmem:[%s5512_s19 + $0x78] sm:$0xff] }
 0x36f   : > { %v1685_v47 = vsub.f32 1.0, %v1652_v49  ;;  %v1669_v53 = vmul.f32 %v1652_v49, %v5698_v14  ;;  %v1833_v40 = vunpack.c.l.b16 %v1801_v60  ;;  %v4987_v45 = vld [vmem:[%s6906_s9 + $0x98] sm:$0xff]  ;;  %v4985_v49 = vld [vmem:[%s6906_s9 + $0x88] sm:$0xff] }
 0x370   : > { %2298 = vmatpush.bf16.msra.mxu1 %v4990_v54 }
 0x371   : > { %v1701_v37 = vmul.f32 %v1685_v47, %v5502_v33  ;;  %v4984_v47 = vld [vmem:[%s6906_s9 + $0x80] sm:$0xff] }
 0x373   : > { %v5941_v3 = vadd.f32 %v1701_v37, %v1669_v53  ;;  %v5982_v53 = vld [vmem:[%s6907_s10 + $0x4] sm:$0xf] }
 0x374   : > { %2299 = vmatpush.bf16.msra.mxu1 %v4989_v28  ;;  %v5985_v37 = vperm.slane %v5982_v53, 0  ;;  %v5988_v60 = vperm.slane %v5982_v53, 1 }
 0x375   : > { %v1802_v31 = vpack.c.bf16 %v5941_v3, %v5941_v3 }
 0x377   : > { %v1834_v11 = vunpack.c.l.b16 %v1802_v31 }
 0x378   : > { %2300 = vmatpush.bf16.msra.mxu1 %v4988_v13 }
 0x379   : > { %v1842_v5 = vpack.c.b16 %v1834_v11, %v1833_v40  ;;  %v5992_v11 = vperm.slane %v5982_v53, 2 }
 0x37b   : > { %1942 = vmatmul.bf16.gmra.mxu2 %v1842_v5  ;;  %2389 = vmatmul.bf16.gmra.mxu0 %v1842_v5 }
 0x37c   : > { %2301 = vmatpush.bf16.msra.mxu1 %v4987_v45 }
 0x380   : > { %2302 = vmatpush.bf16.msra.mxu1 %v4986_v58 }
 0x384   : > { %2303 = vmatpush.bf16.msra.mxu1 %v4985_v49 }
 0x388   : > { %2304 = vmatpush.bf16.msra.mxu1 %v4984_v47 }
 0x38e   : > { %v1908_v7 = vpop.f32.mrf.mxu2 }
 0x396   : > { %v1910_v56 = vpop.f32.mrf.mxu2 }
 0x397   : > { %v1948_v1 = vpack.c.bf16 %v1910_v56, %v1908_v7 }
 0x39e   : > { %v1913_v61 = vpop.f32.mrf.mxu2 }
 0x3a6   : > { %v1915_v19 = vpop.f32.mrf.mxu2 }
 0x3a7   : > { %v1949_v62 = vpack.c.bf16 %v1915_v19, %v1913_v61 }
 0x3ae   : > { %v1918_v14 = vpop.f32.mrf.mxu2 }
 0x3b6   : > { %v1920_v51 = vpop.f32.mrf.mxu2 }
 0x3b7   : > { %v1950_v38 = vpack.c.bf16 %v1920_v51, %v1918_v14 }
 0x3be   : > { %v1923_v33 = vpop.f32.mrf.mxu2 }
 0x3c6   : > { %v1925_v4 = vpop.f32.mrf.mxu2 }
 0x3c7   : > { %v1951_v59 = vpack.c.bf16 %v1925_v4, %v1923_v33 }
 0x3ce   : > { %v1928_v41 = vpop.f32.mrf.mxu2 }
 0x3d6   : > { %v1930_v2 = vpop.f32.mrf.mxu2 }
 0x3d7   : > { %v1952_v10 = vpack.c.bf16 %v1930_v2, %v1928_v41 }
 0x3de   : > { %v1933_v50 = vpop.f32.mrf.mxu2 }
 0x3e6   : > { %v1935_v36 = vpop.f32.mrf.mxu2 }
 0x3e7   : > { %v1953_v34 = vpack.c.bf16 %v1935_v36, %v1933_v50 }
 0x3ee   : > { %v1938_v27 = vpop.f32.mrf.mxu2 }
 0x3f6   : > { %v1940_v63 = vpop.f32.mrf.mxu2 }
 0x3f7   : > { %v1954_v42 = vpack.c.bf16 %v1940_v63, %v1938_v27 }
 0x3fe   : > { %v1943_v16 = vpop.f32.mrf.mxu2 }
 0x406   : > { %v1945_v20 = vpop.f32.mrf.mxu2 }
 0x407   : > { %v1955_v26 = vpack.c.bf16 %v1945_v20, %v1943_v16 }
 0x409   : > { %2005 = vmatpush.bf16.msra.mxu3 %v1955_v26 }
 0x40d   : > { %2006 = vmatpush.bf16.msra.mxu3 %v1954_v42 }
 0x411   : > { %2007 = vmatpush.bf16.msra.mxu3 %v1953_v34 }
 0x415   : > { %2008 = vmatpush.bf16.msra.mxu3 %v1952_v10 }
 0x419   : > { %2009 = vmatpush.bf16.msra.mxu3 %v1951_v59 }
 0x41d   : > { %2010 = vmatpush.bf16.msra.mxu3 %v1950_v38 }
 0x421   : > { %2011 = vmatpush.bf16.msra.mxu3 %v1949_v62 }
 0x425   : > { %2012 = vmatpush.bf16.msra.mxu3 %v1948_v1 }
 0x428   : > { %2013 = vmatmul.bf16.vlgmr.msra.gmra.mxu3 %v4968_v46 }
 0x438   : > { %2018 = vmatmul.bf16.gmra.mxu3 %v4969_v21 }
 0x448   : > { %2023 = vmatmul.bf16.gmra.mxu3 %v4970_v25 }
 0x458   : > { %2028 = vmatmul.bf16.gmra.mxu3 %v4971_v39 }
 0x468   : > { %2033 = vmatmul.bf16.gmra.mxu3 %v4972_v6 }
 0x478   : > { %2038 = vmatmul.bf16.gmra.mxu3 %v4973_v57 }
 0x488   : > { %2043 = vmatmul.bf16.gmra.mxu3 %v4974_v8 }
 0x498   : > { %2048 = vmatmul.bf16.gmra.mxu3 %v4975_v52 }
 0x4ab   : > { %v2014_v31 = vpop.f32.mrf.mxu3 }
 0x4ac   : > { %v2015_v40 = vadd.f32 %v2014_v31, %v5985_v37 }
 0x4ae   : > { %v2055_v5 = vmul.f32 %v5988_v60, %v2015_v40 }
 0x4b0   : > { %v2072_v7 = vadd.f32 %v5992_v11, %v2055_v5 }
 0x4b2   : > { %v2104_v61 = vmul.f32 0.01, %v2072_v7  ;;  %vm2088_vm1 = vcmp.gt.f32.partialorder %v2072_v7, 0.0 }
 0x4b3   : > { %v2016_v56 = vpop.f32.mrf.mxu3 }
 0x4b4   : > { %v2017_v19 = vadd.f32 %v2016_v56, %v5985_v37  ;;  %v5998_v51 = vsel %vm2088_vm1, %v2072_v7, %v2104_v61 }
 0x4b5   : > { %v2136_v2 = vpack.c.bf16 %v5998_v51, %v5998_v51 }
 0x4b6   : > { %v2056_v14 = vmul.f32 %v5988_v60, %v2017_v19 }
 0x4b7   : > { %v2168_v16 = vunpack.c.l.b16 %v2136_v2 }
 0x4b8   : > { %v2073_v33 = vadd.f32 %v5992_v11, %v2056_v14 }
 0x4ba   : > { %vm2089_vm2 = vcmp.gt.f32.partialorder %v2073_v33, 0.0  ;;  %v2105_v4 = vmul.f32 0.01, %v2073_v33 }
 0x4bb   : > { %v2019_v41 = vpop.f32.mrf.mxu3 }
 0x4bc   : > { %v6003_v50 = vsel %vm2089_vm2, %v2073_v33, %v2105_v4  ;;  %v2020_v36 = vadd.f32 %v2019_v41, %v5985_v37 }
 0x4bd   : > { %v2137_v27 = vpack.c.bf16 %v6003_v50, %v6003_v50 }
 0x4be   : > { %v2057_v63 = vmul.f32 %v5988_v60, %v2020_v36 }
 0x4bf   : > { %v2169_v20 = vunpack.c.l.b16 %v2137_v27 }
 0x4c0   : > { %v2074_v26 = vadd.f32 %v5992_v11, %v2057_v63 }
 0x4c1   : > { %v2184_v42 = vpack.c.b16 %v2169_v20, %v2168_v16 }
 0x4c2   : > { %v2106_v10 = vmul.f32 0.01, %v2074_v26  ;;  %vm2090_vm3 = vcmp.gt.f32.partialorder %v2074_v26, 0.0 }
 0x4c3   : > { %v2021_v34 = vpop.f32.mrf.mxu3  ;;  %2305 = vmatmul.bf16.vlgmr.msra.gmra.mxu1 %v2184_v42 }
 0x4c4   : > { %v2022_v59 = vadd.f32 %v2021_v34, %v5985_v37  ;;  %v6013_v1 = vsel %vm2090_vm3, %v2074_v26, %v2106_v10 }
 0x4c5   : > { %v2138_v25 = vpack.c.bf16 %v6013_v1, %v6013_v1 }
 0x4c6   : > { %v2058_v38 = vmul.f32 %v5988_v60, %v2022_v59 }
 0x4c7   : > { %v2170_v54 = vunpack.c.l.b16 %v2138_v25 }
 0x4c8   : > { %v2075_v62 = vadd.f32 %v5992_v11, %v2058_v38 }
 0x4ca   : > { %vm2091_vm4 = vcmp.gt.f32.partialorder %v2075_v62, 0.0  ;;  %v2107_v46 = vmul.f32 0.01, %v2075_v62 }
 0x4cb   : > { %v2024_v21 = vpop.f32.mrf.mxu3 }
 0x4cc   : > { %v2025_v39 = vadd.f32 %v2024_v21, %v5985_v37  ;;  %v6018_v6 = vsel %vm2091_vm4, %v2075_v62, %v2107_v46 }
 0x4cd   : > { %v2139_v57 = vpack.c.bf16 %v6018_v6, %v6018_v6 }
 0x4ce   : > { %v2059_v15 = vmul.f32 %v5988_v60, %v2025_v39 }
 0x4cf   : > { %v2171_v8 = vunpack.c.l.b16 %v2139_v57 }
 0x4d0   : > { %v2076_v28 = vadd.f32 %v5992_v11, %v2059_v15 }
 0x4d1   : > { %v2185_v13 = vpack.c.b16 %v2171_v8, %v2170_v54 }
 0x4d2   : > { %v2108_v45 = vmul.f32 0.01, %v2076_v28  ;;  %vm2092_vm5 = vcmp.gt.f32.partialorder %v2076_v28, 0.0 }
 0x4d3   : > { %v2026_v52 = vpop.f32.mrf.mxu3  ;;  %2310 = vmatmul.bf16.gmra.mxu1 %v2185_v13 }
 0x4d4   : > { %v2027_v58 = vadd.f32 %v2026_v52, %v5985_v37  ;;  %v6027_v31 = vsel %vm2092_vm5, %v2076_v28, %v2108_v45 }
 0x4d5   : > { %v2140_v7 = vpack.c.bf16 %v6027_v31, %v6027_v31 }
 0x4d6   : > { %v2060_v49 = vmul.f32 %v5988_v60, %v2027_v58 }
 0x4d7   : > { %v2172_v33 = vunpack.c.l.b16 %v2140_v7 }
 0x4d8   : > { %v2077_v47 = vadd.f32 %v5992_v11, %v2060_v49 }
 0x4da   : > { %vm2093_vm6 = vcmp.gt.f32.partialorder %v2077_v47, 0.0  ;;  %v2109_v40 = vmul.f32 0.01, %v2077_v47 }
 0x4db   : > { %v2029_v5 = vpop.f32.mrf.mxu3 }
 0x4dc   : > { %v2030_v56 = vadd.f32 %v2029_v5, %v5985_v37  ;;  %v6032_v61 = vsel %vm2093_vm6, %v2077_v47, %v2109_v40 }
 0x4dd   : > { %v2141_v19 = vpack.c.bf16 %v6032_v61, %v6032_v61 }
 0x4de   : > { %v2061_v14 = vmul.f32 %v5988_v60, %v2030_v56 }
 0x4df   : > { %v2173_v4 = vunpack.c.l.b16 %v2141_v19 }
 0x4e0   : > { %v2078_v41 = vadd.f32 %v5992_v11, %v2061_v14 }
 0x4e1   : > { %v2186_v2 = vpack.c.b16 %v2173_v4, %v2172_v33 }
 0x4e2   : > { %v2110_v27 = vmul.f32 0.01, %v2078_v41  ;;  %vm2094_vm7 = vcmp.gt.f32.partialorder %v2078_v41, 0.0 }
 0x4e3   : > { %v2031_v36 = vpop.f32.mrf.mxu3  ;;  %2315 = vmatmul.bf16.gmra.mxu1 %v2186_v2 }
 0x4e4   : > { %v2032_v63 = vadd.f32 %v2031_v36, %v5985_v37  ;;  %v6041_v26 = vsel %vm2094_vm7, %v2078_v41, %v2110_v27 }
 0x4e5   : > { %v2142_v10 = vpack.c.bf16 %v6041_v26, %v6041_v26 }
 0x4e6   : > { %v2062_v16 = vmul.f32 %v5988_v60, %v2032_v63 }
 0x4e7   : > { %v2174_v21 = vunpack.c.l.b16 %v2142_v10 }
 0x4e8   : > { %v2079_v20 = vadd.f32 %v5992_v11, %v2062_v16 }
 0x4ea   : > { %v2111_v42 = vmul.f32 0.01, %v2079_v20  ;;  %vm2095_vm8 = vcmp.gt.f32.partialorder %v2079_v20, 0.0 }
 0x4eb   : > { %v2034_v34 = vpop.f32.mrf.mxu3 }
 0x4ec   : > { %v2035_v59 = vadd.f32 %v2034_v34, %v5985_v37  ;;  %v6046_v38 = vsel %vm2095_vm8, %v2079_v20, %v2111_v42 }
 0x4ed   : > { %v2143_v62 = vpack.c.bf16 %v6046_v38, %v6046_v38 }
 0x4ee   : > { %v2063_v46 = vmul.f32 %v5988_v60, %v2035_v59 }
 0x4ef   : > { %v2175_v25 = vunpack.c.l.b16 %v2143_v62 }
 0x4f0   : > { %v2080_v39 = vadd.f32 %v5992_v11, %v2063_v46 }
 0x4f1   : > { %v2187_v57 = vpack.c.b16 %v2175_v25, %v2174_v21 }
 0x4f2   : > { %v2112_v54 = vmul.f32 0.01, %v2080_v39  ;;  %vm2096_vm9 = vcmp.gt.f32.partialorder %v2080_v39, 0.0 }
 0x4f3   : > { %v2036_v15 = vpop.f32.mrf.mxu3  ;;  %2320 = vmatmul.bf16.gmra.mxu1 %v2187_v57 }
 0x4f4   : > { %v2037_v8 = vadd.f32 %v2036_v15, %v5985_v37  ;;  %v6055_v52 = vsel %vm2096_vm9, %v2080_v39, %v2112_v54 }
 0x4f5   : > { %v2144_v49 = vpack.c.bf16 %v6055_v52, %v6055_v52 }
 0x4f6   : > { %v2064_v28 = vmul.f32 %v5988_v60, %v2037_v8 }
 0x4f7   : > { %v2176_v56 = vunpack.c.l.b16 %v2144_v49 }
 0x4f8   : > { %v2081_v13 = vadd.f32 %v5992_v11, %v2064_v28 }
 0x4fa   : > { %v2113_v45 = vmul.f32 0.01, %v2081_v13  ;;  %vm2097_vm10 = vcmp.gt.f32.partialorder %v2081_v13, 0.0 }
 0x4fb   : > { %v2039_v58 = vpop.f32.mrf.mxu3 }
 0x4fc   : > { %v2040_v47 = vadd.f32 %v2039_v58, %v5985_v37  ;;  %v6060_v40 = vsel %vm2097_vm10, %v2081_v13, %v2113_v45 }
 0x4fd   : > { %v2145_v5 = vpack.c.bf16 %v6060_v40, %v6060_v40 }
 0x4fe   : > { %v2065_v7 = vmul.f32 %v5988_v60, %v2040_v47 }
 0x4ff   : > { %v2177_v19 = vunpack.c.l.b16 %v2145_v5 }
 0x500   : > { %v2082_v14 = vadd.f32 %v5992_v11, %v2065_v7 }
 0x501   : > { %v2188_v33 = vpack.c.b16 %v2177_v19, %v2176_v56 }
 0x502   : > { %v2114_v41 = vmul.f32 0.01, %v2082_v14  ;;  %vm2098_vm11 = vcmp.gt.f32.partialorder %v2082_v14, 0.0 }
 0x503   : > { %v2041_v4 = vpop.f32.mrf.mxu3  ;;  %2325 = vmatmul.bf16.gmra.mxu1 %v2188_v33 }
 0x504   : > { %v2042_v2 = vadd.f32 %v2041_v4, %v5985_v37  ;;  %v6069_v63 = vsel %vm2098_vm11, %v2082_v14, %v2114_v41 }
 0x505   : > { %v2146_v42 = vpack.c.bf16 %v6069_v63, %v6069_v63 }
 0x506   : > { %v2066_v36 = vmul.f32 %v5988_v60, %v2042_v2  ;;  %v2355_v2 = vpop.f32.mrf.mxu0 }
 0x507   : > { %v2178_v46 = vunpack.c.l.b16 %v2146_v42 }
 0x508   : > { %v2083_v27 = vadd.f32 %v5992_v11, %v2066_v36 }
 0x50a   : > { %vm2099_vm12 = vcmp.gt.f32.partialorder %v2083_v27, 0.0  ;;  %v2115_v16 = vmul.f32 0.01, %v2083_v27 }
 0x50b   : > { %v2044_v20 = vpop.f32.mrf.mxu3 }
 0x50c   : > { %v2045_v34 = vadd.f32 %v2044_v20, %v5985_v37  ;;  %v6074_v10 = vsel %vm2099_vm12, %v2083_v27, %v2115_v16 }
 0x50d   : > { %v2147_v59 = vpack.c.bf16 %v6074_v10, %v6074_v10 }
 0x50e   : > { %v2067_v62 = vmul.f32 %v5988_v60, %v2045_v34 }
 0x50f   : > { %v2179_v21 = vunpack.c.l.b16 %v2147_v59 }
 0x510   : > { %v2084_v25 = vadd.f32 %v5992_v11, %v2067_v62 }
 0x511   : > { %v2189_v39 = vpack.c.b16 %v2179_v21, %v2178_v46  ;;  %v2357_v21 = vpop.f32.mrf.mxu0 }
 0x512   : > { %v2116_v15 = vmul.f32 0.01, %v2084_v25  ;;  %vm2100_vm13 = vcmp.gt.f32.partialorder %v2084_v25, 0.0 }
 0x513   : > { %v2046_v57 = vpop.f32.mrf.mxu3  ;;  %2330 = vmatmul.bf16.gmra.mxu1 %v2189_v39 }
 0x514   : > { %v2047_v54 = vadd.f32 %v2046_v57, %v5985_v37  ;;  %v6083_v13 = vsel %vm2100_vm13, %v2084_v25, %v2116_v15  ;;  %v5014_v15 = vld [vmem:[%s6905_s8 + $0xb0] sm:$0xff] }
 0x515   : > { %v2148_v49 = vpack.c.bf16 %v6083_v13, %v6083_v13 }
 0x516   : > { %v2068_v8 = vmul.f32 %v5988_v60, %v2047_v54  ;;  %v5030_v54 = vld [vmem:[%s6906_s9 + $0x170] sm:$0xff] }
 0x517   : > { %v2180_v19 = vunpack.c.l.b16 %v2148_v49 }
 0x518   : > { %v2085_v28 = vadd.f32 %v5992_v11, %v2068_v8  ;;  %v6118_v8 = vperm.slane %v5982_v53, 3  ;;  %v5028_v53 = vld [vmem:[%s6906_s9 + $0x160] sm:$0xff] }
 0x519   : > { %v2360_v57 = vpop.f32.mrf.mxu0 }
 0x51a   : > { %vm2101_vm14 = vcmp.gt.f32.partialorder %v2085_v28, 0.0  ;;  %v2117_v45 = vmul.f32 0.01, %v2085_v28 }
 0x51b   : > { %v2049_v58 = vpop.f32.mrf.mxu3 }
 0x51c   : > { %v2050_v47 = vadd.f32 %v2049_v58, %v5985_v37  ;;  %v6088_v5 = vsel %vm2101_vm14, %v2085_v28, %v2117_v45  ;;  %v5013_v28 = vld [vmem:[%s6905_s8 + $0xa8] sm:$0xff] }
 0x51d   : > { %v2149_v7 = vpack.c.bf16 %v6088_v5, %v6088_v5  ;;  %v5029_v45 = vld [vmem:[%s6906_s9 + $0x168] sm:$0xff] }
 0x51e   : > { %v2069_v56 = vmul.f32 %v5988_v60, %v2050_v47 }
 0x51f   : > { %v2181_v14 = vunpack.c.l.b16 %v2149_v7  ;;  %v5012_v7 = vld [vmem:[%s6905_s8 + $0xa0] sm:$0xff] }
 0x520   : > { %v2086_v33 = vadd.f32 %v5992_v11, %v2069_v56 }
 0x521   : > { %v2190_v4 = vpack.c.b16 %v2181_v14, %v2180_v19  ;;  %v2362_v47 = vpop.f32.mrf.mxu0  ;;  %v5011_v14 = vld [vmem:[%s6905_s8 + $0x98] sm:$0xff] }
 0x522   : > { %v2118_v36 = vmul.f32 0.01, %v2086_v33  ;;  %vm2102_vm15 = vcmp.gt.f32.partialorder %v2086_v33, 0.0 }
 0x523   : > { %v2051_v41 = vpop.f32.mrf.mxu3  ;;  %2335 = vmatmul.bf16.gmra.mxu1 %v2190_v4 }
 0x524   : > { %v2052_v27 = vadd.f32 %v2051_v41, %v5985_v37  ;;  %v6097_v42 = vsel %vm2102_vm15, %v2086_v33, %v2118_v36  ;;  %v5027_v33 = vld [vmem:[%s6906_s9 + $0x158] sm:$0xff]  ;;  %v5026_v36 = vld [vmem:[%s6906_s9 + $0x150] sm:$0xff] }
 0x525   : > { %v2150_v59 = vpack.c.bf16 %v6097_v42, %v6097_v42 }
 0x526   : > { %v2070_v16 = vmul.f32 %v5988_v60, %v2052_v27  ;;  %v5015_v60 = vld [vmem:[%s6905_s8 + $0xb8] sm:$0xff] }
 0x527   : > { %v2182_v25 = vunpack.c.l.b16 %v2150_v59  ;;  %2944 = vmatpush.bf16.msra.mxu2 %v5015_v60  ;;  %v5024_v60 = vld [vmem:[%s6906_s9 + $0x140] sm:$0xff] }
 0x528   : > { %v2087_v20 = vadd.f32 %v5992_v11, %v2070_v16  ;;  %v5031_v11 = vld [vmem:[%s6906_s9 + $0x178] sm:$0xff] }
 0x529   : > { %3391 = vmatpush.bf16.msrb.mxu0 %v5031_v11  ;;  %v2365_v16 = vpop.f32.mrf.mxu0 }
 0x52a   : > { %vm2103_vm0 = vcmp.gt.f32.partialorder %v2087_v20, 0.0  ;;  %v2119_v34 = vmul.f32 0.01, %v2087_v20 }
 0x52b   : > { %2945 = vmatpush.bf16.msra.mxu2 %v5014_v15 }
 0x52c   : > { %v6101_v62 = vsel %vm2103_vm0, %v2087_v20, %v2119_v34 }
 0x52d   : > { %v2151_v46 = vpack.c.bf16 %v6101_v62, %v6101_v62  ;;  %3392 = vmatpush.bf16.msrb.mxu0 %v5030_v54 }
 0x52f   : > { %v2183_v37 = vunpack.c.l.b16 %v2151_v46  ;;  %2946 = vmatpush.bf16.msra.mxu2 %v5013_v28  ;;  %v5009_v46 = vld [vmem:[%s6905_s8 + $0x88] sm:$0xff] }
 0x531   : > { %v2191_v39 = vpack.c.b16 %v2183_v37, %v2182_v25  ;;  %3393 = vmatpush.bf16.msrb.mxu0 %v5029_v45  ;;  %v5025_v25 = vld [vmem:[%s6906_s9 + $0x148] sm:$0xff]  ;;  %v2367_v45 = vpop.f32.mrf.mxu0 }
 0x533   : > { %2340 = vmatmul.bf16.gmra.mxu1 %v2191_v39  ;;  %2947 = vmatpush.bf16.msra.mxu2 %v5012_v7  ;;  %v5008_v39 = vld [vmem:[%s6905_s8 + $0x80] sm:$0xff] }
 0x535   : > { %3394 = vmatpush.bf16.msrb.mxu0 %v5028_v53 }
 0x537   : > { %2948 = vmatpush.bf16.msra.mxu2 %v5011_v14 }
 0x539   : > { %3395 = vmatpush.bf16.msrb.mxu0 %v5027_v33 }
 0x53d   : > { %3396 = vmatpush.bf16.msrb.mxu0 %v5026_v36 }
 0x540   : > { %v2306_v58 = vpop.f32.mrf.mxu1 }
 0x541   : > { %v2307_v49 = vadd.f32 %v2306_v58, %v6118_v8  ;;  %3397 = vmatpush.bf16.msrb.mxu0 %v5025_v25  ;;  %v6160_v25 = vpop.f32.mrf.mxu0 }
 0x543   : > { %v2356_v56 = vadd.f32 %v2355_v2, %v2307_v49  ;;  %v5010_v2 = vld [vmem:[%s6905_s8 + $0x90] sm:$0xff] }
 0x544   : > { %2949 = vmatpush.bf16.msra.mxu2 %v5010_v2 }
 0x545   : > { %v4593_v19 = vmul.f32 -1.442695, %v2356_v56  ;;  %3398 = vmatpush.bf16.msrb.mxu0 %v5024_v60 }
 0x547   : > { %5131 = vpow2.f32 %v4593_v19 }
 0x548   : > { %v2308_v4 = vpop.f32.mrf.mxu1  ;;  %2950 = vmatpush.bf16.msra.mxu2 %v5009_v46 }
 0x549   : > { %v2309_v41 = vadd.f32 %v2308_v4, %v6118_v8 }
 0x54b   : > { %v2358_v27 = vadd.f32 %v2357_v21, %v2309_v41 }
 0x54c   : > { %2951 = vmatpush.bf16.msra.mxu2 %v5008_v39 }
 0x54d   : > { %v5132_v20 = vpop.eup %5131  ;;  %v4594_v34 = vmul.f32 -1.442695, %v2358_v27 }
 0x54e   : > { %v2443_v59 = vadd.f32 1.0, %v5132_v20 }
 0x54f   : > { %5133 = vpow2.f32 %v4594_v34 }
 0x550   : > { %5135 = vrcp.f32 %v2443_v59  ;;  %v2311_v37 = vpop.f32.mrf.mxu1  ;;  %v2470_v19 = vand.u32 2147483648, %v2443_v59  ;;  %v2468_v33 = vand.u32 2147483647, %v2443_v59  ;;  %vm2464_vm2 = vweird.f32 %v2443_v59 }
 0x551   : > { %v2312_v21 = vadd.f32 %v2311_v37, %v6118_v8 }
 0x552   : > { %v2471_v27 = vor.u32 1.1754944e-38, %v2470_v19  ;;  %vm2469_vm4 = vcmp.eq.f32.partialorder %v2468_v33, 8.507059e+37 }
 0x553   : > { %v2361_v11 = vadd.f32 %v2360_v57, %v2312_v21 }
 0x555   : > { %v5134_v15 = vpop.eup %5133  ;;  %v4595_v54 = vmul.f32 -1.442695, %v2361_v11 }
 0x556   : > { %v5136_v28 = vpop.eup %5135  ;;  %v2444_v58 = vadd.f32 1.0, %v5134_v15 }
 0x557   : > { %v2460_v49 = vmul.f32 %v5136_v28, %v2443_v59  ;;  %5137 = vpow2.f32 %v4595_v54  ;;  %vm2465_vm1 = vweird.f32 %v5136_v28 }
 0x558   : > { %5139 = vrcp.f32 %v2444_v58  ;;  %v2313_v7 = vpop.f32.mrf.mxu1  ;;  %vm2466_vm3 = vmor %vm2464_vm2, %vm2465_vm1  ;;  %v2483_v11 = vand.u32 2147483647, %v2444_v58  ;;  %v2485_v59 = vand.u32 2147483648, %v2444_v58  ;;  %vm2479_vm6 = vweird.f32 %v2444_v58 }
 0x559   : > { %v2461_v53 = vsub.f32 1.0, %v2460_v49  ;;  %v2314_v56 = vadd.f32 %v2313_v7, %v6118_v8 }
 0x55a   : > { %vm2484_vm8 = vcmp.eq.f32.partialorder %v2483_v11, 8.507059e+37  ;;  %v2486_v19 = vor.u32 1.1754944e-38, %v2485_v59 }
 0x55b   : > { %v2462_v14 = vmul.f32 %v5136_v28, %v2461_v53  ;;  %v2363_v4 = vadd.f32 %v2362_v47, %v2314_v56 }
 0x55d   : > { %v5138_v57 = vpop.eup %5137  ;;  %v2463_v41 = vadd.f32 %v5136_v28, %v2462_v14  ;;  %v4596_v2 = vmul.f32 -1.442695, %v2363_v4 }
 0x55e   : > { %v5140_v36 = vpop.eup %5139  ;;  %v2445_v20 = vadd.f32 1.0, %v5138_v57 }
 0x55f   : > { %v2467_v34 = vsel %vm2466_vm3, %v5136_v28, %v2463_v41  ;;  %v2475_v46 = vmul.f32 %v5140_v36, %v2444_v58  ;;  %5141 = vpow2.f32 %v4596_v2  ;;  %vm2480_vm5 = vweird.f32 %v5140_v36 }
 0x560   : > { %5143 = vrcp.f32 %v2445_v20  ;;  %v2316_v37 = vpop.f32.mrf.mxu1  ;;  %v2472_v21 = vsel %vm2469_vm4, %v2471_v27, %v2467_v34  ;;  %vm2481_vm7 = vmor %vm2479_vm6, %vm2480_vm5  ;;  %vm2494_vm10 = vweird.f32 %v2445_v20 }
 0x561   : > { %v2476_v39 = vsub.f32 1.0, %v2475_v46  ;;  %v2317_v47 = vadd.f32 %v2316_v37, %v6118_v8  ;;  %v2715_v60 = vsub.f32 1.0, %v2472_v21  ;;  %v2699_v57 = vmul.f32 %v2472_v21, %v5998_v51 }
 0x562   : > { %v2498_v46 = vand.u32 2147483647, %v2445_v20  ;;  %v2500_v37 = vand.u32 2147483648, %v2445_v20 }
 0x563   : > { %v2477_v15 = vmul.f32 %v5140_v36, %v2476_v39  ;;  %v2366_v54 = vadd.f32 %v2365_v16, %v2317_v47  ;;  %v2731_v53 = vmul.f32 %v2715_v60, %v5766_v29  ;;  %v6168_v29 = vpop.f32.mrf.mxu0 }
 0x564   : > { %vm2499_vm12 = vcmp.eq.f32.partialorder %v2498_v46, 8.507059e+37 }
 0x565   : > { %v5142_v49 = vpop.eup %5141  ;;  %v2478_v7 = vadd.f32 %v5140_v36, %v2477_v15  ;;  %v4597_v28 = vmul.f32 -1.442695, %v2366_v54  ;;  %v6166_v34 = vadd.f32 %v2731_v53, %v2699_v57 }
 0x566   : > { %v5144_v56 = vpop.eup %5143  ;;  %v2446_v14 = vadd.f32 1.0, %v5142_v49 }
 0x567   : > { %v2490_v33 = vmul.f32 %v5144_v56, %v2445_v20  ;;  %5145 = vpow2.f32 %v4597_v28  ;;  %v2482_v4 = vsel %vm2481_vm7, %v5140_v36, %v2478_v7  ;;  %vm2495_vm9 = vweird.f32 %v5144_v56 }
 0x568   : > { %5147 = vrcp.f32 %v2446_v14  ;;  %v2318_v41 = vpop.f32.mrf.mxu1  ;;  %v2487_v2 = vsel %vm2484_vm8, %v2486_v19, %v2482_v4  ;;  %v2832_v59 = vpack.c.bf16 %v6166_v34, %v6166_v34  ;;  %vm2496_vm11 = vmor %vm2494_vm10, %vm2495_vm9  ;;  %v2513_v57 = vand.u32 2147483647, %v2446_v14 }
 0x569   : > { %v2491_v16 = vsub.f32 1.0, %v2490_v33  ;;  %v2319_v27 = vadd.f32 %v2318_v41, %v6118_v8  ;;  %v2716_v58 = vsub.f32 1.0, %v2487_v2  ;;  %v2700_v47 = vmul.f32 %v2487_v2, %v6003_v50 }
 0x56a   : > { %v2864_v33 = vunpack.c.l.b16 %v2832_v59  ;;  %v2515_v41 = vand.u32 2147483648, %v2446_v14  ;;  %vm2509_vm14 = vweird.f32 %v2446_v14  ;;  %vm2514_vm0 = vcmp.eq.f32.partialorder %v2513_v57, 8.507059e+37 }
 0x56b   : > { %v2368_v39 = vadd.f32 %v2367_v45, %v2319_v27  ;;  %v2732_v36 = vmul.f32 %v2716_v58, %v5772_v48  ;;  %v2492_v51 = vmul.f32 %v5144_v56, %v2491_v16  ;;  %v2501_v45 = vor.u32 1.1754944e-38, %v2500_v37  ;;  %v2375_v46 = vpop.f32.mrf.mxu0 }
 0x56d   : > { %v5146_v21 = vpop.eup %5145  ;;  %v4598_v60 = vmul.f32 -1.442695, %v2368_v39  ;;  %v6172_v11 = vadd.f32 %v2732_v36, %v2700_v47  ;;  %v2493_v15 = vadd.f32 %v5144_v56, %v2492_v51 }
 0x56e   : > { %v5148_v54 = vpop.eup %5147  ;;  %v6176_v49 = vadd.f32 1.0, %v5146_v21  ;;  %v2516_v21 = vor.u32 1.1754944e-38, %v2515_v41 }
 0x56f   : > { %v2505_v50 = vmul.f32 %v5148_v54, %v2446_v14  ;;  %5149 = vpow2.f32 %v4598_v60  ;;  %v2833_v48 = vpack.c.bf16 %v6172_v11, %v6172_v11  ;;  %v2497_v20 = vsel %vm2496_vm11, %v5144_v56, %v2493_v15 }
 0x570   : > { %5151 = vrcp.f32 %v6176_v49  ;;  %v2321_v7 = vpop.f32.mrf.mxu1  ;;  %v2502_v28 = vsel %vm2499_vm12, %v2501_v45, %v2497_v20  ;;  %vm2510_vm13 = vweird.f32 %v5148_v54  ;;  %v2528_v20 = vand.u32 2147483647, %v6176_v49 }
 0x571   : > { %v2506_v53 = vsub.f32 1.0, %v2505_v50  ;;  %v2322_v19 = vadd.f32 %v2321_v7, %v6118_v8  ;;  %v2865_v4 = vunpack.c.l.b16 %v2833_v48  ;;  %v2717_v2 = vsub.f32 1.0, %v2502_v28  ;;  %vm2511_vm15 = vmor %vm2509_vm14, %vm2510_vm13 }
 0x572   : > { %v2701_v59 = vmul.f32 %v2502_v28, %v6013_v1  ;;  %v2530_v7 = vand.u32 2147483648, %v6176_v49  ;;  %vm2524_vm2 = vweird.f32 %v6176_v49  ;;  %vm2529_vm4 = vcmp.eq.f32.partialorder %v2528_v20, 8.507059e+37 }
 0x573   : > { %v2371_v16 = vadd.f32 %v6160_v25, %v2322_v19  ;;  %v2880_v27 = vpack.c.b16 %v2865_v4, %v2864_v33  ;;  %v2507_v58 = vmul.f32 %v5148_v54, %v2506_v53  ;;  %v2733_v47 = vmul.f32 %v2717_v2, %v5795_v32 }
 0x575   : > { %v5150_v37 = vpop.eup %5149  ;;  %v4599_v56 = vmul.f32 -1.442695, %v2371_v16  ;;  %2952 = vmatmul.bf16.vlgmr.msra.gmra.mxu2 %v2880_v27  ;;  %3399 = vmatmul.bf16.vlgmr.msrb.gmra.mxu0 %v2880_v27  ;;  %v2508_v39 = vadd.f32 %v5148_v54, %v2507_v58  ;;  %v6191_v48 = vadd.f32 %v2733_v47, %v2701_v59  ;;  %v2377_v16 = vpop.f32.mrf.mxu0 }
 0x576   : > { %v5152_v36 = vpop.eup %5151  ;;  %v6185_v51 = vadd.f32 1.0, %v5150_v37 }
 0x577   : > { %v2520_v25 = vmul.f32 %v5152_v36, %v6176_v49  ;;  %5153 = vpow2.f32 %v4599_v56  ;;  %v2512_v60 = vsel %vm2511_vm15, %v5148_v54, %v2508_v39  ;;  %vm2525_vm1 = vweird.f32 %v5152_v36 }
 0x578   : > { %5155 = vrcp.f32 %v6185_v51  ;;  %v2323_v15 = vpop.f32.mrf.mxu1  ;;  %v2517_v45 = vsel %vm2514_vm0, %v2516_v21, %v2512_v60  ;;  %v2834_v57 = vpack.c.bf16 %v6191_v48, %v6191_v48  ;;  %vm2526_vm3 = vmor %vm2524_vm2, %vm2525_vm1  ;;  %v2545_v60 = vand.u32 2147483648, %v6185_v51 }
 0x579   : > { %v2521_v50 = vsub.f32 1.0, %v2520_v25  ;;  %v2324_v14 = vadd.f32 %v2323_v15, %v6118_v8  ;;  %v2718_v32 = vsub.f32 1.0, %v2517_v45  ;;  %v2702_v54 = vmul.f32 %v2517_v45, %v6018_v6 }
 0x57a   : > { %v2531_v6 = vor.u32 1.1754944e-38, %v2530_v7  ;;  %v2866_v47 = vunpack.c.l.b16 %v2834_v57  ;;  %v2543_v25 = vand.u32 2147483647, %v6185_v51  ;;  %vm2539_vm6 = vweird.f32 %v6185_v51 }
 0x57b   : > { %v2373_v53 = vadd.f32 %v6168_v29, %v2324_v14  ;;  %v2734_v1 = vmul.f32 %v2718_v32, %v5803_v55  ;;  %v2522_v28 = vmul.f32 %v5152_v36, %v2521_v50 }
 0x57c   : > { %vm2544_vm8 = vcmp.eq.f32.partialorder %v2543_v25, 8.507059e+37 }
 0x57d   : > { %v5154_v19 = vpop.eup %5153  ;;  %v4600_v33 = vmul.f32 -1.442695, %v2373_v53  ;;  %v6199_v4 = vadd.f32 %v2734_v1, %v2702_v54  ;;  %v2523_v41 = vadd.f32 %v5152_v36, %v2522_v28  ;;  %v2546_v54 = vor.u32 1.1754944e-38, %v2545_v60 }
 0x57e   : > { %v5156_v2 = vpop.eup %5155  ;;  %v6203_v27 = vadd.f32 1.0, %v5154_v19  ;;  %v2380_v19 = vpop.f32.mrf.mxu0 }
 0x57f   : > { %v2535_v55 = vmul.f32 %v5156_v2, %v6185_v51  ;;  %5157 = vpow2.f32 %v4600_v33  ;;  %v2835_v29 = vpack.c.bf16 %v6199_v4, %v6199_v4  ;;  %v2527_v49 = vsel %vm2526_vm3, %v5152_v36, %v2523_v41 }
 0x580   : > { %5159 = vrcp.f32 %v6203_v27  ;;  %v2326_v58 = vpop.f32.mrf.mxu1  ;;  %v2532_v37 = vsel %vm2529_vm4, %v2531_v6, %v2527_v49  ;;  %vm2540_vm5 = vweird.f32 %v5156_v2  ;;  %vm2554_vm10 = vweird.f32 %v6203_v27 }
 0x581   : > { %v2536_v56 = vsub.f32 1.0, %v2535_v55  ;;  %v2327_v39 = vadd.f32 %v2326_v58, %v6118_v8  ;;  %v2867_v21 = vunpack.c.l.b16 %v2835_v29  ;;  %v2719_v59 = vsub.f32 1.0, %v2532_v37  ;;  %vm2541_vm7 = vmor %vm2539_vm6, %vm2540_vm5 }
 0x582   : > { %v2703_v28 = vmul.f32 %v2532_v37, %v6027_v31  ;;  %v2558_v55 = vand.u32 2147483647, %v6203_v27  ;;  %v2560_v29 = vand.u32 2147483648, %v6203_v27 }
 0x583   : > { %v2376_v15 = vadd.f32 %v2375_v46, %v2327_v39  ;;  %v2881_v45 = vpack.c.b16 %v2867_v21, %v2866_v47  ;;  %v2537_v50 = vmul.f32 %v5156_v2, %v2536_v56  ;;  %v2735_v20 = vmul.f32 %v2719_v59, %v5825_v22 }
 0x584   : > { %vm2559_vm12 = vcmp.eq.f32.partialorder %v2558_v55, 8.507059e+37 }
 0x585   : > { %v5158_v14 = vpop.eup %5157  ;;  %v4601_v36 = vmul.f32 -1.442695, %v2376_v15  ;;  %2957 = vmatmul.bf16.gmra.mxu2 %v2881_v45  ;;  %3404 = vmatmul.bf16.gmra.mxu0 %v2881_v45  ;;  %v2538_v32 = vadd.f32 %v5156_v2, %v2537_v50  ;;  %v6221_v6 = vadd.f32 %v2735_v20, %v2703_v28 }
 0x586   : > { %v5160_v7 = vpop.eup %5159  ;;  %v6215_v53 = vadd.f32 1.0, %v5158_v14 }
 0x587   : > { %v2550_v46 = vmul.f32 %v5160_v7, %v6203_v27  ;;  %5161 = vpow2.f32 %v4601_v36  ;;  %v2542_v1 = vsel %vm2541_vm7, %v5156_v2, %v2538_v32  ;;  %vm2555_vm9 = vweird.f32 %v5160_v7  ;;  %v2382_v32 = vpop.f32.mrf.mxu0 }
 0x588   : > { %5163 = vrcp.f32 %v6215_v53  ;;  %v2328_v33 = vpop.f32.mrf.mxu1  ;;  %v2547_v57 = vsel %vm2544_vm8, %v2546_v54, %v2542_v1  ;;  %v2836_v47 = vpack.c.bf16 %v6221_v6, %v6221_v6  ;;  %vm2556_vm11 = vmor %vm2554_vm10, %vm2555_vm9  ;;  %v2573_v20 = vand.u32 2147483647, %v6215_v53 }
 0x589   : > { %v2551_v51 = vsub.f32 1.0, %v2550_v46  ;;  %v2329_v22 = vadd.f32 %v2328_v33, %v6118_v8  ;;  %v2720_v41 = vsub.f32 1.0, %v2547_v57  ;;  %v2704_v2 = vmul.f32 %v2547_v57, %v6032_v61 }
 0x58a   : > { %v2561_v61 = vor.u32 1.1754944e-38, %v2560_v29  ;;  %v2868_v14 = vunpack.c.l.b16 %v2836_v47  ;;  %v2575_v54 = vand.u32 2147483648, %v6215_v53  ;;  %vm2569_vm14 = vweird.f32 %v6215_v53 }
 0x58b   : > { %v2378_v49 = vadd.f32 %v2377_v16, %v2329_v22  ;;  %v2736_v31 = vmul.f32 %v2720_v41, %v5832_v17  ;;  %v2552_v58 = vmul.f32 %v5160_v7, %v2551_v51  ;;  %vm2574_vm0 = vcmp.eq.f32.partialorder %v2573_v20, 8.507059e+37 }
 0x58c   : > { %v2576_v29 = vor.u32 1.1754944e-38, %v2575_v54 }
 0x58d   : > { %v5162_v37 = vpop.eup %5161  ;;  %v4602_v56 = vmul.f32 -1.442695, %v2378_v49  ;;  %v6228_v39 = vadd.f32 %v2736_v31, %v2704_v2  ;;  %v2553_v21 = vadd.f32 %v5160_v7, %v2552_v58 }
 0x58e   : > { %v5164_v25 = vpop.eup %5163  ;;  %v6232_v60 = vadd.f32 1.0, %v5162_v37 }
 0x58f   : > { %v2565_v17 = vmul.f32 %v5164_v25, %v6215_v53  ;;  %5165 = vpow2.f32 %v4602_v56  ;;  %v2837_v16 = vpack.c.bf16 %v6228_v39, %v6228_v39  ;;  %v2557_v27 = vsel %vm2556_vm11, %v5160_v7, %v2553_v21 }
 0x590   : > { %5167 = vrcp.f32 %v6232_v60  ;;  %v2331_v59 = vpop.f32.mrf.mxu1  ;;  %v2562_v15 = vsel %vm2559_vm12, %v2561_v61, %v2557_v27  ;;  %vm2570_vm13 = vweird.f32 %v5164_v25  ;;  %v2588_v47 = vand.u32 2147483647, %v6232_v60 }
 0x591   : > { %v2566_v45 = vsub.f32 1.0, %v2565_v17  ;;  %v2332_v50 = vadd.f32 %v2331_v59, %v6118_v8  ;;  %v2869_v36 = vunpack.c.l.b16 %v2837_v16  ;;  %v2721_v46 = vsub.f32 1.0, %v2562_v15  ;;  %vm2571_vm15 = vmor %vm2569_vm14, %vm2570_vm13  ;;  %v2385_v16 = vpop.f32.mrf.mxu0 }
 0x592   : > { %v2705_v2 = vmul.f32 %v2562_v15, %v6041_v26  ;;  %v2590_v21 = vand.u32 2147483648, %v6232_v60  ;;  %vm2584_vm2 = vweird.f32 %v6232_v60  ;;  %vm2589_vm4 = vcmp.eq.f32.partialorder %v2588_v47, 8.507059e+37 }
 0x593   : > { %v2381_v1 = vadd.f32 %v2380_v19, %v2332_v50  ;;  %v2882_v28 = vpack.c.b16 %v2869_v36, %v2868_v14  ;;  %v2567_v33 = vmul.f32 %v5164_v25, %v2566_v45  ;;  %v2737_v22 = vmul.f32 %v2721_v46, %v5854_v43 }
 0x595   : > { %v5166_v7 = vpop.eup %5165  ;;  %v4603_v57 = vmul.f32 -1.442695, %v2381_v1  ;;  %2962 = vmatmul.bf16.gmra.mxu2 %v2882_v28  ;;  %3409 = vmatmul.bf16.gmra.mxu0 %v2882_v28  ;;  %v2568_v51 = vadd.f32 %v5164_v25, %v2567_v33  ;;  %v6250_v56 = vadd.f32 %v2737_v22, %v2705_v2 }
 0x596   : > { %v5168_v41 = vpop.eup %5167  ;;  %v6244_v55 = vadd.f32 1.0, %v5166_v7 }
 0x597   : > { %v2580_v19 = vmul.f32 %v5168_v41, %v6232_v60  ;;  %5169 = vpow2.f32 %v4603_v57  ;;  %v2572_v49 = vsel %vm2571_vm15, %v5164_v25, %v2568_v51  ;;  %vm2585_vm1 = vweird.f32 %v5168_v41 }
 0x598   : > { %5171 = vrcp.f32 %v6244_v55  ;;  %v2333_v31 = vpop.f32.mrf.mxu1  ;;  %v2577_v58 = vsel %vm2574_vm0, %v2576_v29, %v2572_v49  ;;  %v2838_v45 = vpack.c.bf16 %v6250_v56, %v6250_v56  ;;  %vm2586_vm3 = vmor %vm2584_vm2, %vm2585_vm1  ;;  %v2603_v7 = vand.u32 2147483647, %v6244_v55 }
 0x599   : > { %v2581_v37 = vsub.f32 1.0, %v2580_v19  ;;  %v2334_v53 = vadd.f32 %v2333_v31, %v6118_v8  ;;  %v2722_v43 = vsub.f32 1.0, %v2577_v58  ;;  %v2706_v25 = vmul.f32 %v2577_v58, %v6046_v38 }
 0x59a   : > { %v2591_v38 = vor.u32 1.1754944e-38, %v2590_v21  ;;  %v2870_v28 = vunpack.c.l.b16 %v2838_v45  ;;  %v2605_v57 = vand.u32 2147483648, %v6244_v55  ;;  %vm2599_vm6 = vweird.f32 %v6244_v55 }
 0x59b   : > { %v2383_v61 = vadd.f32 %v2382_v32, %v2334_v53  ;;  %v2738_v26 = vmul.f32 %v2722_v43, %v5861_v18  ;;  %v2582_v17 = vmul.f32 %v5168_v41, %v2581_v37  ;;  %v2387_v37 = vpop.f32.mrf.mxu0  ;;  %vm2604_vm8 = vcmp.eq.f32.partialorder %v2603_v7, 8.507059e+37 }
 0x59c   : > { %v2606_v43 = vor.u32 1.1754944e-38, %v2605_v57 }
 0x59d   : > { %v5170_v27 = vpop.eup %5169  ;;  %v4604_v59 = vmul.f32 -1.442695, %v2383_v61  ;;  %v6257_v15 = vadd.f32 %v2738_v26, %v2706_v25  ;;  %v2583_v50 = vadd.f32 %v5168_v41, %v2582_v17 }
 0x59e   : > { %v5172_v14 = vpop.eup %5171  ;;  %v6261_v36 = vadd.f32 1.0, %v5170_v27 }
 0x59f   : > { %v2595_v18 = vmul.f32 %v5172_v14, %v6244_v55  ;;  %5173 = vpow2.f32 %v4604_v59  ;;  %v2839_v60 = vpack.c.bf16 %v6257_v15, %v6257_v15  ;;  %v2587_v32 = vsel %vm2586_vm3, %v5168_v41, %v2583_v50 }
 0x5a0   : > { %5175 = vrcp.f32 %v6261_v36  ;;  %v2336_v20 = vpop.f32.mrf.mxu1  ;;  %v2592_v54 = vsel %vm2589_vm4, %v2591_v38, %v2587_v32  ;;  %vm2600_vm5 = vweird.f32 %v5172_v14  ;;  %v2618_v27 = vand.u32 2147483647, %v6261_v36 }
 0x5a1   : > { %v2596_v46 = vsub.f32 1.0, %v2595_v18  ;;  %v2337_v1 = vadd.f32 %v2336_v20, %v6118_v8  ;;  %v2871_v33 = vunpack.c.l.b16 %v2839_v60  ;;  %v2723_v51 = vsub.f32 1.0, %v2592_v54  ;;  %vm2601_vm7 = vmor %vm2599_vm6, %vm2600_vm5 }
 0x5a2   : > { %v2707_v61 = vmul.f32 %v2592_v54, %v6055_v52  ;;  %v2620_v59 = vand.u32 2147483648, %v6261_v36  ;;  %vm2614_vm10 = vweird.f32 %v6261_v36  ;;  %vm2619_vm12 = vcmp.eq.f32.partialorder %v2618_v27, 8.507059e+37 }
 0x5a3   : > { %v2386_v22 = vadd.f32 %v2385_v16, %v2337_v1  ;;  %v2883_v29 = vpack.c.b16 %v2871_v33, %v2870_v28  ;;  %v2597_v19 = vmul.f32 %v5172_v14, %v2596_v46  ;;  %v2739_v31 = vmul.f32 %v2723_v51, %v5883_v23  ;;  %v2390_v28 = vpop.f32.mrf.mxu0 }
 0x5a5   : > { %v5174_v49 = vpop.eup %5173  ;;  %v4605_v41 = vmul.f32 -1.442695, %v2386_v22  ;;  %2967 = vmatmul.bf16.gmra.mxu2 %v2883_v29  ;;  %3414 = vmatmul.bf16.gmra.mxu0 %v2883_v29  ;;  %v2598_v2 = vadd.f32 %v5172_v14, %v2597_v19  ;;  %v6279_v16 = vadd.f32 %v2739_v31, %v2707_v61 }
 0x5a6   : > { %v5176_v58 = vpop.eup %5175  ;;  %v6273_v53 = vadd.f32 1.0, %v5174_v49 }
 0x5a7   : > { %v2610_v47 = vmul.f32 %v5176_v58, %v6261_v36  ;;  %5177 = vpow2.f32 %v4605_v41  ;;  %v2602_v21 = vsel %vm2601_vm7, %v5172_v14, %v2598_v2  ;;  %vm2615_vm9 = vweird.f32 %v5176_v58 }
 0x5a8   : > { %5179 = vrcp.f32 %v6273_v53  ;;  %v2338_v25 = vpop.f32.mrf.mxu1  ;;  %v2607_v26 = vsel %vm2604_vm8, %v2606_v43, %v2602_v21  ;;  %v2840_v32 = vpack.c.bf16 %v6279_v16, %v6279_v16  ;;  %vm2616_vm11 = vmor %vm2614_vm10, %vm2615_vm9  ;;  %v2633_v19 = vand.u32 2147483647, %v6273_v53 }
 0x5a9   : > { %v2611_v55 = vsub.f32 1.0, %v2610_v47  ;;  %v2339_v23 = vadd.f32 %v2338_v25, %v6118_v8  ;;  %v2724_v17 = vsub.f32 1.0, %v2607_v26  ;;  %v2708_v50 = vmul.f32 %v2607_v26, %v6060_v40 }
 0x5aa   : > { %v2621_v40 = vor.u32 1.1754944e-38, %v2620_v59  ;;  %v2872_v22 = vunpack.c.l.b16 %v2840_v32  ;;  %v2635_v49 = vand.u32 2147483648, %v6273_v53  ;;  %vm2629_vm14 = vweird.f32 %v6273_v53 }
 0x5ab   : > { %v2388_v45 = vadd.f32 %v2387_v37, %v2339_v23  ;;  %v2740_v52 = vmul.f32 %v2724_v17, %v5890_v44  ;;  %v2612_v14 = vmul.f32 %v5176_v58, %v2611_v55  ;;  %vm2634_vm0 = vcmp.eq.f32.partialorder %v2633_v19, 8.507059e+37 }
 0x5ac   : > { %v2636_v26 = vor.u32 1.1754944e-38, %v2635_v49 }
 0x5ad   : > { %v5178_v38 = vpop.eup %5177  ;;  %v4606_v18 = vmul.f32 -1.442695, %v2388_v45  ;;  %v6286_v60 = vadd.f32 %v2740_v52, %v2708_v50  ;;  %v2613_v20 = vadd.f32 %v5176_v58, %v2612_v14 }
 0x5ae   : > { %v5180_v54 = vpop.eup %5179  ;;  %v6290_v46 = vadd.f32 1.0, %v5178_v38 }
 0x5af   : > { %v2625_v44 = vmul.f32 %v5180_v54, %v6273_v53  ;;  %5181 = vpow2.f32 %v4606_v18  ;;  %v2841_v36 = vpack.c.bf16 %v6286_v60, %v6286_v60  ;;  %v2617_v1 = vsel %vm2616_vm11, %v5176_v58, %v2613_v20 }
 0x5b0   : > { %5183 = vrcp.f32 %v6290_v46  ;;  %v2341_v33 = vpop.f32.mrf.mxu1  ;;  %v2622_v7 = vsel %vm2619_vm12, %v2621_v40, %v2617_v1  ;;  %vm2630_vm13 = vweird.f32 %v5180_v54  ;;  %v2648_v14 = vand.u32 2147483647, %v6290_v46 }
 0x5b1   : > { %v2626_v57 = vsub.f32 1.0, %v2625_v44  ;;  %v2342_v51 = vadd.f32 %v2341_v33, %v6118_v8  ;;  %v2873_v29 = vunpack.c.l.b16 %v2841_v36  ;;  %v2725_v41 = vsub.f32 1.0, %v2622_v7  ;;  %vm2631_vm15 = vmor %vm2629_vm14, %vm2630_vm13 }
 0x5b2   : > { %v2709_v17 = vmul.f32 %v2622_v7, %v6069_v63  ;;  %v2650_v38 = vand.u32 2147483648, %v6290_v46  ;;  %vm2644_vm2 = vweird.f32 %v6290_v46  ;;  %vm2649_vm4 = vcmp.eq.f32.partialorder %v2648_v14, 8.507059e+37 }
 0x5b3   : > { %v2391_v2 = vadd.f32 %v2390_v28, %v2342_v51  ;;  %v2884_v31 = vpack.c.b16 %v2873_v29, %v2872_v22  ;;  %v2627_v37 = vmul.f32 %v5180_v54, %v2626_v57  ;;  %v2741_v21 = vmul.f32 %v2725_v41, %v5909_v30  ;;  %v2392_v30 = vpop.f32.mrf.mxu0 }
 0x5b4   : > { %v2651_v33 = vor.u32 1.1754944e-38, %v2650_v38 }
 0x5b5   : > { %v5182_v58 = vpop.eup %5181  ;;  %v4607_v43 = vmul.f32 -1.442695, %v2391_v2  ;;  %2972 = vmatmul.bf16.gmra.mxu2 %v2884_v31  ;;  %3419 = vmatmul.bf16.gmra.mxu0 %v2884_v31  ;;  %v2628_v47 = vadd.f32 %v5180_v54, %v2627_v37  ;;  %v6305_v52 = vadd.f32 %v2741_v21, %v2709_v17 }
 0x5b6   : > { %v5184_v61 = vpop.eup %5183  ;;  %v2456_v25 = vadd.f32 1.0, %v5182_v58 }
 0x5b7   : > { %v2640_v55 = vmul.f32 %v5184_v61, %v6290_v46  ;;  %5185 = vpow2.f32 %v4607_v43  ;;  %v2632_v23 = vsel %vm2631_vm15, %v5180_v54, %v2628_v47  ;;  %vm2645_vm1 = vweird.f32 %v5184_v61 }
 0x5b8   : > { %5187 = vrcp.f32 %v2456_v25  ;;  %v2343_v27 = vpop.f32.mrf.mxu1  ;;  %v2637_v59 = vsel %vm2634_vm0, %v2636_v26, %v2632_v23  ;;  %v2842_v44 = vpack.c.bf16 %v6305_v52, %v6305_v52  ;;  %vm2646_vm3 = vmor %vm2644_vm2, %vm2645_vm1  ;;  %v2665_v19 = vand.u32 2147483648, %v2456_v25 }
 0x5b9   : > { %v2641_v45 = vsub.f32 1.0, %v2640_v55  ;;  %v2344_v50 = vadd.f32 %v2343_v27, %v6118_v8  ;;  %v2726_v53 = vsub.f32 1.0, %v2637_v59  ;;  %v2710_v32 = vmul.f32 %v2637_v59, %v6074_v10 }
 0x5ba   : > { %v2874_v51 = vunpack.c.l.b16 %v2842_v44  ;;  %v2663_v2 = vand.u32 2147483647, %v2456_v25  ;;  %vm2659_vm6 = vweird.f32 %v2456_v25  ;;  %v2666_v21 = vor.u32 1.1754944e-38, %v2665_v19 }
 0x5bb   : > { %v2393_v18 = vadd.f32 %v2392_v30, %v2344_v50  ;;  %v2742_v63 = vmul.f32 %v2726_v53, %v5916_v35  ;;  %v2642_v20 = vmul.f32 %v5184_v61, %v2641_v45 }
 0x5bc   : > { %vm2664_vm8 = vcmp.eq.f32.partialorder %v2663_v2, 8.507059e+37 }
 0x5bd   : > { %v5186_v54 = vpop.eup %5185  ;;  %v4608_v40 = vmul.f32 -1.442695, %v2393_v18  ;;  %v6312_v8 = vadd.f32 %v2742_v63, %v2710_v32  ;;  %v2643_v36 = vadd.f32 %v5184_v61, %v2642_v20 }
 0x5be   : > { %v5188_v1 = vpop.eup %5187  ;;  %v2457_v28 = vadd.f32 1.0, %v5186_v54 }
 0x5bf   : > { %v2655_v10 = vmul.f32 %v5188_v1, %v2456_v25  ;;  %5189 = vpow2.f32 %v4608_v40  ;;  %v2843_v35 = vpack.c.bf16 %v6312_v8, %v6312_v8  ;;  %v2647_v46 = vsel %vm2646_vm3, %v5184_v61, %v2643_v36 }
 0x5c0   : > { %5191 = vrcp.f32 %v2457_v28  ;;  %v2652_v7 = vsel %vm2649_vm4, %v2651_v33, %v2647_v46  ;;  %vm2660_vm5 = vweird.f32 %v5188_v1  ;;  %v2678_v45 = vand.u32 2147483647, %v2457_v28 }
 0x5c1   : > { %v2656_v57 = vsub.f32 1.0, %v2655_v10  ;;  %v2875_v22 = vunpack.c.l.b16 %v2843_v35  ;;  %v2727_v29 = vsub.f32 1.0, %v2652_v7  ;;  %vm2661_vm7 = vmor %vm2659_vm6, %vm2660_vm5  ;;  %v2711_v55 = vmul.f32 %v2652_v7, %v6083_v13 }
 0x5c2   : > { %v2680_v50 = vand.u32 2147483648, %v2457_v28  ;;  %vm2674_vm10 = vweird.f32 %v2457_v28  ;;  %vm2679_vm12 = vcmp.eq.f32.partialorder %v2678_v45, 8.507059e+37 }
 0x5c3   : > { %v2885_v49 = vpack.c.b16 %v2875_v22, %v2874_v51  ;;  %v2657_v41 = vmul.f32 %v5188_v1, %v2656_v57  ;;  %v2743_v58 = vmul.f32 %v2727_v29, %v5925_v24 }
 0x5c4   : > { %v2681_v18 = vor.u32 1.1754944e-38, %v2680_v50 }
 0x5c5   : > { %v5190_v31 = vpop.eup %5189  ;;  %2977 = vmatmul.bf16.gmra.mxu2 %v2885_v49  ;;  %3424 = vmatmul.bf16.gmra.mxu0 %v2885_v49  ;;  %v2658_v37 = vadd.f32 %v5188_v1, %v2657_v41  ;;  %v6321_v59 = vadd.f32 %v2743_v58, %v2711_v55 }
 0x5c6   : > { %v5192_v43 = vpop.eup %5191  ;;  %v2458_v47 = vadd.f32 1.0, %v5190_v31 }
 0x5c7   : > { %v2670_v61 = vmul.f32 %v5192_v43, %v2457_v28  ;;  %v2662_v26 = vsel %vm2661_vm7, %v5188_v1, %v2658_v37  ;;  %vm2675_vm9 = vweird.f32 %v5192_v43  ;;  %v2844_v14 = vpack.c.bf16 %v6321_v59, %v6321_v59 }
 0x5c8   : > { %5193 = vrcp.f32 %v2458_v47  ;;  %v2667_v23 = vsel %vm2664_vm8, %v2666_v21, %v2662_v26  ;;  %vm2676_vm11 = vmor %vm2674_vm10, %vm2675_vm9  ;;  %v2695_v36 = vand.u32 2147483648, %v2458_v47  ;;  %v2693_v10 = vand.u32 2147483647, %v2458_v47 }
 0x5c9   : > { %v2671_v17 = vsub.f32 1.0, %v2670_v61  ;;  %v2728_v27 = vsub.f32 1.0, %v2667_v23  ;;  %v2712_v25 = vmul.f32 %v2667_v23, %v6088_v5  ;;  %v2876_v54 = vunpack.c.l.b16 %v2844_v14 }
 0x5ca   : > { %vm2689_vm14 = vweird.f32 %v2458_v47  ;;  %v2696_v46 = vor.u32 1.1754944e-38, %v2695_v36  ;;  %vm2694_vm0 = vcmp.eq.f32.partialorder %v2693_v10, 8.507059e+37  ;;  %v5005_v36 = vld [vmem:[%s5512_s19 + $0xa8] sm:$0xff]  ;;  %v5006_v10 = vld [vmem:[%s5512_s19 + $0xb0] sm:$0xff] }
 0x5cb   : > { %v2744_v24 = vmul.f32 %v2728_v27, %v5929_v12  ;;  %v2672_v53 = vmul.f32 %v5192_v43, %v2671_v17 }
 0x5cd   : > { %v6325_v30 = vadd.f32 %v2744_v24, %v2712_v25  ;;  %v2673_v13 = vadd.f32 %v5192_v43, %v2672_v53 }
 0x5ce   : > { %v5194_v38 = vpop.eup %5193 }
 0x5cf   : > { %v2685_v32 = vmul.f32 %v5194_v38, %v2458_v47  ;;  %v2845_v63 = vpack.c.bf16 %v6325_v30, %v6325_v30  ;;  %v2677_v20 = vsel %vm2676_vm11, %v5192_v43, %v2673_v13  ;;  %vm2690_vm13 = vweird.f32 %v5194_v38 }
 0x5d0   : > { %v2682_v5 = vsel %vm2679_vm12, %v2681_v18, %v2677_v20  ;;  %vm2691_vm15 = vmor %vm2689_vm14, %vm2690_vm13 }
 0x5d1   : > { %v2686_v12 = vsub.f32 1.0, %v2685_v32  ;;  %v2877_v40 = vunpack.c.l.b16 %v2845_v63  ;;  %v2729_v44 = vsub.f32 1.0, %v2682_v5  ;;  %v2713_v57 = vmul.f32 %v2682_v5, %v6097_v42  ;;  %v5000_v5 = vld [vmem:[%s5512_s19 + $0x80] sm:$0xff] }
 0x5d3   : > { %v2886_v1 = vpack.c.b16 %v2877_v40, %v2876_v54  ;;  %v2687_v33 = vmul.f32 %v5194_v38, %v2686_v12  ;;  %v2745_v35 = vmul.f32 %v2729_v44, %v5937_v9  ;;  %v5001_v12 = vld [vmem:[%s5512_s19 + $0x88] sm:$0xff]  ;;  %v5002_v54 = vld [vmem:[%s5512_s19 + $0x90] sm:$0xff]  ;;  %v5003_v40 = vld [vmem:[%s5512_s19 + $0x98] sm:$0xff] }
 0x5d4   : > { %v5004_v44 = vld [vmem:[%s5512_s19 + $0xa0] sm:$0xff] }
 0x5d5   : > { %2982 = vmatmul.bf16.gmra.mxu2 %v2886_v1  ;;  %3429 = vmatmul.bf16.gmra.mxu0 %v2886_v1  ;;  %v2688_v28 = vadd.f32 %v5194_v38, %v2687_v33  ;;  %v6333_v29 = vadd.f32 %v2745_v35, %v2713_v57  ;;  %v5023_v1 = vld [vmem:[%s6906_s9 + $0x138] sm:$0xff]  ;;  %v5022_v33 = vld [vmem:[%s6906_s9 + $0x130] sm:$0xff]  ;;  %v5020_v35 = vld [vmem:[%s6906_s9 + $0x120] sm:$0xff] }
 0x5d6   : > { %3342 = vmatpush.bf16.msrb.mxu1 %v5023_v1  ;;  %v5018_v57 = vld [vmem:[%s6906_s9 + $0x110] sm:$0xff] }
 0x5d7   : > { %v2692_v7 = vsel %vm2691_vm15, %v5194_v38, %v2688_v28  ;;  %v2846_v2 = vpack.c.bf16 %v6333_v29, %v6333_v29  ;;  %v5021_v28 = vld [vmem:[%s6906_s9 + $0x128] sm:$0xff] }
 0x5d8   : > { %v2697_v51 = vsel %vm2694_vm0, %v2696_v46, %v2692_v7  ;;  %v5007_v46 = vld [vmem:[%s5512_s19 + $0xb8] sm:$0xff] }
 0x5d9   : > { %v2730_v22 = vsub.f32 1.0, %v2697_v51  ;;  %v2714_v19 = vmul.f32 %v2697_v51, %v6101_v62  ;;  %v2878_v31 = vunpack.c.l.b16 %v2846_v2  ;;  %v5019_v7 = vld [vmem:[%s6906_s9 + $0x118] sm:$0xff]  ;;  %v5017_v51 = vld [vmem:[%s6906_s9 + $0x108] sm:$0xff] }
 0x5da   : > { %3343 = vmatpush.bf16.msrb.mxu1 %v5022_v33 }
 0x5db   : > { %v2746_v49 = vmul.f32 %v2730_v22, %v5941_v3  ;;  %v5016_v22 = vld [vmem:[%s6906_s9 + $0x100] sm:$0xff] }
 0x5dd   : > { %v6337_v41 = vadd.f32 %v2746_v49, %v2714_v19  ;;  %v6378_v19 = vld [vmem:[%s6907_s10 + $0x8] sm:$0xf] }
 0x5de   : > { %3344 = vmatpush.bf16.msrb.mxu1 %v5021_v28  ;;  %v6381_v49 = vperm.slane %v6378_v19, 0  ;;  %v6384_v2 = vperm.slane %v6378_v19, 1 }
 0x5df   : > { %v2847_v9 = vpack.c.bf16 %v6337_v41, %v6337_v41 }
 0x5e1   : > { %v2879_v37 = vunpack.c.l.b16 %v2847_v9 }
 0x5e2   : > { %3345 = vmatpush.bf16.msrb.mxu1 %v5020_v35 }
 0x5e3   : > { %v2887_v58 = vpack.c.b16 %v2879_v37, %v2878_v31  ;;  %v6388_v37 = vperm.slane %v6378_v19, 2 }
 0x5e5   : > { %2987 = vmatmul.bf16.gmra.mxu2 %v2887_v58  ;;  %3434 = vmatmul.bf16.gmra.mxu0 %v2887_v58 }
 0x5e6   : > { %3346 = vmatpush.bf16.msrb.mxu1 %v5019_v7 }
 0x5ea   : > { %3347 = vmatpush.bf16.msrb.mxu1 %v5018_v57 }
 0x5ee   : > { %3348 = vmatpush.bf16.msrb.mxu1 %v5017_v51 }
 0x5f2   : > { %3349 = vmatpush.bf16.msrb.mxu1 %v5016_v22 }
 0x5f8   : > { %v2953_v42 = vpop.f32.mrf.mxu2 }
 0x600   : > { %v2955_v43 = vpop.f32.mrf.mxu2 }
 0x601   : > { %v2993_v47 = vpack.c.bf16 %v2955_v43, %v2953_v42 }
 0x608   : > { %v2958_v21 = vpop.f32.mrf.mxu2 }
 0x610   : > { %v2960_v62 = vpop.f32.mrf.mxu2 }
 0x611   : > { %v2994_v61 = vpack.c.bf16 %v2960_v62, %v2958_v21 }
 0x618   : > { %v2963_v3 = vpop.f32.mrf.mxu2 }
 0x620   : > { %v2965_v26 = vpop.f32.mrf.mxu2 }
 0x621   : > { %v2995_v55 = vpack.c.bf16 %v2965_v26, %v2963_v3 }
 0x628   : > { %v2968_v23 = vpop.f32.mrf.mxu2 }
 0x630   : > { %v2970_v17 = vpop.f32.mrf.mxu2 }
 0x631   : > { %v2996_v27 = vpack.c.bf16 %v2970_v17, %v2968_v23 }
 0x638   : > { %v2973_v45 = vpop.f32.mrf.mxu2 }
 0x640   : > { %v2975_v50 = vpop.f32.mrf.mxu2 }
 0x641   : > { %v2997_v20 = vpack.c.bf16 %v2975_v50, %v2973_v45 }
 0x648   : > { %v2978_v25 = vpop.f32.mrf.mxu2 }
 0x650   : > { %v2980_v24 = vpop.f32.mrf.mxu2 }
 0x651   : > { %v2998_v63 = vpack.c.bf16 %v2980_v24, %v2978_v25 }
 0x658   : > { %v2983_v53 = vpop.f32.mrf.mxu2 }
 0x660   : > { %v2985_v14 = vpop.f32.mrf.mxu2 }
 0x661   : > { %v2999_v32 = vpack.c.bf16 %v2985_v14, %v2983_v53 }
 0x668   : > { %v2988_v13 = vpop.f32.mrf.mxu2 }
 0x670   : > { %v2990_v38 = vpop.f32.mrf.mxu2 }
 0x671   : > { %v3000_v18 = vpack.c.bf16 %v2990_v38, %v2988_v13 }
 0x673   : > { %3050 = vmatpush.bf16.msrb.mxu3 %v3000_v18 }
 0x677   : > { %3051 = vmatpush.bf16.msrb.mxu3 %v2999_v32 }
 0x67b   : > { %3052 = vmatpush.bf16.msrb.mxu3 %v2998_v63 }
 0x67f   : > { %3053 = vmatpush.bf16.msrb.mxu3 %v2997_v20 }
 0x683   : > { %3054 = vmatpush.bf16.msrb.mxu3 %v2996_v27 }
 0x687   : > { %3055 = vmatpush.bf16.msrb.mxu3 %v2995_v55 }
 0x68b   : > { %3056 = vmatpush.bf16.msrb.mxu3 %v2994_v61 }
 0x68f   : > { %3057 = vmatpush.bf16.msrb.mxu3 %v2993_v47 }
 0x692   : > { %3058 = vmatmul.bf16.vlgmr.msrb.gmra.mxu3 %v5000_v5 }
 0x6a2   : > { %3063 = vmatmul.bf16.gmra.mxu3 %v5001_v12 }
 0x6b2   : > { %3068 = vmatmul.bf16.gmra.mxu3 %v5002_v54 }
 0x6c2   : > { %3073 = vmatmul.bf16.gmra.mxu3 %v5003_v40 }
 0x6d2   : > { %3078 = vmatmul.bf16.gmra.mxu3 %v5004_v44 }
 0x6e2   : > { %3083 = vmatmul.bf16.gmra.mxu3 %v5005_v36 }
 0x6f2   : > { %3088 = vmatmul.bf16.gmra.mxu3 %v5006_v10 }
 0x702   : > { %3093 = vmatmul.bf16.gmra.mxu3 %v5007_v46 }
 0x715   : > { %v3059_v9 = vpop.f32.mrf.mxu3 }
 0x716   : > { %v3060_v31 = vadd.f32 %v3059_v9, %v6381_v49 }
 0x718   : > { %v3100_v58 = vmul.f32 %v6384_v2, %v3060_v31 }
 0x71a   : > { %v3117_v42 = vadd.f32 %v6388_v37, %v3100_v58 }
 0x71c   : > { %v3149_v47 = vmul.f32 0.01, %v3117_v42  ;;  %vm3133_vm1 = vcmp.gt.f32.partialorder %v3117_v42, 0.0 }
 0x71d   : > { %v3061_v43 = vpop.f32.mrf.mxu3 }
 0x71e   : > { %v3062_v21 = vadd.f32 %v3061_v43, %v6381_v49  ;;  %v6394_v61 = vsel %vm3133_vm1, %v3117_v42, %v3149_v47 }
 0x71f   : > { %v3181_v55 = vpack.c.bf16 %v6394_v61, %v6394_v61 }
 0x720   : > { %v3101_v62 = vmul.f32 %v6384_v2, %v3062_v21 }
 0x721   : > { %v3213_v25 = vunpack.c.l.b16 %v3181_v55 }
 0x722   : > { %v3118_v3 = vadd.f32 %v6388_v37, %v3101_v62 }
 0x724   : > { %vm3134_vm2 = vcmp.gt.f32.partialorder %v3118_v3, 0.0  ;;  %v3150_v26 = vmul.f32 0.01, %v3118_v3 }
 0x725   : > { %v3064_v23 = vpop.f32.mrf.mxu3 }
 0x726   : > { %v6399_v17 = vsel %vm3134_vm2, %v3118_v3, %v3150_v26  ;;  %v3065_v27 = vadd.f32 %v3064_v23, %v6381_v49 }
 0x727   : > { %v3182_v45 = vpack.c.bf16 %v6399_v17, %v6399_v17 }
 0x728   : > { %v3102_v50 = vmul.f32 %v6384_v2, %v3065_v27 }
 0x729   : > { %v3214_v24 = vunpack.c.l.b16 %v3182_v45 }
 0x72a   : > { %v3119_v53 = vadd.f32 %v6388_v37, %v3102_v50 }
 0x72b   : > { %v3229_v14 = vpack.c.b16 %v3214_v24, %v3213_v25 }
 0x72c   : > { %v3151_v38 = vmul.f32 0.01, %v3119_v53  ;;  %vm3135_vm3 = vcmp.gt.f32.partialorder %v3119_v53, 0.0 }
 0x72d   : > { %v3066_v13 = vpop.f32.mrf.mxu3  ;;  %3350 = vmatmul.bf16.vlgmr.msrb.gmra.mxu1 %v3229_v14 }
 0x72e   : > { %v3067_v18 = vadd.f32 %v3066_v13, %v6381_v49  ;;  %v6409_v20 = vsel %vm3135_vm3, %v3119_v53, %v3151_v38 }
 0x72f   : > { %v3183_v54 = vpack.c.bf16 %v6409_v20, %v6409_v20 }
 0x730   : > { %v3103_v32 = vmul.f32 %v6384_v2, %v3067_v18 }
 0x731   : > { %v3215_v33 = vunpack.c.l.b16 %v3183_v54 }
 0x732   : > { %v3120_v63 = vadd.f32 %v6388_v37, %v3103_v32 }
 0x734   : > { %vm3136_vm4 = vcmp.gt.f32.partialorder %v3120_v63, 0.0  ;;  %v3152_v5 = vmul.f32 0.01, %v3120_v63 }
 0x735   : > { %v3069_v12 = vpop.f32.mrf.mxu3 }
 0x736   : > { %v3070_v40 = vadd.f32 %v3069_v12, %v6381_v49  ;;  %v6414_v44 = vsel %vm3136_vm4, %v3120_v63, %v3152_v5 }
 0x737   : > { %v3184_v36 = vpack.c.bf16 %v6414_v44, %v6414_v44 }
 0x738   : > { %v3104_v1 = vmul.f32 %v6384_v2, %v3070_v40 }
 0x739   : > { %v3216_v10 = vunpack.c.l.b16 %v3184_v36 }
 0x73a   : > { %v3121_v28 = vadd.f32 %v6388_v37, %v3104_v1 }
 0x73b   : > { %v3230_v35 = vpack.c.b16 %v3216_v10, %v3215_v33 }
 0x73c   : > { %v3153_v7 = vmul.f32 0.01, %v3121_v28  ;;  %vm3137_vm5 = vcmp.gt.f32.partialorder %v3121_v28, 0.0 }
 0x73d   : > { %v3071_v46 = vpop.f32.mrf.mxu3  ;;  %3355 = vmatmul.bf16.gmra.mxu1 %v3230_v35 }
 0x73e   : > { %v3072_v57 = vadd.f32 %v3071_v46, %v6381_v49  ;;  %v6423_v9 = vsel %vm3137_vm5, %v3121_v28, %v3153_v7 }
 0x73f   : > { %v3185_v42 = vpack.c.bf16 %v6423_v9, %v6423_v9 }
 0x740   : > { %v3105_v51 = vmul.f32 %v6384_v2, %v3072_v57 }
 0x741   : > { %v3217_v3 = vunpack.c.l.b16 %v3185_v42 }
 0x742   : > { %v3122_v22 = vadd.f32 %v6388_v37, %v3105_v51 }
 0x744   : > { %vm3138_vm6 = vcmp.gt.f32.partialorder %v3122_v22, 0.0  ;;  %v3154_v31 = vmul.f32 0.01, %v3122_v22 }
 0x745   : > { %v3074_v58 = vpop.f32.mrf.mxu3 }
 0x746   : > { %v3075_v43 = vadd.f32 %v3074_v58, %v6381_v49  ;;  %v6428_v47 = vsel %vm3138_vm6, %v3122_v22, %v3154_v31 }
 0x747   : > { %v3186_v21 = vpack.c.bf16 %v6428_v47, %v6428_v47 }
 0x748   : > { %v3106_v62 = vmul.f32 %v6384_v2, %v3075_v43 }
 0x749   : > { %v3218_v26 = vunpack.c.l.b16 %v3186_v21 }
 0x74a   : > { %v3123_v55 = vadd.f32 %v6388_v37, %v3106_v62 }
 0x74b   : > { %v3231_v23 = vpack.c.b16 %v3218_v26, %v3217_v3 }
 0x74c   : > { %v3155_v45 = vmul.f32 0.01, %v3123_v55  ;;  %vm3139_vm7 = vcmp.gt.f32.partialorder %v3123_v55, 0.0 }
 0x74d   : > { %v3076_v27 = vpop.f32.mrf.mxu3  ;;  %3360 = vmatmul.bf16.gmra.mxu1 %v3231_v23 }
 0x74e   : > { %v3077_v50 = vadd.f32 %v3076_v27, %v6381_v49  ;;  %v6437_v53 = vsel %vm3139_vm7, %v3123_v55, %v3155_v45  ;;  %v5047_v27 = vld [vmem:[%s6902_s5 + $0x78] sm:$0xff] }
 0x74f   : > { %v3187_v38 = vpack.c.bf16 %v6437_v53, %v6437_v53  ;;  %3974 = vmatpush.bf16.msra.mxu1 %v5047_v27 }
 0x750   : > { %v3107_v25 = vmul.f32 %v6384_v2, %v3077_v50 }
 0x751   : > { %v3219_v12 = vunpack.c.l.b16 %v3187_v38 }
 0x752   : > { %v3124_v24 = vadd.f32 %v6388_v37, %v3107_v25 }
 0x754   : > { %vm3140_vm8 = vcmp.gt.f32.partialorder %v3124_v24, 0.0  ;;  %v3156_v14 = vmul.f32 0.01, %v3124_v24 }
 0x755   : > { %v3079_v13 = vpop.f32.mrf.mxu3 }
 0x756   : > { %v3080_v18 = vadd.f32 %v3079_v13, %v6381_v49  ;;  %v6442_v32 = vsel %vm3140_vm8, %v3124_v24, %v3156_v14  ;;  %v5046_v24 = vld [vmem:[%s6902_s5 + $0x70] sm:$0xff]  ;;  %v5045_v13 = vld [vmem:[%s6902_s5 + $0x68] sm:$0xff] }
 0x757   : > { %v3188_v63 = vpack.c.bf16 %v6442_v32, %v6442_v32  ;;  %3975 = vmatpush.bf16.msra.mxu1 %v5046_v24 }
 0x758   : > { %v3108_v5 = vmul.f32 %v6384_v2, %v3080_v18 }
 0x759   : > { %v3220_v54 = vunpack.c.l.b16 %v3188_v63 }
 0x75a   : > { %v3125_v40 = vadd.f32 %v6388_v37, %v3108_v5 }
 0x75b   : > { %v3232_v36 = vpack.c.b16 %v3220_v54, %v3219_v12  ;;  %3976 = vmatpush.bf16.msra.mxu1 %v5045_v13 }
 0x75c   : > { %v3157_v33 = vmul.f32 0.01, %v3125_v40  ;;  %vm3141_vm9 = vcmp.gt.f32.partialorder %v3125_v40, 0.0 }
 0x75d   : > { %v3081_v1 = vpop.f32.mrf.mxu3  ;;  %3365 = vmatmul.bf16.gmra.mxu1 %v3232_v36 }
 0x75e   : > { %v3082_v10 = vadd.f32 %v3081_v1, %v6381_v49  ;;  %v6451_v46 = vsel %vm3141_vm9, %v3125_v40, %v3157_v33  ;;  %v5044_v40 = vld [vmem:[%s6902_s5 + $0x60] sm:$0xff] }
 0x75f   : > { %v3189_v51 = vpack.c.bf16 %v6451_v46, %v6451_v46  ;;  %3977 = vmatpush.bf16.msra.mxu1 %v5044_v40 }
 0x760   : > { %v3109_v28 = vmul.f32 %v6384_v2, %v3082_v10 }
 0x761   : > { %v3221_v43 = vunpack.c.l.b16 %v3189_v51 }
 0x762   : > { %v3126_v35 = vadd.f32 %v6388_v37, %v3109_v28 }
 0x764   : > { %vm3142_vm10 = vcmp.gt.f32.partialorder %v3126_v35, 0.0  ;;  %v3158_v7 = vmul.f32 0.01, %v3126_v35 }
 0x765   : > { %v3084_v57 = vpop.f32.mrf.mxu3 }
 0x766   : > { %v3085_v22 = vadd.f32 %v3084_v57, %v6381_v49  ;;  %v6456_v31 = vsel %vm3142_vm10, %v3126_v35, %v3158_v7  ;;  %v5043_v35 = vld [vmem:[%s6902_s5 + $0x58] sm:$0xff] }
 0x767   : > { %v3190_v58 = vpack.c.bf16 %v6456_v31, %v6456_v31  ;;  %3978 = vmatpush.bf16.msra.mxu1 %v5043_v35 }
 0x768   : > { %v3110_v42 = vmul.f32 %v6384_v2, %v3085_v22  ;;  %v5042_v22 = vld [vmem:[%s6902_s5 + $0x50] sm:$0xff] }
 0x769   : > { %v3222_v21 = vunpack.c.l.b16 %v3190_v58 }
 0x76a   : > { %v3127_v62 = vadd.f32 %v6388_v37, %v3110_v42 }
 0x76b   : > { %v3233_v3 = vpack.c.b16 %v3222_v21, %v3221_v43  ;;  %3979 = vmatpush.bf16.msra.mxu1 %v5042_v22  ;;  %v5041_v21 = vld [vmem:[%s6902_s5 + $0x48] sm:$0xff] }
 0x76c   : > { %v3159_v55 = vmul.f32 0.01, %v3127_v62  ;;  %vm3143_vm11 = vcmp.gt.f32.partialorder %v3127_v62, 0.0 }
 0x76d   : > { %v3086_v26 = vpop.f32.mrf.mxu3  ;;  %3370 = vmatmul.bf16.gmra.mxu1 %v3233_v3 }
 0x76e   : > { %v3087_v23 = vadd.f32 %v3086_v26, %v6381_v49  ;;  %v6468_v25 = vsel %vm3143_vm11, %v3127_v62, %v3159_v55 }
 0x76f   : > { %v3191_v18 = vpack.c.bf16 %v6468_v25, %v6468_v25  ;;  %3980 = vmatpush.bf16.msra.mxu1 %v5041_v21 }
 0x770   : > { %v3111_v45 = vmul.f32 %v6384_v2, %v3087_v23 }
 0x771   : > { %v3223_v36 = vunpack.c.l.b16 %v3191_v18  ;;  %v3400_v18 = vpop.f32.mrf.mxu0 }
 0x772   : > { %v3128_v50 = vadd.f32 %v6388_v37, %v3111_v45 }
 0x774   : > { %vm3144_vm12 = vcmp.gt.f32.partialorder %v3128_v50, 0.0  ;;  %v3160_v14 = vmul.f32 0.01, %v3128_v50 }
 0x775   : > { %v3089_v38 = vpop.f32.mrf.mxu3 }
 0x776   : > { %v3090_v63 = vadd.f32 %v3089_v38, %v6381_v49  ;;  %v6479_v5 = vsel %vm3144_vm12, %v3128_v50, %v3160_v14  ;;  %v5040_v14 = vld [vmem:[%s6902_s5 + $0x40] sm:$0xff] }
 0x777   : > { %v3192_v12 = vpack.c.bf16 %v6479_v5, %v6479_v5  ;;  %3981 = vmatpush.bf16.msra.mxu1 %v5040_v14 }
 0x778   : > { %v3112_v54 = vmul.f32 %v6384_v2, %v3090_v63 }
 0x779   : > { %v3224_v1 = vunpack.c.l.b16 %v3192_v12  ;;  %v3402_v35 = vpop.f32.mrf.mxu0 }
 0x77a   : > { %v3129_v33 = vadd.f32 %v6388_v37, %v3112_v54 }
 0x77b   : > { %v3234_v10 = vpack.c.b16 %v3224_v1, %v3223_v36 }
 0x77c   : > { %v3161_v7 = vmul.f32 0.01, %v3129_v33  ;;  %vm3145_vm13 = vcmp.gt.f32.partialorder %v3129_v33, 0.0 }
 0x77d   : > { %v3091_v28 = vpop.f32.mrf.mxu3  ;;  %3375 = vmatmul.bf16.gmra.mxu1 %v3234_v10 }
 0x77e   : > { %v3092_v57 = vadd.f32 %v3091_v28, %v6381_v49  ;;  %v6497_v42 = vsel %vm3145_vm13, %v3129_v33, %v3161_v7 }
 0x77f   : > { %v3193_v3 = vpack.c.bf16 %v6497_v42, %v6497_v42 }
 0x780   : > { %v3113_v51 = vmul.f32 %v6384_v2, %v3092_v57 }
 0x781   : > { %v3225_v45 = vunpack.c.l.b16 %v3193_v3 }
 0x782   : > { %v3130_v58 = vadd.f32 %v6388_v37, %v3113_v51 }
 0x784   : > { %vm3146_vm14 = vcmp.gt.f32.partialorder %v3130_v58, 0.0  ;;  %v3162_v43 = vmul.f32 0.01, %v3130_v58 }
 0x785   : > { %v3094_v62 = vpop.f32.mrf.mxu3 }
 0x786   : > { %v3095_v26 = vadd.f32 %v3094_v62, %v6381_v49  ;;  %v6505_v55 = vsel %vm3146_vm14, %v3130_v58, %v3162_v43  ;;  %v6533_v58 = vperm.slane %v6378_v19, 3 }
 0x787   : > { %v3194_v23 = vpack.c.bf16 %v6505_v55, %v6505_v55 }
 0x788   : > { %v3114_v27 = vmul.f32 %v6384_v2, %v3095_v26 }
 0x789   : > { %v3226_v50 = vunpack.c.l.b16 %v3194_v23 }
 0x78a   : > { %v3131_v24 = vadd.f32 %v6388_v37, %v3114_v27 }
 0x78b   : > { %v3235_v13 = vpack.c.b16 %v3226_v50, %v3225_v45 }
 0x78c   : > { %v3163_v63 = vmul.f32 0.01, %v3131_v24  ;;  %vm3147_vm15 = vcmp.gt.f32.partialorder %v3131_v24, 0.0 }
 0x78d   : > { %v3096_v38 = vpop.f32.mrf.mxu3  ;;  %3380 = vmatmul.bf16.gmra.mxu1 %v3235_v13 }
 0x78e   : > { %v3097_v12 = vadd.f32 %v3096_v38, %v6381_v49  ;;  %v6517_v36 = vsel %vm3147_vm15, %v3131_v24, %v3163_v63 }
 0x78f   : > { %v3195_v33 = vpack.c.bf16 %v6517_v36, %v6517_v36 }
 0x790   : > { %v3115_v54 = vmul.f32 %v6384_v2, %v3097_v12  ;;  %v3405_v2 = vpop.f32.mrf.mxu0 }
 0x791   : > { %v3227_v7 = vunpack.c.l.b16 %v3195_v33 }
 0x792   : > { %v3132_v40 = vadd.f32 %v6388_v37, %v3115_v54  ;;  %v6528_v37 = vld [vmem:[%s6904_s7] sm:$0xf] }
 0x793   : > { %v615_v51 = vperm.slane %v6528_v37, 1 }
 0x794   : > { %vm3148_vm0 = vcmp.gt.f32.partialorder %v3132_v40, 0.0  ;;  %v3164_v1 = vmul.f32 0.01, %v3132_v40 }
 0x795   : > { %v674_v22 = vadd.f32 %v5666_v0, %v615_v51 }
 0x796   : > { %v6521_v10 = vsel %vm3148_vm0, %v3132_v40, %v3164_v1 }
 0x797   : > { %v3196_v28 = vpack.c.bf16 %v6521_v10, %v6521_v10  ;;  %v3831_v21 = vpack.c.bf16 %v674_v22, %v674_v22 }
 0x798   : > { %v3407_v3 = vpop.f32.mrf.mxu0 }
 0x799   : > { %v3228_v49 = vunpack.c.l.b16 %v3196_v28 }
 0x79b   : > { %v3236_v57 = vpack.c.b16 %v3228_v49, %v3227_v7 }
 0x79d   : > { %3385 = vmatmul.bf16.gmra.mxu1 %v3236_v57 }
 0x7a0   : > { %v3410_v24 = vpop.f32.mrf.mxu0 }
 0x7a8   : > { %v3412_v40 = vpop.f32.mrf.mxu0 }
 0x7aa   : > { %v3351_v43 = vpop.f32.mrf.mxu1 }
 0x7ab   : > { %v3352_v62 = vadd.f32 %v3351_v43, %v6533_v58 }
 0x7ad   : > { %v3401_v26 = vadd.f32 %v3400_v18, %v3352_v62  ;;  %3982 = vmatmul.bf16.vlgmr.msra.gmra.mxu1 %v3831_v21 }
 0x7af   : > { %v4802_v23 = vmul.f32 -1.442695, %v3401_v26 }
 0x7b1   : > { %5195 = vpow2.f32 %v4802_v23 }
 0x7b2   : > { %v3353_v27 = vpop.f32.mrf.mxu1 }
 0x7b3   : > { %v3354_v45 = vadd.f32 %v3353_v27, %v6533_v58  ;;  %v6541_v27 = vpop.f32.mrf.mxu0 }
 0x7b5   : > { %v3403_v50 = vadd.f32 %v3402_v35, %v3354_v45 }
 0x7b7   : > { %v5196_v14 = vpop.eup %5195  ;;  %v4803_v13 = vmul.f32 -1.442695, %v3403_v50 }
 0x7b8   : > { %v3488_v0 = vadd.f32 1.0, %v5196_v14 }
 0x7b9   : > { %5197 = vpow2.f32 %v4803_v13 }
 0x7ba   : > { %5199 = vrcp.f32 %v3488_v0  ;;  %v3356_v19 = vpop.f32.mrf.mxu1  ;;  %v3515_v62 = vand.u32 2147483648, %v3488_v0  ;;  %vm3509_vm2 = vweird.f32 %v3488_v0  ;;  %v3513_v23 = vand.u32 2147483647, %v3488_v0 }
 0x7bb   : > { %v3357_v38 = vadd.f32 %v3356_v19, %v6533_v58 }
 0x7bc   : > { %v3516_v13 = vor.u32 1.1754944e-38, %v3515_v62  ;;  %vm3514_vm4 = vcmp.eq.f32.partialorder %v3513_v23, 8.507059e+37 }
 0x7bd   : > { %v3406_v63 = vadd.f32 %v3405_v2, %v3357_v38 }
 0x7bf   : > { %v5198_v12 = vpop.eup %5197  ;;  %v4804_v54 = vmul.f32 -1.442695, %v3406_v63 }
 0x7c0   : > { %v5200_v18 = vpop.eup %5199  ;;  %v3489_v1 = vadd.f32 1.0, %v5198_v12 }
 0x7c1   : > { %v3505_v33 = vmul.f32 %v5200_v18, %v3488_v0  ;;  %5201 = vpow2.f32 %v4804_v54  ;;  %vm3510_vm1 = vweird.f32 %v5200_v18 }
 0x7c2   : > { %5203 = vrcp.f32 %v3489_v1  ;;  %v3358_v28 = vpop.f32.mrf.mxu1  ;;  %vm3511_vm3 = vmor %vm3509_vm2, %vm3510_vm1  ;;  %v3530_v19 = vand.u32 2147483648, %v3489_v1  ;;  %v3528_v54 = vand.u32 2147483647, %v3489_v1  ;;  %vm3524_vm6 = vweird.f32 %v3489_v1 }
 0x7c3   : > { %v3506_v35 = vsub.f32 1.0, %v3505_v33  ;;  %v3359_v7 = vadd.f32 %v3358_v28, %v6533_v58 }
 0x7c4   : > { %vm3529_vm8 = vcmp.eq.f32.partialorder %v3528_v54, 8.507059e+37 }
 0x7c5   : > { %v3408_v49 = vadd.f32 %v3407_v3, %v3359_v7  ;;  %v3507_v57 = vmul.f32 %v5200_v18, %v3506_v35 }
 0x7c7   : > { %v5202_v51 = vpop.eup %5201  ;;  %v4805_v22 = vmul.f32 -1.442695, %v3408_v49  ;;  %v3508_v43 = vadd.f32 %v5200_v18, %v3507_v57  ;;  %v3531_v49 = vor.u32 1.1754944e-38, %v3530_v19 }
 0x7c8   : > { %v5204_v21 = vpop.eup %5203  ;;  %v6539_v2 = vadd.f32 1.0, %v5202_v51 }
 0x7c9   : > { %v3520_v26 = vmul.f32 %v5204_v21, %v3489_v1  ;;  %5205 = vpow2.f32 %v4805_v22  ;;  %v3512_v14 = vsel %vm3511_vm3, %v5200_v18, %v3508_v43  ;;  %vm3525_vm5 = vweird.f32 %v5204_v21 }
 0x7ca   : > { %5207 = vrcp.f32 %v6539_v2  ;;  %v3361_v45 = vpop.f32.mrf.mxu1  ;;  %v3517_v12 = vsel %vm3514_vm4, %v3516_v13, %v3512_v14  ;;  %vm3526_vm7 = vmor %vm3524_vm6, %vm3525_vm5  ;;  %vm3539_vm10 = vweird.f32 %v6539_v2 }
 0x7cb   : > { %v3521_v3 = vsub.f32 1.0, %v3520_v26  ;;  %v3362_v50 = vadd.f32 %v3361_v45, %v6533_v58  ;;  %v3760_v51 = vsub.f32 1.0, %v3517_v12  ;;  %v3417_v26 = vpop.f32.mrf.mxu0 }
 0x7cd   : > { %v3411_v38 = vadd.f32 %v3410_v24, %v3362_v50  ;;  %v3522_v63 = vmul.f32 %v5204_v21, %v3521_v3  ;;  %v3776_v3 = vmul.f32 %v3760_v51, %v6166_v34 }
 0x7cf   : > { %v5206_v33 = vpop.eup %5205  ;;  %v4806_v0 = vmul.f32 -1.442695, %v3411_v38  ;;  %v3523_v28 = vadd.f32 %v5204_v21, %v3522_v63  ;;  %v3744_v38 = vmul.f32 %v3517_v12, %v6394_v61 }
 0x7d0   : > { %v5208_v35 = vpop.eup %5207  ;;  %v6545_v7 = vadd.f32 1.0, %v5206_v33 }
 0x7d1   : > { %v3535_v57 = vmul.f32 %v5208_v35, %v6539_v2  ;;  %5209 = vpow2.f32 %v4806_v0  ;;  %v3527_v18 = vsel %vm3526_vm7, %v5204_v21, %v3523_v28  ;;  %vm3540_vm9 = vweird.f32 %v5208_v35 }
 0x7d2   : > { %5211 = vrcp.f32 %v6545_v7  ;;  %v3363_v24 = vpop.f32.mrf.mxu1  ;;  %v3532_v62 = vsel %vm3529_vm8, %v3531_v49, %v3527_v18  ;;  %vm3541_vm11 = vmor %vm3539_vm10, %vm3540_vm9  ;;  %v3560_v18 = vand.u32 2147483648, %v6545_v7  ;;  %vm3554_vm14 = vweird.f32 %v6545_v7 }
 0x7d3   : > { %v3536_v22 = vsub.f32 1.0, %v3535_v57  ;;  %v3364_v43 = vadd.f32 %v3363_v24, %v6533_v58  ;;  %v3761_v1 = vsub.f32 1.0, %v3532_v62  ;;  %v3745_v50 = vmul.f32 %v3532_v62, %v6399_v17  ;;  %v3420_v24 = vpop.f32.mrf.mxu0 }
 0x7d4   : > { %v6562_v17 = vadd.f32 %v3776_v3, %v3744_v38  ;;  %v3561_v3 = vor.u32 1.1754944e-38, %v3560_v18 }
 0x7d5   : > { %v3413_v23 = vadd.f32 %v3412_v40, %v3364_v43  ;;  %v3537_v45 = vmul.f32 %v5208_v35, %v3536_v22  ;;  %v3777_v14 = vmul.f32 %v3761_v1, %v6172_v11  ;;  %v3545_v40 = vand.u32 2147483648, %v6539_v2 }
 0x7d6   : > { %v3543_v11 = vand.u32 2147483647, %v6539_v2  ;;  %v3558_v43 = vand.u32 2147483647, %v6545_v7 }
 0x7d7   : > { %v5210_v21 = vpop.eup %5209  ;;  %v4807_v13 = vmul.f32 -1.442695, %v3413_v23  ;;  %v3538_v19 = vadd.f32 %v5208_v35, %v3537_v45  ;;  %v6558_v33 = vadd.f32 %v3777_v14, %v3745_v50  ;;  %v3546_v57 = vor.u32 1.1754944e-38, %v3545_v40 }
 0x7d8   : > { %v5212_v63 = vpop.eup %5211  ;;  %v6554_v54 = vadd.f32 1.0, %v5210_v21  ;;  %vm3544_vm12 = vcmp.eq.f32.partialorder %v3543_v11, 8.507059e+37  ;;  %vm3559_vm0 = vcmp.eq.f32.partialorder %v3558_v43, 8.507059e+37 }
 0x7d9   : > { %v3550_v34 = vmul.f32 %v5212_v63, %v6545_v7  ;;  %5213 = vpow2.f32 %v4807_v13  ;;  %v3542_v28 = vsel %vm3541_vm11, %v5208_v35, %v3538_v19  ;;  %vm3555_vm13 = vweird.f32 %v5212_v63 }
 0x7da   : > { %5215 = vrcp.f32 %v6554_v54  ;;  %v3366_v0 = vpop.f32.mrf.mxu1  ;;  %v3547_v22 = vsel %vm3544_vm12, %v3546_v57, %v3542_v28  ;;  %vm3556_vm15 = vmor %vm3554_vm14, %vm3555_vm13  ;;  %v3573_v43 = vand.u32 2147483647, %v6554_v54  ;;  %vm3569_vm2 = vweird.f32 %v6554_v54 }
 0x7db   : > { %v3551_v61 = vsub.f32 1.0, %v3550_v34  ;;  %v3367_v12 = vadd.f32 %v3366_v0, %v6533_v58  ;;  %v3762_v14 = vsub.f32 1.0, %v3547_v22  ;;  %v3746_v57 = vmul.f32 %v3547_v22, %v6409_v20 }
 0x7dc   : > { %vm3574_vm4 = vcmp.eq.f32.partialorder %v3573_v43, 8.507059e+37 }
 0x7dd   : > { %v3416_v51 = vadd.f32 %v6541_v27, %v3367_v12  ;;  %v3552_v2 = vmul.f32 %v5212_v63, %v3551_v61  ;;  %v3778_v7 = vmul.f32 %v3762_v14, %v6191_v48 }
 0x7df   : > { %v5214_v62 = vpop.eup %5213  ;;  %v4808_v1 = vmul.f32 -1.442695, %v3416_v51  ;;  %v3553_v23 = vadd.f32 %v5212_v63, %v3552_v2  ;;  %v6578_v51 = vpop.f32.mrf.mxu0 }
 0x7e0   : > { %v5216_v35 = vpop.eup %5215  ;;  %v3493_v45 = vadd.f32 1.0, %v5214_v62 }
 0x7e1   : > { %v3565_v50 = vmul.f32 %v5216_v35, %v6554_v54  ;;  %5217 = vpow2.f32 %v4808_v1  ;;  %v3557_v27 = vsel %vm3556_vm15, %v5212_v63, %v3553_v23  ;;  %vm3570_vm1 = vweird.f32 %v5216_v35 }
 0x7e2   : > { %5219 = vrcp.f32 %v3493_v45  ;;  %v3368_v21 = vpop.f32.mrf.mxu1  ;;  %v3562_v38 = vsel %vm3559_vm0, %v3561_v3, %v3557_v27  ;;  %vm3571_vm3 = vmor %vm3569_vm2, %vm3570_vm1  ;;  %v3590_v14 = vand.u32 2147483648, %v3493_v45  ;;  %vm3584_vm6 = vweird.f32 %v3493_v45 }
 0x7e3   : > { %v3566_v13 = vsub.f32 1.0, %v3565_v50  ;;  %v3369_v19 = vadd.f32 %v3368_v21, %v6533_v58  ;;  %v3763_v40 = vsub.f32 1.0, %v3562_v38  ;;  %v3747_v0 = vmul.f32 %v3562_v38, %v6414_v44 }
 0x7e4   : > { %v3588_v21 = vand.u32 2147483647, %v3493_v45 }
 0x7e5   : > { %v3418_v34 = vadd.f32 %v3417_v26, %v3369_v19  ;;  %v3567_v11 = vmul.f32 %v5216_v35, %v3566_v13  ;;  %v3779_v61 = vmul.f32 %v3763_v40, %v6199_v4  ;;  %v3575_v26 = vand.u32 2147483648, %v6554_v54 }
 0x7e6   : > { %v6585_v4 = vadd.f32 %v3778_v7, %v3746_v57  ;;  %vm3589_vm8 = vcmp.eq.f32.partialorder %v3588_v21, 8.507059e+37 }
 0x7e7   : > { %v5218_v12 = vpop.eup %5217  ;;  %v4809_v28 = vmul.f32 -1.442695, %v3418_v34  ;;  %v3568_v63 = vadd.f32 %v5216_v35, %v3567_v11  ;;  %v6582_v62 = vadd.f32 %v3779_v61, %v3747_v0  ;;  %v3576_v3 = vor.u32 1.1754944e-38, %v3575_v26  ;;  %v3425_v0 = vpop.f32.mrf.mxu0 }
 0x7e8   : > { %v5220_v18 = vpop.eup %5219  ;;  %v3494_v2 = vadd.f32 1.0, %v5218_v12  ;;  %v3591_v11 = vor.u32 1.1754944e-38, %v3590_v14 }
 0x7e9   : > { %v3580_v48 = vmul.f32 %v5220_v18, %v3493_v45  ;;  %5221 = vpow2.f32 %v4809_v28  ;;  %v3572_v1 = vsel %vm3571_vm3, %v5216_v35, %v3568_v63  ;;  %vm3585_vm5 = vweird.f32 %v5220_v18 }
 0x7ea   : > { %5223 = vrcp.f32 %v3494_v2  ;;  %v3371_v44 = vpop.f32.mrf.mxu1  ;;  %v3577_v54 = vsel %vm3574_vm4, %v3576_v3, %v3572_v1  ;;  %vm3586_vm7 = vmor %vm3584_vm6, %vm3585_vm5  ;;  %vm3599_vm10 = vweird.f32 %v3494_v2  ;;  %v3603_v1 = vand.u32 2147483647, %v3494_v2 }
 0x7eb   : > { %v3581_v20 = vsub.f32 1.0, %v3580_v48  ;;  %v3372_v22 = vadd.f32 %v3371_v44, %v6533_v58  ;;  %v3764_v7 = vsub.f32 1.0, %v3577_v54  ;;  %v3605_v44 = vand.u32 2147483648, %v3494_v2 }
 0x7ec   : > { %vm3604_vm12 = vcmp.eq.f32.partialorder %v3603_v1, 8.507059e+37 }
 0x7ed   : > { %v6590_v50 = vadd.f32 %v3420_v24, %v3372_v22  ;;  %v3582_v27 = vmul.f32 %v5220_v18, %v3581_v20  ;;  %v3780_v57 = vmul.f32 %v3764_v7, %v6221_v6  ;;  %v3606_v21 = vor.u32 1.1754944e-38, %v3605_v44 }
 0x7ef   : > { %v5222_v13 = vpop.eup %5221  ;;  %v3583_v19 = vadd.f32 %v5220_v18, %v3582_v27 }
 0x7f0   : > { %v5224_v38 = vpop.eup %5223  ;;  %v3495_v40 = vadd.f32 1.0, %v5222_v13 }
 0x7f1   : > { %v3595_v34 = vmul.f32 %v5224_v38, %v3494_v2  ;;  %v3587_v35 = vsel %vm3586_vm7, %v5220_v18, %v3583_v19  ;;  %vm3600_vm9 = vweird.f32 %v5224_v38  ;;  %v3748_v18 = vmul.f32 %v3577_v54, %v6423_v9 }
 0x7f2   : > { %5225 = vrcp.f32 %v3495_v40  ;;  %v3373_v61 = vpop.f32.mrf.mxu1  ;;  %v3592_v12 = vsel %vm3589_vm8, %v3591_v11, %v3587_v35  ;;  %vm3601_vm11 = vmor %vm3599_vm10, %vm3600_vm9  ;;  %v3620_v54 = vand.u32 2147483648, %v3495_v40  ;;  %v3618_v19 = vand.u32 2147483647, %v3495_v40 }
 0x7f3   : > { %v3596_v24 = vsub.f32 1.0, %v3595_v34  ;;  %v3765_v28 = vsub.f32 1.0, %v3592_v12  ;;  %v3749_v43 = vmul.f32 %v3592_v12, %v6428_v47  ;;  %v6598_v3 = vadd.f32 %v3780_v57, %v3748_v18  ;;  %v3427_v47 = vpop.f32.mrf.mxu0 }
 0x7f4   : > { %vm3614_vm14 = vweird.f32 %v3495_v40  ;;  %v3621_v35 = vor.u32 1.1754944e-38, %v3620_v54  ;;  %v3374_v7 = vadd.f32 %v3373_v61, %v6533_v58  ;;  %vm3619_vm0 = vcmp.eq.f32.partialorder %v3618_v19, 8.507059e+37 }
 0x7f5   : > { %v3597_v63 = vmul.f32 %v5224_v38, %v3596_v24  ;;  %v3781_v45 = vmul.f32 %v3765_v28, %v6228_v39 }
 0x7f6   : > { %v3423_v57 = vadd.f32 %v6578_v51, %v3374_v7 }
 0x7f7   : > { %v3598_v26 = vadd.f32 %v5224_v38, %v3597_v63  ;;  %v6596_v20 = vadd.f32 %v3781_v45, %v3749_v43 }
 0x7f8   : > { %v5226_v48 = vpop.eup %5225 }
 0x7f9   : > { %v3610_v22 = vmul.f32 %v5226_v48, %v3495_v40  ;;  %v3602_v14 = vsel %vm3601_vm11, %v5224_v38, %v3598_v26  ;;  %vm3615_vm13 = vweird.f32 %v5226_v48 }
 0x7fa   : > { %v3376_v27 = vpop.f32.mrf.mxu1  ;;  %v3607_v13 = vsel %vm3604_vm12, %v3606_v21, %v3602_v14  ;;  %vm3616_vm15 = vmor %vm3614_vm14, %vm3615_vm13 }
 0x7fb   : > { %v3611_v6 = vsub.f32 1.0, %v3610_v22  ;;  %v3766_v11 = vsub.f32 1.0, %v3607_v13  ;;  %v3430_v63 = vpop.f32.mrf.mxu0  ;;  %v3377_v40 = vadd.f32 %v3376_v27, %v6533_v58  ;;  %v3750_v26 = vmul.f32 %v3607_v13, %v6437_v53 }
 0x7fd   : > { %v3612_v9 = vmul.f32 %v5226_v48, %v3611_v6  ;;  %v3782_v28 = vmul.f32 %v3766_v11, %v6250_v56  ;;  %v3426_v22 = vadd.f32 %v3425_v0, %v3377_v40 }
 0x7ff   : > { %v3613_v34 = vadd.f32 %v5226_v48, %v3612_v9  ;;  %v6611_v61 = vadd.f32 %v3782_v28, %v3750_v26  ;;  %v4812_v1 = vmul.f32 -1.442695, %v3426_v22 }
 0x801   : > { %v3617_v2 = vsel %vm3616_vm15, %v5226_v48, %v3613_v34  ;;  %v4811_v48 = vmul.f32 -1.442695, %v3423_v57 }
 0x802   : > { %v3378_v38 = vpop.f32.mrf.mxu1  ;;  %v3622_v24 = vsel %vm3619_vm0, %v3621_v35, %v3617_v2 }
 0x803   : > { %v3767_v12 = vsub.f32 1.0, %v3622_v24  ;;  %v3751_v43 = vmul.f32 %v3622_v24, %v6442_v32  ;;  %v4810_v32 = vmul.f32 -1.442695, %v6590_v50  ;;  %5227 = vpow2.f32 %v4811_v48  ;;  %v3432_v53 = vpop.f32.mrf.mxu0 }
 0x805   : > { %v3783_v45 = vmul.f32 %v3767_v12, %v6257_v15  ;;  %v3379_v15 = vadd.f32 %v3378_v38, %v6533_v58  ;;  %5229 = vpow2.f32 %v4810_v32 }
 0x806   : > { %5231 = vpow2.f32 %v4812_v1 }
 0x807   : > { %v6609_v18 = vadd.f32 %v3783_v45, %v3751_v43  ;;  %v3428_v6 = vadd.f32 %v3427_v47, %v3379_v15 }
 0x809   : > { %v5228_v9 = vpop.eup %5227  ;;  %v4813_v54 = vmul.f32 -1.442695, %v3428_v6 }
 0x80a   : > { %v3381_v44 = vpop.f32.mrf.mxu1  ;;  %v6619_v34 = vadd.f32 1.0, %v5228_v9 }
 0x80b   : > { %v3382_v56 = vadd.f32 %v3381_v44, %v6533_v58  ;;  %v5230_v19 = vpop.eup %5229  ;;  %v3435_v11 = vpop.f32.mrf.mxu0 }
 0x80c   : > { %v5232_v2 = vpop.eup %5231  ;;  %v6621_v35 = vadd.f32 1.0, %v5230_v19  ;;  %vm3644_vm1 = vweird.f32 %v6619_v34 }
 0x80d   : > { %v3431_v27 = vadd.f32 %v3430_v63, %v3382_v56  ;;  %v6625_v38 = vadd.f32 1.0, %v5232_v2 }
 0x80f   : > { %v4814_v21 = vmul.f32 -1.442695, %v3431_v27  ;;  %vm3659_vm8 = vweird.f32 %v6625_v38 }
 0x811   : > { %5233 = vpow2.f32 %v4814_v21 }
 0x812   : > { %v3383_v14 = vpop.f32.mrf.mxu1  ;;  %5235 = vpow2.f32 %v4813_v54 }
 0x813   : > { %v3384_v0 = vadd.f32 %v3383_v14, %v6533_v58  ;;  %v3437_v56 = vpop.f32.mrf.mxu0 }
 0x815   : > { %v3433_v13 = vadd.f32 %v3432_v53, %v3384_v0 }
 0x817   : > { %v4815_v50 = vmul.f32 -1.442695, %v3433_v13  ;;  %v5234_v24 = vpop.eup %5233 }
 0x818   : > { %v5236_v28 = vpop.eup %5235  ;;  %v6629_v43 = vadd.f32 1.0, %v5234_v24 }
 0x819   : > { %5237 = vpow2.f32 %v4815_v50  ;;  %v6635_v26 = vadd.f32 1.0, %v5236_v28 }
 0x81a   : > { %v3386_v47 = vpop.f32.mrf.mxu1  ;;  %5239 = vrcp.f32 %v6619_v34  ;;  %vm3689_vm15 = vweird.f32 %v6629_v43 }
 0x81b   : > { %v3387_v7 = vadd.f32 %v3386_v47, %v6533_v58  ;;  %5241 = vrcp.f32 %v6621_v35  ;;  %vm3674_vm5 = vweird.f32 %v6635_v26 }
 0x81c   : > { %5243 = vrcp.f32 %v6625_v38 }
 0x81d   : > { %v3436_v12 = vadd.f32 %v3435_v11, %v3387_v7 }
 0x81f   : > { %v5238_v63 = vpop.eup %5237  ;;  %v4816_v57 = vmul.f32 -1.442695, %v3436_v12 }
 0x820   : > { %v6631_v45 = vadd.f32 1.0, %v5238_v63  ;;  %v6633_v40 = vpop.eup %5239  ;;  %v3665_v63 = vand.u32 2147483648, %v6625_v38 }
 0x821   : > { %5245 = vpow2.f32 %v4816_v57  ;;  %v6638_v44 = vpop.eup %5241  ;;  %v3640_v32 = vmul.f32 %v6633_v40, %v6619_v34  ;;  %vm3645_vm2 = vweird.f32 %v6633_v40  ;;  %v3693_v57 = vand.u32 2147483647, %v6629_v43 }
 0x822   : > { %5247 = vrcp.f32 %v6631_v45  ;;  %v3388_v48 = vpop.f32.mrf.mxu1  ;;  %v6645_v1 = vpop.eup %5243  ;;  %v3625_v27 = vmul.f32 %v6638_v44, %v6621_v35  ;;  %v6690_v49 = vor.u32 1.1754944e-38, %v3665_v63  ;;  %vm6694_vm3 = vmor %vm3644_vm1, %vm3645_vm2  ;;  %v3680_v63 = vand.u32 2147483648, %v6635_v26 }
 0x823   : > { %v3389_v22 = vadd.f32 %v3388_v48, %v6533_v58  ;;  %5249 = vrcp.f32 %v6629_v43  ;;  %v3641_v21 = vsub.f32 1.0, %v3640_v32  ;;  %v3655_v54 = vmul.f32 %v6645_v1, %v6625_v38 }
 0x824   : > { %5251 = vrcp.f32 %v6635_v26  ;;  %v3626_v9 = vsub.f32 1.0, %v3625_v27  ;;  %vm3660_vm4 = vweird.f32 %v6645_v1  ;;  %vm3630_vm13 = vweird.f32 %v6638_v44 }
 0x825   : > { %v3438_v15 = vadd.f32 %v3437_v56, %v3389_v22  ;;  %v3642_v2 = vmul.f32 %v6633_v40, %v3641_v21  ;;  %v3656_v47 = vsub.f32 1.0, %v3655_v54  ;;  %vm3704_vm14 = vweird.f32 %v6631_v45 }
 0x826   : > { %v3627_v24 = vmul.f32 %v6638_v44, %v3626_v9  ;;  %vm3629_vm1 = vweird.f32 %v6621_v35 }
 0x827   : > { %v5246_v53 = vpop.eup %5245  ;;  %v4817_v6 = vmul.f32 -1.442695, %v3438_v15  ;;  %v6676_v32 = vadd.f32 %v6633_v40, %v3642_v2  ;;  %v3657_v54 = vmul.f32 %v6645_v1, %v3656_v47  ;;  %v3678_v47 = vand.u32 2147483647, %v6635_v26 }
 0x828   : > { %v6649_v14 = vpop.eup %5247  ;;  %v6651_v58 = vadd.f32 1.0, %v5246_v53 }
 0x829   : > { %5253 = vpow2.f32 %v4817_v6  ;;  %v6653_v0 = vpop.eup %5249  ;;  %v3700_v50 = vmul.f32 %v6649_v14, %v6631_v45  ;;  %vm3705_vm7 = vweird.f32 %v6649_v14  ;;  %v3695_v6 = vand.u32 2147483648, %v6629_v43 }
 0x82a   : > { %5255 = vrcp.f32 %v6651_v58  ;;  %v6658_v13 = vpop.f32.mrf.mxu1  ;;  %v6660_v19 = vpop.eup %5251  ;;  %v3685_v11 = vmul.f32 %v6653_v0, %v6629_v43  ;;  %vm3719_vm9 = vweird.f32 %v6651_v58  ;;  %vm3690_vm11 = vweird.f32 %v6653_v0  ;;  %vm6735_vm0 = vmor %vm3704_vm14, %vm3705_vm7 }
 0x82b   : > { %6910 = vst [vmem:[#allocation2_spill] sm:$0xff] %v6658_v13  ;;  %v3670_v7 = vmul.f32 %v6660_v19, %v6635_v26  ;;  %v3701_v28 = vsub.f32 1.0, %v3700_v50  ;;  %v6686_v50 = vadd.f32 %v6638_v44, %v3627_v24  ;;  %vm3675_vm12 = vweird.f32 %v6660_v19 }
 0x82c   : > { %v3686_v15 = vsub.f32 1.0, %v3685_v11  ;;  %v3696_v53 = vor.u32 1.1754944e-38, %v3695_v6  ;;  %vm3694_vm14 = vcmp.eq.f32.partialorder %v3693_v57, 8.507059e+37 }
 0x82d   : > { %v3671_v21 = vsub.f32 1.0, %v3670_v7  ;;  %v3710_v7 = vand.u32 2147483648, %v6631_v45 }
 0x82f   : > { %v5254_v12 = vpop.eup %5253  ;;  %v3672_v39 = vmul.f32 %v6660_v19, %v3671_v21 }
 0x830   : > { %v5256_v22 = vpop.eup %5255  ;;  %v6673_v56 = vadd.f32 1.0, %v5254_v12  ;;  %v3702_v12 = vmul.f32 %v6649_v14, %v3701_v28  ;;  %v3687_v28 = vmul.f32 %v6653_v0, %v3686_v15 }
 0x831   : > { %v3715_v27 = vmul.f32 %v5256_v22, %v6651_v58  ;;  %vm3720_vm6 = vweird.f32 %v5256_v22  ;;  %v3673_v11 = vadd.f32 %v6660_v19, %v3672_v39  ;;  %v3711_v39 = vor.u32 1.1754944e-38, %v3710_v7 }
 0x832   : > { %5257 = vrcp.f32 %v6673_v56  ;;  %v3985_v9 = vpop.f32.mrf.mxu1  ;;  %v3703_v15 = vadd.f32 %v6649_v14, %v3702_v12  ;;  %vm6717_vm10 = vmor %vm3719_vm9, %vm3720_vm6  ;;  %v3688_v12 = vadd.f32 %v6653_v0, %v3687_v28  ;;  %v3740_v28 = vand.u32 2147483648, %v6673_v56 }
 0x833   : > { %v3716_v2 = vsub.f32 1.0, %v3715_v27  ;;  %v3725_v27 = vand.u32 2147483648, %v6651_v58  ;;  %v6710_v9 = vadd.f32 %v6645_v1, %v3657_v54  ;;  %v3708_v54 = vand.u32 2147483647, %v6631_v45  ;;  %vm6748_vm6 = vmor %vm3689_vm15, %vm3690_vm11 }
 0x834   : > { %v3707_v45 = vsel %vm6735_vm0, %v6649_v14, %v3703_v15  ;;  %v3692_v43 = vsel %vm6748_vm6, %v6653_v0, %v3688_v12  ;;  %vm3734_vm11 = vweird.f32 %v6673_v56  ;;  %v3741_v0 = vor.u32 1.1754944e-38, %v3740_v28 }
 0x835   : > { %v3717_v24 = vmul.f32 %v5256_v22, %v3716_v2  ;;  %v3723_v2 = vand.u32 2147483647, %v6651_v58  ;;  %vm3709_vm7 = vcmp.eq.f32.partialorder %v3708_v54, 8.507059e+37  ;;  %v3681_v54 = vor.u32 1.1754944e-38, %v3680_v63 }
 0x836   : > { %v3712_v15 = vsel %vm3709_vm7, %v3711_v39, %v3707_v45  ;;  %v3697_v6 = vsel %vm3694_vm14, %v3696_v53, %v3692_v43  ;;  %vm3679_vm15 = vcmp.eq.f32.partialorder %v3678_v47, 8.507059e+37  ;;  %v6923_v12 = vand.u32 2147483647, %v6625_v38 }
 0x837   : > { %v3718_v51 = vadd.f32 %v5256_v22, %v3717_v24  ;;  %v3726_v24 = vor.u32 1.1754944e-38, %v3725_v27  ;;  %vm3724_vm2 = vcmp.eq.f32.partialorder %v3723_v2, 8.507059e+37  ;;  %v3738_v2 = vand.u32 2147483647, %v6673_v56 }
 0x838   : > { %v5258_v48 = vpop.eup %5257  ;;  %v3772_v27 = vsub.f32 1.0, %v3697_v6  ;;  %v6929_v14 = vand.u32 2147483647, %v6621_v35 }
 0x839   : > { %v3730_v21 = vmul.f32 %v5258_v48, %v6673_v56  ;;  %v3722_v58 = vsel %vm6717_vm10, %v5256_v22, %v3718_v51  ;;  %vm3735_vm9 = vweird.f32 %v5258_v48  ;;  %vm6760_vm10 = vmor %vm3674_vm5, %vm3675_vm12  ;;  %vm3739_vm0 = vcmp.eq.f32.partialorder %v3738_v2, 8.507059e+37 }
 0x83a   : > { %v3727_v22 = vsel %vm3724_vm2, %v3726_v24, %v3722_v58  ;;  %v3677_v7 = vsel %vm6760_vm10, %v6660_v19, %v3673_v11  ;;  %vm6772_vm5 = vmor %vm3659_vm8, %vm3660_vm4  ;;  %v3773_v56 = vsub.f32 1.0, %v3712_v15  ;;  %vm3664_vm4 = vcmp.eq.f32.partialorder %v6923_v12, 8.507059e+37  ;;  %v5033_v12 = vld [vmem:[%s6902_s5 + $0x8] sm:$0xff] }
 0x83b   : > { %v3731_v51 = vsub.f32 1.0, %v3730_v21  ;;  %v3774_v58 = vsub.f32 1.0, %v3727_v22  ;;  %vm3736_vm12 = vmor %vm3734_vm11, %vm3735_vm9  ;;  %v3662_v19 = vsel %vm6772_vm5, %v6645_v1, %v6710_v9  ;;  %v3682_v11 = vsel %vm3679_vm15, %v3681_v54, %v3677_v7  ;;  %v5039_v54 = vld [vmem:[%s6902_s5 + $0x38] sm:$0xff] }
 0x83c   : > { %v6924_v24 = vand.u32 2147483647, %v6619_v34  ;;  %v3667_v1 = vsel %vm3664_vm4, %v6690_v49, %v3662_v19  ;;  %vm6792_vm2 = vmor %vm3629_vm1, %vm3630_vm13  ;;  %v3771_v38 = vsub.f32 1.0, %v3682_v11  ;;  %v3758_v47 = vmul.f32 %v3727_v22, %v6517_v36  ;;  %3961 = vmatpush.bf16.msra.mxu3 %v5039_v54 }
 0x83d   : > { %v3732_v13 = vmul.f32 %v5258_v48, %v3731_v51  ;;  %v6925_v51 = vand.u32 2147483648, %v6619_v34  ;;  %v3790_v28 = vmul.f32 %v3774_v58, %v6333_v29  ;;  %v3632_v34 = vsel %vm6792_vm2, %v6638_v44, %v6686_v50 }
 0x83e   : > { %vm3649_vm8 = vcmp.eq.f32.partialorder %v6924_v24, 8.507059e+37  ;;  %v6928_v29 = vsel %vm6694_vm3, %v6633_v40, %v6676_v32  ;;  %v3789_v2 = vmul.f32 %v3773_v56, %v6325_v30  ;;  %v3770_v43 = vsub.f32 1.0, %v3667_v1 }
 0x83f   : > { %v3733_v21 = vadd.f32 %v5258_v48, %v3732_v13  ;;  %v3651_v57 = vor.u32 1.1754944e-38, %v6925_v51  ;;  %vm3634_vm13 = vcmp.eq.f32.partialorder %v6929_v14, 8.507059e+37  ;;  %v6930_v44 = vand.u32 2147483648, %v6621_v35  ;;  %v5050_v51 = vld [vmem:[%s6903_s6 + $0x10] sm:$0xff] }
 0x840   : > { %v3806_v23 = vadd.f32 %v3790_v28, %v3758_v47  ;;  %v3757_v40 = vmul.f32 %v3712_v15, %v6505_v55  ;;  %v3788_v32 = vmul.f32 %v3772_v27, %v6321_v59  ;;  %v3787_v30 = vmul.f32 %v3771_v38, %v6312_v8  ;;  %v5038_v59 = vld [vmem:[%s6902_s5 + $0x30] sm:$0xff]  ;;  %v5049_v27 = vld [vmem:[%s6903_s6 + $0x8] sm:$0xff] }
 0x841   : > { %v3737_v13 = vsel %vm3736_vm12, %v5258_v48, %v3733_v21  ;;  %v3652_v49 = vsel %vm3649_vm8, %v3651_v57, %v6928_v29  ;;  %v3636_v50 = vor.u32 1.1754944e-38, %v6930_v44  ;;  %v3755_v21 = vmul.f32 %v3682_v11, %v6479_v5  ;;  %3962 = vmatpush.bf16.msra.mxu3 %v5038_v59  ;;  %v6935_v29 = vld [vmem:[#allocation2_spill] sm:$0xff] }
 0x842   : > { %v3742_v63 = vsel %vm3739_vm0, %v3741_v0, %v3737_v13  ;;  %v3769_v22 = vsub.f32 1.0, %v3652_v49  ;;  %v3805_v7 = vadd.f32 %v3789_v2, %v3757_v40  ;;  %v3786_v55 = vmul.f32 %v3770_v43, %v6305_v52  ;;  %v5037_v52 = vld [vmem:[%s6902_s5 + $0x28] sm:$0xff] }
 0x843   : > { %v3775_v45 = vsub.f32 1.0, %v3742_v63  ;;  %v3759_v9 = vmul.f32 %v3742_v63, %v6521_v10  ;;  %v3637_v36 = vsel %vm3634_vm13, %v3636_v50, %v3632_v34  ;;  %v3754_v58 = vmul.f32 %v3667_v1, %v6468_v25  ;;  %v5048_v1 = vld [vmem:[%s6903_s6] sm:$0xff] }
 0x844   : > { %v3768_v15 = vsub.f32 1.0, %v3637_v36  ;;  %v3803_v8 = vadd.f32 %v3787_v30, %v3755_v21  ;;  %v3785_v26 = vmul.f32 %v3769_v22, %v6286_v60  ;;  %v3752_v13 = vmul.f32 %v3637_v36, %v6451_v46  ;;  %v5036_v60 = vld [vmem:[%s6902_s5 + $0x20] sm:$0xff]  ;;  %v5034_v46 = vld [vmem:[%s6902_s5 + $0x10] sm:$0xff] }
 0x845   : > { %v3791_v39 = vmul.f32 %v3775_v45, %v6337_v41  ;;  %v3756_v41 = vmul.f32 %v3697_v6, %v6497_v42  ;;  %v3802_v0 = vadd.f32 %v3786_v55, %v3754_v58  ;;  %v3753_v6 = vmul.f32 %v3652_v49, %v6456_v31  ;;  %3963 = vmatpush.bf16.msra.mxu3 %v5037_v52 }
 0x846   : > { %v3784_v5 = vmul.f32 %v3768_v15, %v6279_v16  ;;  %v5035_v16 = vld [vmem:[%s6902_s5 + $0x18] sm:$0xff]  ;;  %v6931_v31 = vpack.c.bf16 %v6609_v18, %v6611_v61  ;;  %v6932_v63 = vpack.c.bf16 %v6596_v20, %v6598_v3  ;;  %v6933_v24 = vpack.c.bf16 %v6582_v62, %v6585_v4  ;;  %v3808_v61 = vld [vmem:[%s6908_s11] sm:$0xf] }
 0x847   : > { %v3807_v53 = vadd.f32 %v3791_v39, %v3759_v9  ;;  %v3804_v35 = vadd.f32 %v3788_v32, %v3756_v41  ;;  %v3814_v19 = vpack.c.bf16 %v3803_v8, %v3802_v0  ;;  %v3801_v56 = vadd.f32 %v3785_v26, %v3753_v6  ;;  %v5032_v20 = vld [vmem:[%s6902_s5] sm:$0xff]  ;;  %v5055_v62 = vld [vmem:[%s6903_s6 + $0x38] sm:$0xff] }
 0x848   : > { %v3800_v25 = vadd.f32 %v3784_v5, %v3752_v13  ;;  %v6934_v18 = vpack.c.bf16 %v6558_v33, %v6562_v17  ;;  %v5054_v33 = vld [vmem:[%s6903_s6 + $0x30] sm:$0xff]  ;;  %v5053_v17 = vld [vmem:[%s6903_s6 + $0x28] sm:$0xff]  ;;  %v5052_v4 = vld [vmem:[%s6903_s6 + $0x20] sm:$0xff]  ;;  %v3864_v48 = vperm.slane %v6528_v37, 2  ;;  %v4007_v43 = vperm.slane %v6528_v37, 3 }
 0x849   : > { %v3816_v10 = vpack.c.bf16 %v3807_v53, %v3806_v23  ;;  %v3815_v42 = vpack.c.bf16 %v3805_v7, %v3804_v35  ;;  %3964 = vmatpush.bf16.msra.mxu3 %v5036_v60  ;;  %v5051_v3 = vld [vmem:[%s6903_s6 + $0x18] sm:$0xff] }
 0x84a   : > { %v3813_v11 = vpack.c.bf16 %v3801_v56, %v3800_v25 }
 0x84b   : > { %3817 = vmatpush.bf16.msrb.mxu2 %v3816_v10 }
 0x84d   : > { %3965 = vmatpush.bf16.msra.mxu3 %v5035_v16 }
 0x84f   : > { %3818 = vmatpush.bf16.msrb.mxu2 %v3815_v42 }
 0x851   : > { %3966 = vmatpush.bf16.msra.mxu3 %v5034_v46 }
 0x853   : > { %3819 = vmatpush.bf16.msrb.mxu2 %v3814_v19 }
 0x855   : > { %3967 = vmatpush.bf16.msra.mxu3 %v5033_v12 }
 0x857   : > { %3820 = vmatpush.bf16.msrb.mxu2 %v3813_v11 }
 0x859   : > { %3968 = vmatpush.bf16.msra.mxu3 %v5032_v20 }
 0x85b   : > { %3821 = vmatpush.bf16.msrb.mxu2 %v6931_v31 }
 0x85f   : > { %3822 = vmatpush.bf16.msrb.mxu2 %v6932_v63 }
 0x863   : > { %3823 = vmatpush.bf16.msrb.mxu2 %v6933_v24 }
 0x867   : > { %3824 = vmatpush.bf16.msrb.mxu2 %v6934_v18 }
 0x86a   : > { %3825 = vmatmul.bf16.vlgmr.msrb.gmra.mxu2 %v3808_v61 }
 0x86b   : > { %4056 = vmatpush.bf16.msra.mxu2 %v5055_v62 }
 0x86f   : > { %4057 = vmatpush.bf16.msra.mxu2 %v5054_v33 }
 0x873   : > { %4058 = vmatpush.bf16.msra.mxu2 %v5053_v17 }
 0x877   : > { %4059 = vmatpush.bf16.msra.mxu2 %v5052_v4 }
 0x87b   : > { %4060 = vmatpush.bf16.msra.mxu2 %v5051_v3 }
 0x87f   : > { %4061 = vmatpush.bf16.msra.mxu2 %v5050_v51 }
 0x883   : > { %4062 = vmatpush.bf16.msra.mxu2 %v5049_v27 }
 0x887   : > { %4063 = vmatpush.bf16.msra.mxu2 %v5048_v1 }
 0x8ed   : > { %v3826_v57 = vpop.f32.mrf.mxu2 }
 0x8ee   : > { %v3830_v45 = vpack.c.bf16 %v3826_v57, %v3826_v57 }
 0x8f0   : > { %3969 = vmatmul.bf16.vlgmr.msra.gmra.mxu3 %v3830_v45 }
 0x8f5   : > { %v3828_v28 = vpop.f32.mrf.mxu2 }
 0x973   : > { %v3970_v38 = vpop.f32.mrf.mxu3 }
 0x974   : > { %v3971_v34 = vadd.f32 %v3970_v38, %v3864_v48 }
 0x976   : > { %v3984_v49 = vadd.f32 %v6935_v29, %v3971_v34 }
 0x978   : > { %vm3987_vm3 = vcmp.gt.f32.partialorder %v3984_v49, 0.0  ;;  %v3988_v47 = vmul.f32 0.01, %v3984_v49 }
 0x97a   : > { %v3989_v9 = vsel %vm3987_vm3, %v3984_v49, %v3988_v47 }
 0x97b   : > { %v3990_v39 = vpack.c.bf16 %v3989_v9, %v3989_v9  ;;  %v3972_v2 = vpop.f32.mrf.mxu3 }
 0x97d   : > { %4064 = vmatmul.bf16.vlgmr.msra.gmra.mxu2 %v3990_v39 }
 0xa00   : > { %v4065_v14 = vpop.f32.mrf.mxu2 }
 0xa01   : > { %v4066_v44 = vadd.f32 %v4065_v14, %v4007_v43 }
 0xa03   : > { %v4914_v50 = vmul.f32 -1.442695, %v4066_v44 }
 0xa05   : > { %5259 = vpow2.f32 %v4914_v50 }
 0xa08   : > { %v4067_v23 = vpop.f32.mrf.mxu2 }
 0xa0b   : > { %v5260_v53 = vpop.eup %5259 }
 0xa0c   : > { %v4072_v40 = vadd.f32 1.0, %v5260_v53 }
 0xa0e   : > { %5261 = vrcp.f32 %v4072_v40  ;;  %v4084_v10 = vand.u32 2147483648, %v4072_v40  ;;  %v4082_v7 = vand.u32 2147483647, %v4072_v40  ;;  %vm4078_vm6 = vweird.f32 %v4072_v40 }
 0xa10   : > { %v4085_v37 = vor.u32 1.1754944e-38, %v4084_v10  ;;  %vm4083_vm9 = vcmp.eq.f32.partialorder %v4082_v7, 8.507059e+37 }
 0xa14   : > { %v5262_v32 = vpop.eup %5261 }
 0xa15   : > { %v4074_v36 = vmul.f32 %v5262_v32, %v4072_v40  ;;  %vm4079_vm1 = vweird.f32 %v5262_v32 }
 0xa16   : > { %vm4080_vm7 = vmor %vm4078_vm6, %vm4079_vm1 }
 0xa17   : > { %v4075_v22 = vsub.f32 1.0, %v4074_v36 }
 0xa19   : > { %v4076_v41 = vmul.f32 %v5262_v32, %v4075_v22 }
 0xa1b   : > { %v4077_v30 = vadd.f32 %v5262_v32, %v4076_v41 }
 0xa1d   : > { %v4081_v54 = vsel %vm4080_vm7, %v5262_v32, %v4077_v30 }
 0xa1e   : > { %v4086_v35 = vsel %vm4083_vm9, %v4085_v37, %v4081_v54 }
 0xa1f   : > { %4088 = vst [vmem:[%s448_s13] sm:$0xff] %v4086_v35 }
 0xa20 PF: > { %s22_s21 = sadd.s32 1, %s5270_s21  }
 0xa21   : > { %p19_p4 = scmp.ge.s32.totalorder %s22_s21, 4  }
 0xa23   :  { %21 = sbr.rel (!%p19_p4) target bundleno = 1 (0x1), region = 112 }

</bundles_post_ra>
